<compile_context>
chip_gen: v5e
topology: v5e:2x2
jax: 0.10.0
libtpu: 0.0.40
codegen_flags: <defaults>
</compile_context>

<pallas_src>
import numpy as np
import jax
import jax.numpy as jnp
from jax.experimental import pallas as pl
from jax.experimental.pallas import tpu as pltpu

NEG_SLOPE = 0.1            # nn.LeakyReLU(negative_slope=0.1) in the module
MXU_DTYPE = jnp.bfloat16   # conv matmul operand dtype (f32 accumulate); jnp.float32 for exact f32
HALO = 3                   # shared zero halo, sized for the 7x7 spatial-attention conv


def _lrelu(v):
    return jnp.where(v >= 0, v, NEG_SLOPE * v)


def _sigmoid(v):
    return 1.0 / (1.0 + jnp.exp(-v))


# ----------------------------- Pallas kernel -----------------------------

def _make_kernel(H, W, C):
    WC = W * C
    WpC = (W + 2 * HALO) * C
    P = HALO

    def conv(pad_ref, src, wf_ref, ksize, pad, bias=None):
        # src: (H, W*C) f32 activation in the lane-dense (h, w*C + c) layout.
        # wf_ref: (ksize, (W+2*HALO)*C, W*Cout) folded banded weight (kw + cin folded),
        #         one MXU matmul per row tap kh with a wide contraction dim.
        pad_ref[P:P + H, P * C:(P + W) * C] = src          # interior; halo already zero
        acc = jnp.zeros((H, wf_ref.shape[2]), jnp.float32)
        r0 = P - pad
        for kh in range(ksize):
            slab = pad_ref[r0 + kh:r0 + kh + H, :].astype(MXU_DTYPE)   # (H, WpC)
            acc = acc + jnp.dot(slab, wf_ref[kh], preferred_element_type=jnp.float32)
        if bias is not None:
            acc = acc + bias
        return acc

    def kernel(x_ref,
               wf_sq, wf_ext, b_ext, wf_r1a, b_r1a, wf_r1b,
               wf_r2a, b_r2a, wf_r2b,
               w_dn, b_dn, w_up, b_up,
               wf_sp, b_sp,
               o_ref, pad_ref):
        # Zero only the halo strips (every conv fully rewrites the interior).
        zr = jnp.zeros((P, WpC), jnp.float32)
        pad_ref[0:P, :] = zr
        pad_ref[P + H:P + H + P, :] = zr
        zc = jnp.zeros((H, P * C), jnp.float32)
        pad_ref[P:P + H, 0:P * C] = zc
        pad_ref[P:P + H, (P + W) * C:] = zc

        x = x_ref[0]                                        # (H, W*C) f32

        # square_conv (no bias) -> lrelu -> extract_conv (bias) -> + x
        t = _lrelu(conv(pad_ref, x, wf_sq, 3, 1))
        t = x + conv(pad_ref, t, wf_ext, 3, 1, b_ext[...])

        # res_block1 / res_block2 (SimpleBlock depth=2): conv(bias)->lrelu->conv(no bias)
        r = _lrelu(conv(pad_ref, t, wf_r1a, 3, 1, b_r1a[...]))
        t = t + conv(pad_ref, r, wf_r1b, 3, 1)
        r = _lrelu(conv(pad_ref, t, wf_r2a, 3, 1, b_r2a[...]))
        t = t + conv(pad_ref, r, wf_r2b, 3, 1)

        # Squeeze-excite: global avg pool -> 1x1 down -> lrelu -> 1x1 up -> sigmoid.
        # Pool-over-w and the broadcast back to the lane-dense layout are folded
        # into w_dn / w_up on the host, so everything stays (.., W*C) here.
        rowsum = jnp.sum(t, axis=0, keepdims=True)          # (1, W*C)
        z = _lrelu(jnp.dot(rowsum, w_dn[...], preferred_element_type=jnp.float32)
                   + b_dn[...])                              # (1, Chp)
        se = _sigmoid(jnp.dot(z, w_up[...], preferred_element_type=jnp.float32)
                      + b_up[...])                           # (1, W*C)

        # 7x7 spatial attention; Cout=1 is pre-broadcast to C in the folded weight,
        # so the matmul output is already lane-dense.
        sp = _sigmoid(conv(pad_ref, t, wf_sp, 7, 3, b_sp[...]))   # (H, W*C)

        # x_temp + x_temp*se + x_temp*sp  ==  x_temp * (1 + se + sp)
        o_ref[0] = t * (1.0 + se + sp)

    return kernel


# ----------------------------- host-side weight folding -----------------------------

def _fold_conv(w, W, C, pad):
    """(K, K, Cin, Cout) HWIO conv -> (K, (W+2*HALO)*Cin, W*Cout) banded row-tap matrices."""
    w = np.asarray(w, np.float32)
    K, _, Cin, Cout = w.shape
    Wp = W + 2 * HALO
    M = np.zeros((K, Wp * Cin, W * Cout), np.float32)
    for kh in range(K):
        for kw in range(K):
            for wo in range(W):
                r = (wo + kw + HALO - pad) * Cin
                M[kh, r:r + Cin, wo * Cout:(wo + 1) * Cout] = w[kh, kw]
    return M


def _lane_dense_bias(b, W):
    b = np.asarray(b, np.float32).reshape(1, -1)
    return np.tile(b, (1, W))                              # (1, W*C), index w*C+c -> b[c]


def prepare_params(params, H, W, C):
    """Fold the module's weights into the lane-dense kernel layout (host side, once)."""
    (w_sq, w_ext, b_ext, w_r1a, b_r1a, w_r1b, w_r2a, b_r2a, w_r2b,
     w_dn, b_dn, w_up, b_up, w_sp, b_sp) = params
    md = MXU_DTYPE

    def fold3(w):
        return jnp.asarray(_fold_conv(w, W, C, pad=1), md)

    # 7x7 spatial attention: broadcast Cout 1 -> C so the matmul output is lane-dense.
    w_sp_b = np.repeat(np.asarray(w_sp, np.float32), C, axis=3)
    wf_sp = jnp.asarray(_fold_conv(w_sp_b, W, C, pad=3), md)
    b_sp_d = jnp.full((1, W * C), float(np.asarray(b_sp).reshape(-1)[0]), jnp.float32)

    # SE folds: G[w*C+c, c] = 1 groups lanes by channel.
    G = np.tile(np.eye(C, dtype=np.float32), (W, 1))                 # (W*C, C)
    Ch = int(np.asarray(w_dn).shape[1])
    Chp = max(8, ((Ch + 7) // 8) * 8)                                # pad hidden dim to >=8 lanes
    w_dn_f = np.zeros((W * C, Chp), np.float32)
    w_dn_f[:, :Ch] = (G / float(H * W)) @ np.asarray(w_dn, np.float32)
    b_dn_p = np.zeros((1, Chp), np.float32)
    b_dn_p[:, :Ch] = np.asarray(b_dn, np.float32).reshape(1, -1)
    w_up_f = np.zeros((Chp, W * C), np.float32)
    w_up_f[:Ch, :] = np.asarray(w_up, np.float32) @ G.T
    b_up_f = np.asarray(b_up, np.float32).reshape(1, -1) @ G.T       # (1, W*C)

    return (
        fold3(w_sq),
        fold3(w_ext), jnp.asarray(_lane_dense_bias(b_ext, W)),
        fold3(w_r1a), jnp.asarray(_lane_dense_bias(b_r1a, W)),
        fold3(w_r1b),
        fold3(w_r2a), jnp.asarray(_lane_dense_bias(b_r2a, W)),
        fold3(w_r2b),
        jnp.asarray(w_dn_f), jnp.asarray(b_dn_p),
        jnp.asarray(w_up_f), jnp.asarray(b_up_f),
        wf_sp, b_sp_d,
    )


# ----------------------------- wrapper -----------------------------

@jax.jit
def acnse_forward(x_nhwc, folded):
    """x_nhwc: (N, H, W, C) f32 -> (N, H, W, C) f32.

    The kernel works on the lane-dense (N, H, W*C) view; the reshapes below are
    free (same row-major bytes) -- no transposes on the hot path.
    """
    N, H, W, C = x_nhwc.shape
    WC = W * C
    x_d = x_nhwc.reshape(N, H, WC)

    kernel = _make_kernel(H, W, C)

    def full_spec(a):
        return pl.BlockSpec(a.shape, lambda n, nd=a.ndim: (0,) * nd)

    in_specs = [pl.BlockSpec((1, H, WC), lambda n: (n, 0, 0))] + [full_spec(a) for a in folded]
    out_spec = pl.BlockSpec((1, H, WC), lambda n: (n, 0, 0))

    out_d = pl.pallas_call(
        kernel,
        out_shape=jax.ShapeDtypeStruct((N, H, WC), jnp.float32),
        grid=(N,),
        in_specs=in_specs,
        out_specs=out_spec,
        scratch_shapes=[
            # single shared padded-activation buffer (halo=3), reused by every conv
            pltpu.VMEM((H + 2 * HALO, (W + 2 * HALO) * C), jnp.float32),
        ],
        compiler_params=pltpu.CompilerParams(
            dimension_semantics=("parallel",),      # v7x: both TensorCores split the batch
            vmem_limit_bytes=32 * 1024 * 1024,
        ),
    )(x_d, *folded)
    return out_d.reshape(N, H, W, C)


# ----------------------------- pure-JAX reference -----------------------------

def ref_forward(x_nhwc, params):
    """Same math as the kernel: conv operands cast to MXU_DTYPE, f32 accumulation."""
    (w_sq, w_ext, b_ext, w_r1a, b_r1a, w_r1b, w_r2a, b_r2a, w_r2b,
     w_dn, b_dn, w_up, b_up, w_sp, b_sp) = params

    def conv(x, w, b=None, pad=1):
        y = jax.lax.conv_general_dilated(
            x.astype(MXU_DTYPE), w.astype(MXU_DTYPE), (1, 1),
            [(pad, pad), (pad, pad)],
            dimension_numbers=('NHWC', 'HWIO', 'NHWC'),
            preferred_element_type=jnp.float32)
        if b is not None:
            y = y + b.reshape(1, 1, 1, -1)
        return y

    t = _lrelu(conv(x_nhwc, w_sq))
    t = x_nhwc + conv(t, w_ext, b_ext)
    t = t + conv(_lrelu(conv(t, w_r1a, b_r1a)), w_r1b)
    t = t + conv(_lrelu(conv(t, w_r2a, b_r2a)), w_r2b)
    pooled = jnp.mean(t, axis=(1, 2))                       # (N, C)
    se = _lrelu(pooled @ w_dn + b_dn)
    se = _sigmoid(se @ w_up + b_up)                         # (N, C)
    sp = _sigmoid(conv(t, w_sp, b_sp, pad=3))               # (N, H, W, 1)
    return t + t * se[:, None, None, :] + t * sp


# ----------------------------- params + main -----------------------------

def make_params(key, C):
    """Deterministic stand-ins: biases zero (init.constant_), scaled-gaussian conv weights."""
    Ch = C // 2
    ks = jax.random.split(key, 9)

    def conv_w(k, kh, kw, cin, cout):
        return jax.random.normal(k, (kh, kw, cin, cout), jnp.float32) / np.sqrt(cin * kh * kw)

    w_sq = conv_w(ks[0], 3, 3, C, C)
    w_ext = conv_w(ks[1], 3, 3, C, C)
    b_ext = jnp.zeros((1, C), jnp.float32)
    w_r1a = conv_w(ks[2], 3, 3, C, C)
    b_r1a = jnp.zeros((1, C), jnp.float32)
    w_r1b = conv_w(ks[3], 3, 3, C, C)
    w_r2a = conv_w(ks[4], 3, 3, C, C)
    b_r2a = jnp.zeros((1, C), jnp.float32)
    w_r2b = conv_w(ks[5], 3, 3, C, C)
    w_dn = jax.random.normal(ks[6], (C, Ch), jnp.float32) / np.sqrt(C)
    b_dn = jnp.zeros((1, Ch), jnp.float32)
    w_up = jax.random.normal(ks[7], (Ch, C), jnp.float32) / np.sqrt(Ch)
    b_up = jnp.zeros((1, C), jnp.float32)
    w_sp = conv_w(ks[8], 7, 7, C, 1)
    b_sp = jnp.zeros((1, 1), jnp.float32)
    return (w_sq, w_ext, b_ext, w_r1a, b_r1a, w_r1b, w_r2a, b_r2a, w_r2b,
            w_dn, b_dn, w_up, b_up, w_sp, b_sp)


if __name__ == "__main__":
    key = jax.random.PRNGKey(0)
    k_x, k_p = jax.random.split(key)

    # NHWC end-to-end.  Residual `x + x_temp` requires input_channels == n_channels,
    # so C_in == C == 8; W*C == 128 makes the last dim exactly one full lane width.
    N, H, W, C = 2, 16, 16, 8
    x = jax.random.normal(k_x, (N, H, W, C), jnp.float32)
    params = make_params(k_p, C)

    folded = prepare_params(params, H, W, C)
    out = jax.block_until_ready(acnse_forward(x, folded))
    assert out.shape == (N, H, W, C)

    ref = jax.block_until_ready(ref_forward(x, params))
    err = float(jnp.max(jnp.abs(out - ref)))
    assert err < 5e-3, f"mismatch vs reference: {err}"

    print("KERNEL_OK")
</pallas_src>

<mosaic_0001>
module attributes {stable_mosaic.version = 11 : i64} {
  func.func @kernel(%arg0: i32, %arg1: memref<1x16x128xf32, #tpu.memory_space<vmem>>, %arg2: memref<3x176x128xbf16, #tpu.memory_space<vmem>>, %arg3: memref<3x176x128xbf16, #tpu.memory_space<vmem>>, %arg4: memref<1x128xf32, #tpu.memory_space<vmem>>, %arg5: memref<3x176x128xbf16, #tpu.memory_space<vmem>>, %arg6: memref<1x128xf32, #tpu.memory_space<vmem>>, %arg7: memref<3x176x128xbf16, #tpu.memory_space<vmem>>, %arg8: memref<3x176x128xbf16, #tpu.memory_space<vmem>>, %arg9: memref<1x128xf32, #tpu.memory_space<vmem>>, %arg10: memref<3x176x128xbf16, #tpu.memory_space<vmem>>, %arg11: memref<128x8xf32, #tpu.memory_space<vmem>>, %arg12: memref<1x8xf32, #tpu.memory_space<vmem>>, %arg13: memref<8x128xf32, #tpu.memory_space<vmem>>, %arg14: memref<1x128xf32, #tpu.memory_space<vmem>>, %arg15: memref<7x176x128xbf16, #tpu.memory_space<vmem>>, %arg16: memref<1x128xf32, #tpu.memory_space<vmem>>, %arg17: memref<1x16x128xf32, #tpu.memory_space<vmem>>, %arg18: memref<22x176xf32, #tpu.memory_space<vmem>>) attributes {dimension_semantics = [#tpu.dimension_semantics<parallel>], iteration_bounds = array<i64: 2>, scalar_prefetch = 0 : i64, scratch_operands = 1 : i64, tpu.core_type = #tpu.core_type<tc>, window_params = [{transform_indices = @transform_0, window_bounds = array<i64: 1, 16, 128>}, {pipeline_mode = #tpu.pipeline_mode<synchronous>, transform_indices = @transform_1, window_bounds = array<i64: 3, 176, 128>}, {pipeline_mode = #tpu.pipeline_mode<synchronous>, transform_indices = @transform_2, window_bounds = array<i64: 3, 176, 128>}, {pipeline_mode = #tpu.pipeline_mode<synchronous>, transform_indices = @transform_3, window_bounds = array<i64: 1, 128>}, {pipeline_mode = #tpu.pipeline_mode<synchronous>, transform_indices = @transform_4, window_bounds = array<i64: 3, 176, 128>}, {pipeline_mode = #tpu.pipeline_mode<synchronous>, transform_indices = @transform_5, window_bounds = array<i64: 1, 128>}, {pipeline_mode = #tpu.pipeline_mode<synchronous>, transform_indices = @transform_6, window_bounds = array<i64: 3, 176, 128>}, {pipeline_mode = #tpu.pipeline_mode<synchronous>, transform_indices = @transform_7, window_bounds = array<i64: 3, 176, 128>}, {pipeline_mode = #tpu.pipeline_mode<synchronous>, transform_indices = @transform_8, window_bounds = array<i64: 1, 128>}, {pipeline_mode = #tpu.pipeline_mode<synchronous>, transform_indices = @transform_9, window_bounds = array<i64: 3, 176, 128>}, {pipeline_mode = #tpu.pipeline_mode<synchronous>, transform_indices = @transform_10, window_bounds = array<i64: 128, 8>}, {pipeline_mode = #tpu.pipeline_mode<synchronous>, transform_indices = @transform_11, window_bounds = array<i64: 1, 8>}, {pipeline_mode = #tpu.pipeline_mode<synchronous>, transform_indices = @transform_12, window_bounds = array<i64: 8, 128>}, {pipeline_mode = #tpu.pipeline_mode<synchronous>, transform_indices = @transform_13, window_bounds = array<i64: 1, 128>}, {pipeline_mode = #tpu.pipeline_mode<synchronous>, transform_indices = @transform_14, window_bounds = array<i64: 7, 176, 128>}, {pipeline_mode = #tpu.pipeline_mode<synchronous>, transform_indices = @transform_15, window_bounds = array<i64: 1, 128>}, {transform_indices = @transform_16, window_bounds = array<i64: 1, 16, 128>}]} {
    %cst = arith.constant 0.000000e+00 : f32
    %0 = vector.broadcast %cst : f32 to vector<3x176xf32>
    %c0 = arith.constant 0 : index
    %c0_0 = arith.constant 0 : index
    %1 = vector.load %arg18[%c0, %c0_0] : memref<22x176xf32, #tpu.memory_space<vmem>>, vector<3x176xf32>
    tpu.vector_store %arg18[%c0, %c0_0], %0 {strides = array<i32>} : memref<22x176xf32, #tpu.memory_space<vmem>>, vector<3x176xf32>,
    %c19 = arith.constant 19 : index
    %c0_1 = arith.constant 0 : index
    %2 = vector.load %arg18[%c19, %c0_1] : memref<22x176xf32, #tpu.memory_space<vmem>>, vector<3x176xf32>
    tpu.vector_store %arg18[%c19, %c0_1], %0 {strides = array<i32>} : memref<22x176xf32, #tpu.memory_space<vmem>>, vector<3x176xf32>,
    %cst_2 = arith.constant 0.000000e+00 : f32
    %3 = vector.broadcast %cst_2 : f32 to vector<16x24xf32>
    %c3 = arith.constant 3 : index
    %c0_3 = arith.constant 0 : index
    %4 = vector.load %arg18[%c3, %c0_3] : memref<22x176xf32, #tpu.memory_space<vmem>>, vector<16x24xf32>
    tpu.vector_store %arg18[%c3, %c0_3], %3 {strides = array<i32>} : memref<22x176xf32, #tpu.memory_space<vmem>>, vector<16x24xf32>,
    %c3_4 = arith.constant 3 : index
    %c152 = arith.constant 152 : index
    %5 = vector.load %arg18[%c3_4, %c152] : memref<22x176xf32, #tpu.memory_space<vmem>>, vector<16x24xf32>
    tpu.vector_store %arg18[%c3_4, %c152], %3 {strides = array<i32>} : memref<22x176xf32, #tpu.memory_space<vmem>>, vector<16x24xf32>,
    %c0_5 = arith.constant 0 : index
    %c0_6 = arith.constant 0 : index
    %c0_7 = arith.constant 0 : index
    %6 = vector.load %arg1[%c0_5, %c0_6, %c0_7] : memref<1x16x128xf32, #tpu.memory_space<vmem>>, vector<1x16x128xf32>
    %7 = vector.shape_cast %6 : vector<1x16x128xf32> to vector<16x128xf32>
    %c3_8 = arith.constant 3 : index
    %c24 = arith.constant 24 : index
    %8 = vector.load %arg18[%c3_8, %c24] : memref<22x176xf32, #tpu.memory_space<vmem>>, vector<16x128xf32>
    tpu.vector_store %arg18[%c3_8, %c24], %7 {strides = array<i32>} : memref<22x176xf32, #tpu.memory_space<vmem>>, vector<16x128xf32>,
    %cst_9 = arith.constant 0.000000e+00 : f32
    %9 = vector.broadcast %cst_9 : f32 to vector<16x128xf32>
    %c2 = arith.constant 2 : index
    %c0_10 = arith.constant 0 : index
    %10 = vector.load %arg18[%c2, %c0_10] : memref<22x176xf32, #tpu.memory_space<vmem>>, vector<16x176xf32>
    %11 = arith.truncf %10 : vector<16x176xf32> to vector<16x176xbf16>
    %c0_11 = arith.constant 0 : index
    %c0_12 = arith.constant 0 : index
    %c0_13 = arith.constant 0 : index
    %12 = vector.load %arg2[%c0_11, %c0_12, %c0_13] : memref<3x176x128xbf16, #tpu.memory_space<vmem>>, vector<1x176x128xbf16>
    %13 = vector.shape_cast %12 : vector<1x176x128xbf16> to vector<176x128xbf16>
    %cst_14 = arith.constant dense<0.000000e+00> : vector<16x128xf32>
    %14 = tpu.matmul %11, %13, %cst_14 {dimension_numbers = #tpu.dot_dimension_numbers<[1], [0], [0], [1], [0, 0, 1, 1], [], []>} : vector<16x176xbf16>, vector<176x128xbf16>, vector<16x128xf32> -> vector<16x128xf32>
    %15 = arith.addf %9, %14 : vector<16x128xf32>
    %c3_15 = arith.constant 3 : index
    %c0_16 = arith.constant 0 : index
    %16 = vector.load %arg18[%c3_15, %c0_16] : memref<22x176xf32, #tpu.memory_space<vmem>>, vector<16x176xf32>
    %17 = arith.truncf %16 : vector<16x176xf32> to vector<16x176xbf16>
    %c1 = arith.constant 1 : index
    %c0_17 = arith.constant 0 : index
    %c0_18 = arith.constant 0 : index
    %18 = vector.load %arg2[%c1, %c0_17, %c0_18] : memref<3x176x128xbf16, #tpu.memory_space<vmem>>, vector<1x176x128xbf16>
    %19 = vector.shape_cast %18 : vector<1x176x128xbf16> to vector<176x128xbf16>
    %cst_19 = arith.constant dense<0.000000e+00> : vector<16x128xf32>
    %20 = tpu.matmul %17, %19, %cst_19 {dimension_numbers = #tpu.dot_dimension_numbers<[1], [0], [0], [1], [0, 0, 1, 1], [], []>} : vector<16x176xbf16>, vector<176x128xbf16>, vector<16x128xf32> -> vector<16x128xf32>
    %21 = arith.addf %15, %20 : vector<16x128xf32>
    %c4 = arith.constant 4 : index
    %c0_20 = arith.constant 0 : index
    %22 = vector.load %arg18[%c4, %c0_20] : memref<22x176xf32, #tpu.memory_space<vmem>>, vector<16x176xf32>
    %23 = arith.truncf %22 : vector<16x176xf32> to vector<16x176xbf16>
    %c2_21 = arith.constant 2 : index
    %c0_22 = arith.constant 0 : index
    %c0_23 = arith.constant 0 : index
    %24 = vector.load %arg2[%c2_21, %c0_22, %c0_23] : memref<3x176x128xbf16, #tpu.memory_space<vmem>>, vector<1x176x128xbf16>
    %25 = vector.shape_cast %24 : vector<1x176x128xbf16> to vector<176x128xbf16>
    %cst_24 = arith.constant dense<0.000000e+00> : vector<16x128xf32>
    %26 = tpu.matmul %23, %25, %cst_24 {dimension_numbers = #tpu.dot_dimension_numbers<[1], [0], [0], [1], [0, 0, 1, 1], [], []>} : vector<16x176xbf16>, vector<176x128xbf16>, vector<16x128xf32> -> vector<16x128xf32>
    %27 = arith.addf %21, %26 : vector<16x128xf32>
    %cst_25 = arith.constant 0.000000e+00 : f32
    %28 = vector.broadcast %cst_25 : f32 to vector<16x128xf32>
    %29 = arith.cmpf oge, %27, %28 : vector<16x128xf32>
    %cst_26 = arith.constant 1.000000e-01 : f32
    %30 = vector.broadcast %cst_26 : f32 to vector<16x128xf32>
    %31 = arith.mulf %30, %27 : vector<16x128xf32>
    %32 = arith.select %29, %27, %31 : vector<16x128xi1>, vector<16x128xf32>
    %c0_27 = arith.constant 0 : index
    %c0_28 = arith.constant 0 : index
    %33 = vector.load %arg4[%c0_27, %c0_28] : memref<1x128xf32, #tpu.memory_space<vmem>>, vector<1x128xf32>
    %c3_29 = arith.constant 3 : index
    %c24_30 = arith.constant 24 : index
    %34 = vector.load %arg18[%c3_29, %c24_30] : memref<22x176xf32, #tpu.memory_space<vmem>>, vector<16x128xf32>
    tpu.vector_store %arg18[%c3_29, %c24_30], %32 {strides = array<i32>} : memref<22x176xf32, #tpu.memory_space<vmem>>, vector<16x128xf32>,
    %cst_31 = arith.constant 0.000000e+00 : f32
    %35 = vector.broadcast %cst_31 : f32 to vector<16x128xf32>
    %c2_32 = arith.constant 2 : index
    %c0_33 = arith.constant 0 : index
    %36 = vector.load %arg18[%c2_32, %c0_33] : memref<22x176xf32, #tpu.memory_space<vmem>>, vector<16x176xf32>
    %37 = arith.truncf %36 : vector<16x176xf32> to vector<16x176xbf16>
    %c0_34 = arith.constant 0 : index
    %c0_35 = arith.constant 0 : index
    %c0_36 = arith.constant 0 : index
    %38 = vector.load %arg3[%c0_34, %c0_35, %c0_36] : memref<3x176x128xbf16, #tpu.memory_space<vmem>>, vector<1x176x128xbf16>
    %39 = vector.shape_cast %38 : vector<1x176x128xbf16> to vector<176x128xbf16>
    %cst_37 = arith.constant dense<0.000000e+00> : vector<16x128xf32>
    %40 = tpu.matmul %37, %39, %cst_37 {dimension_numbers = #tpu.dot_dimension_numbers<[1], [0], [0], [1], [0, 0, 1, 1], [], []>} : vector<16x176xbf16>, vector<176x128xbf16>, vector<16x128xf32> -> vector<16x128xf32>
    %41 = arith.addf %35, %40 : vector<16x128xf32>
    %c3_38 = arith.constant 3 : index
    %c0_39 = arith.constant 0 : index
    %42 = vector.load %arg18[%c3_38, %c0_39] : memref<22x176xf32, #tpu.memory_space<vmem>>, vector<16x176xf32>
    %43 = arith.truncf %42 : vector<16x176xf32> to vector<16x176xbf16>
    %c1_40 = arith.constant 1 : index
    %c0_41 = arith.constant 0 : index
    %c0_42 = arith.constant 0 : index
    %44 = vector.load %arg3[%c1_40, %c0_41, %c0_42] : memref<3x176x128xbf16, #tpu.memory_space<vmem>>, vector<1x176x128xbf16>
    %45 = vector.shape_cast %44 : vector<1x176x128xbf16> to vector<176x128xbf16>
    %cst_43 = arith.constant dense<0.000000e+00> : vector<16x128xf32>
    %46 = tpu.matmul %43, %45, %cst_43 {dimension_numbers = #tpu.dot_dimension_numbers<[1], [0], [0], [1], [0, 0, 1, 1], [], []>} : vector<16x176xbf16>, vector<176x128xbf16>, vector<16x128xf32> -> vector<16x128xf32>
    %47 = arith.addf %41, %46 : vector<16x128xf32>
    %c4_44 = arith.constant 4 : index
    %c0_45 = arith.constant 0 : index
    %48 = vector.load %arg18[%c4_44, %c0_45] : memref<22x176xf32, #tpu.memory_space<vmem>>, vector<16x176xf32>
    %49 = arith.truncf %48 : vector<16x176xf32> to vector<16x176xbf16>
    %c2_46 = arith.constant 2 : index
    %c0_47 = arith.constant 0 : index
    %c0_48 = arith.constant 0 : index
    %50 = vector.load %arg3[%c2_46, %c0_47, %c0_48] : memref<3x176x128xbf16, #tpu.memory_space<vmem>>, vector<1x176x128xbf16>
    %51 = vector.shape_cast %50 : vector<1x176x128xbf16> to vector<176x128xbf16>
    %cst_49 = arith.constant dense<0.000000e+00> : vector<16x128xf32>
    %52 = tpu.matmul %49, %51, %cst_49 {dimension_numbers = #tpu.dot_dimension_numbers<[1], [0], [0], [1], [0, 0, 1, 1], [], []>} : vector<16x176xbf16>, vector<176x128xbf16>, vector<16x128xf32> -> vector<16x128xf32>
    %53 = arith.addf %47, %52 : vector<16x128xf32>
    %54 = vector.broadcast %33 : vector<1x128xf32> to vector<16x128xf32>
    %55 = arith.addf %53, %54 : vector<16x128xf32>
    %56 = arith.addf %7, %55 : vector<16x128xf32>
    %c0_50 = arith.constant 0 : index
    %c0_51 = arith.constant 0 : index
    %57 = vector.load %arg6[%c0_50, %c0_51] : memref<1x128xf32, #tpu.memory_space<vmem>>, vector<1x128xf32>
    %c3_52 = arith.constant 3 : index
    %c24_53 = arith.constant 24 : index
    %58 = vector.load %arg18[%c3_52, %c24_53] : memref<22x176xf32, #tpu.memory_space<vmem>>, vector<16x128xf32>
    tpu.vector_store %arg18[%c3_52, %c24_53], %56 {strides = array<i32>} : memref<22x176xf32, #tpu.memory_space<vmem>>, vector<16x128xf32>,
    %cst_54 = arith.constant 0.000000e+00 : f32
    %59 = vector.broadcast %cst_54 : f32 to vector<16x128xf32>
    %c2_55 = arith.constant 2 : index
    %c0_56 = arith.constant 0 : index
    %60 = vector.load %arg18[%c2_55, %c0_56] : memref<22x176xf32, #tpu.memory_space<vmem>>, vector<16x176xf32>
    %61 = arith.truncf %60 : vector<16x176xf32> to vector<16x176xbf16>
    %c0_57 = arith.constant 0 : index
    %c0_58 = arith.constant 0 : index
    %c0_59 = arith.constant 0 : index
    %62 = vector.load %arg5[%c0_57, %c0_58, %c0_59] : memref<3x176x128xbf16, #tpu.memory_space<vmem>>, vector<1x176x128xbf16>
    %63 = vector.shape_cast %62 : vector<1x176x128xbf16> to vector<176x128xbf16>
    %cst_60 = arith.constant dense<0.000000e+00> : vector<16x128xf32>
    %64 = tpu.matmul %61, %63, %cst_60 {dimension_numbers = #tpu.dot_dimension_numbers<[1], [0], [0], [1], [0, 0, 1, 1], [], []>} : vector<16x176xbf16>, vector<176x128xbf16>, vector<16x128xf32> -> vector<16x128xf32>
    %65 = arith.addf %59, %64 : vector<16x128xf32>
    %c3_61 = arith.constant 3 : index
    %c0_62 = arith.constant 0 : index
    %66 = vector.load %arg18[%c3_61, %c0_62] : memref<22x176xf32, #tpu.memory_space<vmem>>, vector<16x176xf32>
    %67 = arith.truncf %66 : vector<16x176xf32> to vector<16x176xbf16>
    %c1_63 = arith.constant 1 : index
    %c0_64 = arith.constant 0 : index
    %c0_65 = arith.constant 0 : index
    %68 = vector.load %arg5[%c1_63, %c0_64, %c0_65] : memref<3x176x128xbf16, #tpu.memory_space<vmem>>, vector<1x176x128xbf16>
    %69 = vector.shape_cast %68 : vector<1x176x128xbf16> to vector<176x128xbf16>
    %cst_66 = arith.constant dense<0.000000e+00> : vector<16x128xf32>
    %70 = tpu.matmul %67, %69, %cst_66 {dimension_numbers = #tpu.dot_dimension_numbers<[1], [0], [0], [1], [0, 0, 1, 1], [], []>} : vector<16x176xbf16>, vector<176x128xbf16>, vector<16x128xf32> -> vector<16x128xf32>
    %71 = arith.addf %65, %70 : vector<16x128xf32>
    %c4_67 = arith.constant 4 : index
    %c0_68 = arith.constant 0 : index
    %72 = vector.load %arg18[%c4_67, %c0_68] : memref<22x176xf32, #tpu.memory_space<vmem>>, vector<16x176xf32>
    %73 = arith.truncf %72 : vector<16x176xf32> to vector<16x176xbf16>
    %c2_69 = arith.constant 2 : index
    %c0_70 = arith.constant 0 : index
    %c0_71 = arith.constant 0 : index
    %74 = vector.load %arg5[%c2_69, %c0_70, %c0_71] : memref<3x176x128xbf16, #tpu.memory_space<vmem>>, vector<1x176x128xbf16>
    %75 = vector.shape_cast %74 : vector<1x176x128xbf16> to vector<176x128xbf16>
    %cst_72 = arith.constant dense<0.000000e+00> : vector<16x128xf32>
    %76 = tpu.matmul %73, %75, %cst_72 {dimension_numbers = #tpu.dot_dimension_numbers<[1], [0], [0], [1], [0, 0, 1, 1], [], []>} : vector<16x176xbf16>, vector<176x128xbf16>, vector<16x128xf32> -> vector<16x128xf32>
    %77 = arith.addf %71, %76 : vector<16x128xf32>
    %78 = vector.broadcast %57 : vector<1x128xf32> to vector<16x128xf32>
    %79 = arith.addf %77, %78 : vector<16x128xf32>
    %cst_73 = arith.constant 0.000000e+00 : f32
    %80 = vector.broadcast %cst_73 : f32 to vector<16x128xf32>
    %81 = arith.cmpf oge, %79, %80 : vector<16x128xf32>
    %cst_74 = arith.constant 1.000000e-01 : f32
    %82 = vector.broadcast %cst_74 : f32 to vector<16x128xf32>
    %83 = arith.mulf %82, %79 : vector<16x128xf32>
    %84 = arith.select %81, %79, %83 : vector<16x128xi1>, vector<16x128xf32>
    %c3_75 = arith.constant 3 : index
    %c24_76 = arith.constant 24 : index
    %85 = vector.load %arg18[%c3_75, %c24_76] : memref<22x176xf32, #tpu.memory_space<vmem>>, vector<16x128xf32>
    tpu.vector_store %arg18[%c3_75, %c24_76], %84 {strides = array<i32>} : memref<22x176xf32, #tpu.memory_space<vmem>>, vector<16x128xf32>,
    %cst_77 = arith.constant 0.000000e+00 : f32
    %86 = vector.broadcast %cst_77 : f32 to vector<16x128xf32>
    %c2_78 = arith.constant 2 : index
    %c0_79 = arith.constant 0 : index
    %87 = vector.load %arg18[%c2_78, %c0_79] : memref<22x176xf32, #tpu.memory_space<vmem>>, vector<16x176xf32>
    %88 = arith.truncf %87 : vector<16x176xf32> to vector<16x176xbf16>
    %c0_80 = arith.constant 0 : index
    %c0_81 = arith.constant 0 : index
    %c0_82 = arith.constant 0 : index
    %89 = vector.load %arg7[%c0_80, %c0_81, %c0_82] : memref<3x176x128xbf16, #tpu.memory_space<vmem>>, vector<1x176x128xbf16>
    %90 = vector.shape_cast %89 : vector<1x176x128xbf16> to vector<176x128xbf16>
    %cst_83 = arith.constant dense<0.000000e+00> : vector<16x128xf32>
    %91 = tpu.matmul %88, %90, %cst_83 {dimension_numbers = #tpu.dot_dimension_numbers<[1], [0], [0], [1], [0, 0, 1, 1], [], []>} : vector<16x176xbf16>, vector<176x128xbf16>, vector<16x128xf32> -> vector<16x128xf32>
    %92 = arith.addf %86, %91 : vector<16x128xf32>
    %c3_84 = arith.constant 3 : index
    %c0_85 = arith.constant 0 : index
    %93 = vector.load %arg18[%c3_84, %c0_85] : memref<22x176xf32, #tpu.memory_space<vmem>>, vector<16x176xf32>
    %94 = arith.truncf %93 : vector<16x176xf32> to vector<16x176xbf16>
    %c1_86 = arith.constant 1 : index
    %c0_87 = arith.constant 0 : index
    %c0_88 = arith.constant 0 : index
    %95 = vector.load %arg7[%c1_86, %c0_87, %c0_88] : memref<3x176x128xbf16, #tpu.memory_space<vmem>>, vector<1x176x128xbf16>
    %96 = vector.shape_cast %95 : vector<1x176x128xbf16> to vector<176x128xbf16>
    %cst_89 = arith.constant dense<0.000000e+00> : vector<16x128xf32>
    %97 = tpu.matmul %94, %96, %cst_89 {dimension_numbers = #tpu.dot_dimension_numbers<[1], [0], [0], [1], [0, 0, 1, 1], [], []>} : vector<16x176xbf16>, vector<176x128xbf16>, vector<16x128xf32> -> vector<16x128xf32>
    %98 = arith.addf %92, %97 : vector<16x128xf32>
    %c4_90 = arith.constant 4 : index
    %c0_91 = arith.constant 0 : index
    %99 = vector.load %arg18[%c4_90, %c0_91] : memref<22x176xf32, #tpu.memory_space<vmem>>, vector<16x176xf32>
    %100 = arith.truncf %99 : vector<16x176xf32> to vector<16x176xbf16>
    %c2_92 = arith.constant 2 : index
    %c0_93 = arith.constant 0 : index
    %c0_94 = arith.constant 0 : index
    %101 = vector.load %arg7[%c2_92, %c0_93, %c0_94] : memref<3x176x128xbf16, #tpu.memory_space<vmem>>, vector<1x176x128xbf16>
    %102 = vector.shape_cast %101 : vector<1x176x128xbf16> to vector<176x128xbf16>
    %cst_95 = arith.constant dense<0.000000e+00> : vector<16x128xf32>
    %103 = tpu.matmul %100, %102, %cst_95 {dimension_numbers = #tpu.dot_dimension_numbers<[1], [0], [0], [1], [0, 0, 1, 1], [], []>} : vector<16x176xbf16>, vector<176x128xbf16>, vector<16x128xf32> -> vector<16x128xf32>
    %104 = arith.addf %98, %103 : vector<16x128xf32>
    %105 = arith.addf %56, %104 : vector<16x128xf32>
    %c0_96 = arith.constant 0 : index
    %c0_97 = arith.constant 0 : index
    %106 = vector.load %arg9[%c0_96, %c0_97] : memref<1x128xf32, #tpu.memory_space<vmem>>, vector<1x128xf32>
    %c3_98 = arith.constant 3 : index
    %c24_99 = arith.constant 24 : index
    %107 = vector.load %arg18[%c3_98, %c24_99] : memref<22x176xf32, #tpu.memory_space<vmem>>, vector<16x128xf32>
    tpu.vector_store %arg18[%c3_98, %c24_99], %105 {strides = array<i32>} : memref<22x176xf32, #tpu.memory_space<vmem>>, vector<16x128xf32>,
    %cst_100 = arith.constant 0.000000e+00 : f32
    %108 = vector.broadcast %cst_100 : f32 to vector<16x128xf32>
    %c2_101 = arith.constant 2 : index
    %c0_102 = arith.constant 0 : index
    %109 = vector.load %arg18[%c2_101, %c0_102] : memref<22x176xf32, #tpu.memory_space<vmem>>, vector<16x176xf32>
    %110 = arith.truncf %109 : vector<16x176xf32> to vector<16x176xbf16>
    %c0_103 = arith.constant 0 : index
    %c0_104 = arith.constant 0 : index
    %c0_105 = arith.constant 0 : index
    %111 = vector.load %arg8[%c0_103, %c0_104, %c0_105] : memref<3x176x128xbf16, #tpu.memory_space<vmem>>, vector<1x176x128xbf16>
    %112 = vector.shape_cast %111 : vector<1x176x128xbf16> to vector<176x128xbf16>
    %cst_106 = arith.constant dense<0.000000e+00> : vector<16x128xf32>
    %113 = tpu.matmul %110, %112, %cst_106 {dimension_numbers = #tpu.dot_dimension_numbers<[1], [0], [0], [1], [0, 0, 1, 1], [], []>} : vector<16x176xbf16>, vector<176x128xbf16>, vector<16x128xf32> -> vector<16x128xf32>
    %114 = arith.addf %108, %113 : vector<16x128xf32>
    %c3_107 = arith.constant 3 : index
    %c0_108 = arith.constant 0 : index
    %115 = vector.load %arg18[%c3_107, %c0_108] : memref<22x176xf32, #tpu.memory_space<vmem>>, vector<16x176xf32>
    %116 = arith.truncf %115 : vector<16x176xf32> to vector<16x176xbf16>
    %c1_109 = arith.constant 1 : index
    %c0_110 = arith.constant 0 : index
    %c0_111 = arith.constant 0 : index
    %117 = vector.load %arg8[%c1_109, %c0_110, %c0_111] : memref<3x176x128xbf16, #tpu.memory_space<vmem>>, vector<1x176x128xbf16>
    %118 = vector.shape_cast %117 : vector<1x176x128xbf16> to vector<176x128xbf16>
    %cst_112 = arith.constant dense<0.000000e+00> : vector<16x128xf32>
    %119 = tpu.matmul %116, %118, %cst_112 {dimension_numbers = #tpu.dot_dimension_numbers<[1], [0], [0], [1], [0, 0, 1, 1], [], []>} : vector<16x176xbf16>, vector<176x128xbf16>, vector<16x128xf32> -> vector<16x128xf32>
    %120 = arith.addf %114, %119 : vector<16x128xf32>
    %c4_113 = arith.constant 4 : index
    %c0_114 = arith.constant 0 : index
    %121 = vector.load %arg18[%c4_113, %c0_114] : memref<22x176xf32, #tpu.memory_space<vmem>>, vector<16x176xf32>
    %122 = arith.truncf %121 : vector<16x176xf32> to vector<16x176xbf16>
    %c2_115 = arith.constant 2 : index
    %c0_116 = arith.constant 0 : index
    %c0_117 = arith.constant 0 : index
    %123 = vector.load %arg8[%c2_115, %c0_116, %c0_117] : memref<3x176x128xbf16, #tpu.memory_space<vmem>>, vector<1x176x128xbf16>
    %124 = vector.shape_cast %123 : vector<1x176x128xbf16> to vector<176x128xbf16>
    %cst_118 = arith.constant dense<0.000000e+00> : vector<16x128xf32>
    %125 = tpu.matmul %122, %124, %cst_118 {dimension_numbers = #tpu.dot_dimension_numbers<[1], [0], [0], [1], [0, 0, 1, 1], [], []>} : vector<16x176xbf16>, vector<176x128xbf16>, vector<16x128xf32> -> vector<16x128xf32>
    %126 = arith.addf %120, %125 : vector<16x128xf32>
    %127 = vector.broadcast %106 : vector<1x128xf32> to vector<16x128xf32>
    %128 = arith.addf %126, %127 : vector<16x128xf32>
    %cst_119 = arith.constant 0.000000e+00 : f32
    %129 = vector.broadcast %cst_119 : f32 to vector<16x128xf32>
    %130 = arith.cmpf oge, %128, %129 : vector<16x128xf32>
    %cst_120 = arith.constant 1.000000e-01 : f32
    %131 = vector.broadcast %cst_120 : f32 to vector<16x128xf32>
    %132 = arith.mulf %131, %128 : vector<16x128xf32>
    %133 = arith.select %130, %128, %132 : vector<16x128xi1>, vector<16x128xf32>
    %c3_121 = arith.constant 3 : index
    %c24_122 = arith.constant 24 : index
    %134 = vector.load %arg18[%c3_121, %c24_122] : memref<22x176xf32, #tpu.memory_space<vmem>>, vector<16x128xf32>
    tpu.vector_store %arg18[%c3_121, %c24_122], %133 {strides = array<i32>} : memref<22x176xf32, #tpu.memory_space<vmem>>, vector<16x128xf32>,
    %cst_123 = arith.constant 0.000000e+00 : f32
    %135 = vector.broadcast %cst_123 : f32 to vector<16x128xf32>
    %c2_124 = arith.constant 2 : index
    %c0_125 = arith.constant 0 : index
    %136 = vector.load %arg18[%c2_124, %c0_125] : memref<22x176xf32, #tpu.memory_space<vmem>>, vector<16x176xf32>
    %137 = arith.truncf %136 : vector<16x176xf32> to vector<16x176xbf16>
    %c0_126 = arith.constant 0 : index
    %c0_127 = arith.constant 0 : index
    %c0_128 = arith.constant 0 : index
    %138 = vector.load %arg10[%c0_126, %c0_127, %c0_128] : memref<3x176x128xbf16, #tpu.memory_space<vmem>>, vector<1x176x128xbf16>
    %139 = vector.shape_cast %138 : vector<1x176x128xbf16> to vector<176x128xbf16>
    %cst_129 = arith.constant dense<0.000000e+00> : vector<16x128xf32>
    %140 = tpu.matmul %137, %139, %cst_129 {dimension_numbers = #tpu.dot_dimension_numbers<[1], [0], [0], [1], [0, 0, 1, 1], [], []>} : vector<16x176xbf16>, vector<176x128xbf16>, vector<16x128xf32> -> vector<16x128xf32>
    %141 = arith.addf %135, %140 : vector<16x128xf32>
    %c3_130 = arith.constant 3 : index
    %c0_131 = arith.constant 0 : index
    %142 = vector.load %arg18[%c3_130, %c0_131] : memref<22x176xf32, #tpu.memory_space<vmem>>, vector<16x176xf32>
    %143 = arith.truncf %142 : vector<16x176xf32> to vector<16x176xbf16>
    %c1_132 = arith.constant 1 : index
    %c0_133 = arith.constant 0 : index
    %c0_134 = arith.constant 0 : index
    %144 = vector.load %arg10[%c1_132, %c0_133, %c0_134] : memref<3x176x128xbf16, #tpu.memory_space<vmem>>, vector<1x176x128xbf16>
    %145 = vector.shape_cast %144 : vector<1x176x128xbf16> to vector<176x128xbf16>
    %cst_135 = arith.constant dense<0.000000e+00> : vector<16x128xf32>
    %146 = tpu.matmul %143, %145, %cst_135 {dimension_numbers = #tpu.dot_dimension_numbers<[1], [0], [0], [1], [0, 0, 1, 1], [], []>} : vector<16x176xbf16>, vector<176x128xbf16>, vector<16x128xf32> -> vector<16x128xf32>
    %147 = arith.addf %141, %146 : vector<16x128xf32>
    %c4_136 = arith.constant 4 : index
    %c0_137 = arith.constant 0 : index
    %148 = vector.load %arg18[%c4_136, %c0_137] : memref<22x176xf32, #tpu.memory_space<vmem>>, vector<16x176xf32>
    %149 = arith.truncf %148 : vector<16x176xf32> to vector<16x176xbf16>
    %c2_138 = arith.constant 2 : index
    %c0_139 = arith.constant 0 : index
    %c0_140 = arith.constant 0 : index
    %150 = vector.load %arg10[%c2_138, %c0_139, %c0_140] : memref<3x176x128xbf16, #tpu.memory_space<vmem>>, vector<1x176x128xbf16>
    %151 = vector.shape_cast %150 : vector<1x176x128xbf16> to vector<176x128xbf16>
    %cst_141 = arith.constant dense<0.000000e+00> : vector<16x128xf32>
    %152 = tpu.matmul %149, %151, %cst_141 {dimension_numbers = #tpu.dot_dimension_numbers<[1], [0], [0], [1], [0, 0, 1, 1], [], []>} : vector<16x176xbf16>, vector<176x128xbf16>, vector<16x128xf32> -> vector<16x128xf32>
    %153 = arith.addf %147, %152 : vector<16x128xf32>
    %154 = arith.addf %105, %153 : vector<16x128xf32>
    %cst_142 = arith.constant dense<0.000000e+00> : vector<128xf32>
    %155 = vector.multi_reduction <add>, %154, %cst_142 [0] : vector<16x128xf32> to vector<128xf32>
    %156 = vector.shape_cast %155 : vector<128xf32> to vector<1x128xf32>
    %c0_143 = arith.constant 0 : index
    %c0_144 = arith.constant 0 : index
    %157 = vector.load %arg11[%c0_143, %c0_144] : memref<128x8xf32, #tpu.memory_space<vmem>>, vector<128x8xf32>
    %cst_145 = arith.constant dense<0.000000e+00> : vector<1x8xf32>
    %158 = tpu.matmul %156, %157, %cst_145 {dimension_numbers = #tpu.dot_dimension_numbers<[1], [0], [0], [1], [0, 0, 1, 1], [], []>} : vector<1x128xf32>, vector<128x8xf32>, vector<1x8xf32> -> vector<1x8xf32>
    %c0_146 = arith.constant 0 : index
    %c0_147 = arith.constant 0 : index
    %159 = vector.load %arg12[%c0_146, %c0_147] : memref<1x8xf32, #tpu.memory_space<vmem>>, vector<1x8xf32>
    %160 = arith.addf %158, %159 : vector<1x8xf32>
    %cst_148 = arith.constant 0.000000e+00 : f32
    %161 = vector.broadcast %cst_148 : f32 to vector<1x8xf32>
    %162 = arith.cmpf oge, %160, %161 : vector<1x8xf32>
    %cst_149 = arith.constant 1.000000e-01 : f32
    %163 = vector.broadcast %cst_149 : f32 to vector<1x8xf32>
    %164 = arith.mulf %163, %160 : vector<1x8xf32>
    %165 = arith.select %162, %160, %164 : vector<1x8xi1>, vector<1x8xf32>
    %c0_150 = arith.constant 0 : index
    %c0_151 = arith.constant 0 : index
    %166 = vector.load %arg13[%c0_150, %c0_151] : memref<8x128xf32, #tpu.memory_space<vmem>>, vector<8x128xf32>
    %cst_152 = arith.constant dense<0.000000e+00> : vector<1x128xf32>
    %167 = tpu.matmul %165, %166, %cst_152 {dimension_numbers = #tpu.dot_dimension_numbers<[1], [0], [0], [1], [0, 0, 1, 1], [], []>} : vector<1x8xf32>, vector<8x128xf32>, vector<1x128xf32> -> vector<1x128xf32>
    %c0_153 = arith.constant 0 : index
    %c0_154 = arith.constant 0 : index
    %168 = vector.load %arg14[%c0_153, %c0_154] : memref<1x128xf32, #tpu.memory_space<vmem>>, vector<1x128xf32>
    %169 = arith.addf %167, %168 : vector<1x128xf32>
    %cst_155 = arith.constant 0.000000e+00 : f32
    %170 = vector.broadcast %cst_155 : f32 to vector<1x128xf32>
    %171 = arith.subf %170, %169 : vector<1x128xf32>
    %172 = math.exp %171 : vector<1x128xf32>
    %cst_156 = arith.constant 1.000000e+00 : f32
    %173 = vector.broadcast %cst_156 : f32 to vector<1x128xf32>
    %174 = arith.addf %173, %172 : vector<1x128xf32>
    %cst_157 = arith.constant 1.000000e+00 : f32
    %175 = vector.broadcast %cst_157 : f32 to vector<1x128xf32>
    %176 = arith.divf %175, %174 : vector<1x128xf32>
    %c0_158 = arith.constant 0 : index
    %c0_159 = arith.constant 0 : index
    %177 = vector.load %arg16[%c0_158, %c0_159] : memref<1x128xf32, #tpu.memory_space<vmem>>, vector<1x128xf32>
    %c3_160 = arith.constant 3 : index
    %c24_161 = arith.constant 24 : index
    %178 = vector.load %arg18[%c3_160, %c24_161] : memref<22x176xf32, #tpu.memory_space<vmem>>, vector<16x128xf32>
    tpu.vector_store %arg18[%c3_160, %c24_161], %154 {strides = array<i32>} : memref<22x176xf32, #tpu.memory_space<vmem>>, vector<16x128xf32>,
    %cst_162 = arith.constant 0.000000e+00 : f32
    %179 = vector.broadcast %cst_162 : f32 to vector<16x128xf32>
    %c0_163 = arith.constant 0 : index
    %c0_164 = arith.constant 0 : index
    %180 = vector.load %arg18[%c0_163, %c0_164] : memref<22x176xf32, #tpu.memory_space<vmem>>, vector<16x176xf32>
    %181 = arith.truncf %180 : vector<16x176xf32> to vector<16x176xbf16>
    %c0_165 = arith.constant 0 : index
    %c0_166 = arith.constant 0 : index
    %c0_167 = arith.constant 0 : index
    %182 = vector.load %arg15[%c0_165, %c0_166, %c0_167] : memref<7x176x128xbf16, #tpu.memory_space<vmem>>, vector<1x176x128xbf16>
    %183 = vector.shape_cast %182 : vector<1x176x128xbf16> to vector<176x128xbf16>
    %cst_168 = arith.constant dense<0.000000e+00> : vector<16x128xf32>
    %184 = tpu.matmul %181, %183, %cst_168 {dimension_numbers = #tpu.dot_dimension_numbers<[1], [0], [0], [1], [0, 0, 1, 1], [], []>} : vector<16x176xbf16>, vector<176x128xbf16>, vector<16x128xf32> -> vector<16x128xf32>
    %185 = arith.addf %179, %184 : vector<16x128xf32>
    %c1_169 = arith.constant 1 : index
    %c0_170 = arith.constant 0 : index
    %186 = vector.load %arg18[%c1_169, %c0_170] : memref<22x176xf32, #tpu.memory_space<vmem>>, vector<16x176xf32>
    %187 = arith.truncf %186 : vector<16x176xf32> to vector<16x176xbf16>
    %c1_171 = arith.constant 1 : index
    %c0_172 = arith.constant 0 : index
    %c0_173 = arith.constant 0 : index
    %188 = vector.load %arg15[%c1_171, %c0_172, %c0_173] : memref<7x176x128xbf16, #tpu.memory_space<vmem>>, vector<1x176x128xbf16>
    %189 = vector.shape_cast %188 : vector<1x176x128xbf16> to vector<176x128xbf16>
    %cst_174 = arith.constant dense<0.000000e+00> : vector<16x128xf32>
    %190 = tpu.matmul %187, %189, %cst_174 {dimension_numbers = #tpu.dot_dimension_numbers<[1], [0], [0], [1], [0, 0, 1, 1], [], []>} : vector<16x176xbf16>, vector<176x128xbf16>, vector<16x128xf32> -> vector<16x128xf32>
    %191 = arith.addf %185, %190 : vector<16x128xf32>
    %c2_175 = arith.constant 2 : index
    %c0_176 = arith.constant 0 : index
    %192 = vector.load %arg18[%c2_175, %c0_176] : memref<22x176xf32, #tpu.memory_space<vmem>>, vector<16x176xf32>
    %193 = arith.truncf %192 : vector<16x176xf32> to vector<16x176xbf16>
    %c2_177 = arith.constant 2 : index
    %c0_178 = arith.constant 0 : index
    %c0_179 = arith.constant 0 : index
    %194 = vector.load %arg15[%c2_177, %c0_178, %c0_179] : memref<7x176x128xbf16, #tpu.memory_space<vmem>>, vector<1x176x128xbf16>
    %195 = vector.shape_cast %194 : vector<1x176x128xbf16> to vector<176x128xbf16>
    %cst_180 = arith.constant dense<0.000000e+00> : vector<16x128xf32>
    %196 = tpu.matmul %193, %195, %cst_180 {dimension_numbers = #tpu.dot_dimension_numbers<[1], [0], [0], [1], [0, 0, 1, 1], [], []>} : vector<16x176xbf16>, vector<176x128xbf16>, vector<16x128xf32> -> vector<16x128xf32>
    %197 = arith.addf %191, %196 : vector<16x128xf32>
    %c3_181 = arith.constant 3 : index
    %c0_182 = arith.constant 0 : index
    %198 = vector.load %arg18[%c3_181, %c0_182] : memref<22x176xf32, #tpu.memory_space<vmem>>, vector<16x176xf32>
    %199 = arith.truncf %198 : vector<16x176xf32> to vector<16x176xbf16>
    %c3_183 = arith.constant 3 : index
    %c0_184 = arith.constant 0 : index
    %c0_185 = arith.constant 0 : index
    %200 = vector.load %arg15[%c3_183, %c0_184, %c0_185] : memref<7x176x128xbf16, #tpu.memory_space<vmem>>, vector<1x176x128xbf16>
    %201 = vector.shape_cast %200 : vector<1x176x128xbf16> to vector<176x128xbf16>
    %cst_186 = arith.constant dense<0.000000e+00> : vector<16x128xf32>
    %202 = tpu.matmul %199, %201, %cst_186 {dimension_numbers = #tpu.dot_dimension_numbers<[1], [0], [0], [1], [0, 0, 1, 1], [], []>} : vector<16x176xbf16>, vector<176x128xbf16>, vector<16x128xf32> -> vector<16x128xf32>
    %203 = arith.addf %197, %202 : vector<16x128xf32>
    %c4_187 = arith.constant 4 : index
    %c0_188 = arith.constant 0 : index
    %204 = vector.load %arg18[%c4_187, %c0_188] : memref<22x176xf32, #tpu.memory_space<vmem>>, vector<16x176xf32>
    %205 = arith.truncf %204 : vector<16x176xf32> to vector<16x176xbf16>
    %c4_189 = arith.constant 4 : index
    %c0_190 = arith.constant 0 : index
    %c0_191 = arith.constant 0 : index
    %206 = vector.load %arg15[%c4_189, %c0_190, %c0_191] : memref<7x176x128xbf16, #tpu.memory_space<vmem>>, vector<1x176x128xbf16>
    %207 = vector.shape_cast %206 : vector<1x176x128xbf16> to vector<176x128xbf16>
    %cst_192 = arith.constant dense<0.000000e+00> : vector<16x128xf32>
    %208 = tpu.matmul %205, %207, %cst_192 {dimension_numbers = #tpu.dot_dimension_numbers<[1], [0], [0], [1], [0, 0, 1, 1], [], []>} : vector<16x176xbf16>, vector<176x128xbf16>, vector<16x128xf32> -> vector<16x128xf32>
    %209 = arith.addf %203, %208 : vector<16x128xf32>
    %c5 = arith.constant 5 : index
    %c0_193 = arith.constant 0 : index
    %210 = vector.load %arg18[%c5, %c0_193] : memref<22x176xf32, #tpu.memory_space<vmem>>, vector<16x176xf32>
    %211 = arith.truncf %210 : vector<16x176xf32> to vector<16x176xbf16>
    %c5_194 = arith.constant 5 : index
    %c0_195 = arith.constant 0 : index
    %c0_196 = arith.constant 0 : index
    %212 = vector.load %arg15[%c5_194, %c0_195, %c0_196] : memref<7x176x128xbf16, #tpu.memory_space<vmem>>, vector<1x176x128xbf16>
    %213 = vector.shape_cast %212 : vector<1x176x128xbf16> to vector<176x128xbf16>
    %cst_197 = arith.constant dense<0.000000e+00> : vector<16x128xf32>
    %214 = tpu.matmul %211, %213, %cst_197 {dimension_numbers = #tpu.dot_dimension_numbers<[1], [0], [0], [1], [0, 0, 1, 1], [], []>} : vector<16x176xbf16>, vector<176x128xbf16>, vector<16x128xf32> -> vector<16x128xf32>
    %215 = arith.addf %209, %214 : vector<16x128xf32>
    %c6 = arith.constant 6 : index
    %c0_198 = arith.constant 0 : index
    %216 = vector.load %arg18[%c6, %c0_198] : memref<22x176xf32, #tpu.memory_space<vmem>>, vector<16x176xf32>
    %217 = arith.truncf %216 : vector<16x176xf32> to vector<16x176xbf16>
    %c6_199 = arith.constant 6 : index
    %c0_200 = arith.constant 0 : index
    %c0_201 = arith.constant 0 : index
    %218 = vector.load %arg15[%c6_199, %c0_200, %c0_201] : memref<7x176x128xbf16, #tpu.memory_space<vmem>>, vector<1x176x128xbf16>
    %219 = vector.shape_cast %218 : vector<1x176x128xbf16> to vector<176x128xbf16>
    %cst_202 = arith.constant dense<0.000000e+00> : vector<16x128xf32>
    %220 = tpu.matmul %217, %219, %cst_202 {dimension_numbers = #tpu.dot_dimension_numbers<[1], [0], [0], [1], [0, 0, 1, 1], [], []>} : vector<16x176xbf16>, vector<176x128xbf16>, vector<16x128xf32> -> vector<16x128xf32>
    %221 = arith.addf %215, %220 : vector<16x128xf32>
    %222 = vector.broadcast %177 : vector<1x128xf32> to vector<16x128xf32>
    %223 = arith.addf %221, %222 : vector<16x128xf32>
    %cst_203 = arith.constant 0.000000e+00 : f32
    %224 = vector.broadcast %cst_203 : f32 to vector<16x128xf32>
    %225 = arith.subf %224, %223 : vector<16x128xf32>
    %226 = math.exp %225 : vector<16x128xf32>
    %cst_204 = arith.constant 1.000000e+00 : f32
    %227 = vector.broadcast %cst_204 : f32 to vector<16x128xf32>
    %228 = arith.addf %227, %226 : vector<16x128xf32>
    %cst_205 = arith.constant 1.000000e+00 : f32
    %229 = vector.broadcast %cst_205 : f32 to vector<16x128xf32>
    %230 = arith.divf %229, %228 : vector<16x128xf32>
    %cst_206 = arith.constant 1.000000e+00 : f32
    %231 = vector.broadcast %cst_206 : f32 to vector<1x128xf32>
    %232 = arith.addf %231, %176 : vector<1x128xf32>
    %233 = vector.broadcast %232 : vector<1x128xf32> to vector<16x128xf32>
    %234 = arith.addf %233, %230 : vector<16x128xf32>
    %235 = arith.mulf %154, %234 : vector<16x128xf32>
    %c0_207 = arith.constant 0 : index
    %c0_208 = arith.constant 0 : index
    %c0_209 = arith.constant 0 : index
    %236 = vector.load %arg17[%c0_207, %c0_208, %c0_209] : memref<1x16x128xf32, #tpu.memory_space<vmem>>, vector<1x16x128xf32>
    %237 = vector.shape_cast %236 : vector<1x16x128xf32> to vector<16x128xf32>
    %238 = vector.shape_cast %235 : vector<16x128xf32> to vector<1x16x128xf32>
    tpu.vector_store %arg17[%c0_207, %c0_208, %c0_209], %238 {strides = array<i32>} : memref<1x16x128xf32, #tpu.memory_space<vmem>>, vector<1x16x128xf32>,
    return
  }
  func.func @transform_0(%arg0: i32) -> (i32, i32, i32) {
    %c0_i32 = arith.constant 0 : i32
    %c0_i32_0 = arith.constant 0 : i32
    %c0_i32_1 = arith.constant 0 : i32
    return %arg0, %c0_i32, %c0_i32_0 : i32, i32, i32
  }
  func.func @transform_1(%arg0: i32) -> (i32, i32, i32) {
    %c0_i32 = arith.constant 0 : i32
    %c0_i32_0 = arith.constant 0 : i32
    %c0_i32_1 = arith.constant 0 : i32
    %c0_i32_2 = arith.constant 0 : i32
    return %c0_i32, %c0_i32_0, %c0_i32_1 : i32, i32, i32
  }
  func.func @transform_2(%arg0: i32) -> (i32, i32, i32) {
    %c0_i32 = arith.constant 0 : i32
    %c0_i32_0 = arith.constant 0 : i32
    %c0_i32_1 = arith.constant 0 : i32
    %c0_i32_2 = arith.constant 0 : i32
    return %c0_i32, %c0_i32_0, %c0_i32_1 : i32, i32, i32
  }
  func.func @transform_3(%arg0: i32) -> (i32, i32) {
    %c0_i32 = arith.constant 0 : i32
    %c0_i32_0 = arith.constant 0 : i32
    %c0_i32_1 = arith.constant 0 : i32
    return %c0_i32, %c0_i32_0 : i32, i32
  }
  func.func @transform_4(%arg0: i32) -> (i32, i32, i32) {
    %c0_i32 = arith.constant 0 : i32
    %c0_i32_0 = arith.constant 0 : i32
    %c0_i32_1 = arith.constant 0 : i32
    %c0_i32_2 = arith.constant 0 : i32
    return %c0_i32, %c0_i32_0, %c0_i32_1 : i32, i32, i32
  }
  func.func @transform_5(%arg0: i32) -> (i32, i32) {
    %c0_i32 = arith.constant 0 : i32
    %c0_i32_0 = arith.constant 0 : i32
    %c0_i32_1 = arith.constant 0 : i32
    return %c0_i32, %c0_i32_0 : i32, i32
  }
  func.func @transform_6(%arg0: i32) -> (i32, i32, i32) {
    %c0_i32 = arith.constant 0 : i32
    %c0_i32_0 = arith.constant 0 : i32
    %c0_i32_1 = arith.constant 0 : i32
    %c0_i32_2 = arith.constant 0 : i32
    return %c0_i32, %c0_i32_0, %c0_i32_1 : i32, i32, i32
  }
  func.func @transform_7(%arg0: i32) -> (i32, i32, i32) {
    %c0_i32 = arith.constant 0 : i32
    %c0_i32_0 = arith.constant 0 : i32
    %c0_i32_1 = arith.constant 0 : i32
    %c0_i32_2 = arith.constant 0 : i32
    return %c0_i32, %c0_i32_0, %c0_i32_1 : i32, i32, i32
  }
  func.func @transform_8(%arg0: i32) -> (i32, i32) {
    %c0_i32 = arith.constant 0 : i32
    %c0_i32_0 = arith.constant 0 : i32
    %c0_i32_1 = arith.constant 0 : i32
    return %c0_i32, %c0_i32_0 : i32, i32
  }
  func.func @transform_9(%arg0: i32) -> (i32, i32, i32) {
    %c0_i32 = arith.constant 0 : i32
    %c0_i32_0 = arith.constant 0 : i32
    %c0_i32_1 = arith.constant 0 : i32
    %c0_i32_2 = arith.constant 0 : i32
    return %c0_i32, %c0_i32_0, %c0_i32_1 : i32, i32, i32
  }
  func.func @transform_10(%arg0: i32) -> (i32, i32) {
    %c0_i32 = arith.constant 0 : i32
    %c0_i32_0 = arith.constant 0 : i32
    %c0_i32_1 = arith.constant 0 : i32
    return %c0_i32, %c0_i32_0 : i32, i32
  }
  func.func @transform_11(%arg0: i32) -> (i32, i32) {
    %c0_i32 = arith.constant 0 : i32
    %c0_i32_0 = arith.constant 0 : i32
    %c0_i32_1 = arith.constant 0 : i32
    return %c0_i32, %c0_i32_0 : i32, i32
  }
  func.func @transform_12(%arg0: i32) -> (i32, i32) {
    %c0_i32 = arith.constant 0 : i32
    %c0_i32_0 = arith.constant 0 : i32
    %c0_i32_1 = arith.constant 0 : i32
    return %c0_i32, %c0_i32_0 : i32, i32
  }
  func.func @transform_13(%arg0: i32) -> (i32, i32) {
    %c0_i32 = arith.constant 0 : i32
    %c0_i32_0 = arith.constant 0 : i32
    %c0_i32_1 = arith.constant 0 : i32
    return %c0_i32, %c0_i32_0 : i32, i32
  }
  func.func @transform_14(%arg0: i32) -> (i32, i32, i32) {
    %c0_i32 = arith.constant 0 : i32
    %c0_i32_0 = arith.constant 0 : i32
    %c0_i32_1 = arith.constant 0 : i32
    %c0_i32_2 = arith.constant 0 : i32
    return %c0_i32, %c0_i32_0, %c0_i32_1 : i32, i32, i32
  }
  func.func @transform_15(%arg0: i32) -> (i32, i32) {
    %c0_i32 = arith.constant 0 : i32
    %c0_i32_0 = arith.constant 0 : i32
    %c0_i32_1 = arith.constant 0 : i32
    return %c0_i32, %c0_i32_0 : i32, i32
  }
  func.func @transform_16(%arg0: i32) -> (i32, i32, i32) {
    %c0_i32 = arith.constant 0 : i32
    %c0_i32_0 = arith.constant 0 : i32
    %c0_i32_1 = arith.constant 0 : i32
    return %arg0, %c0_i32, %c0_i32_0 : i32, i32, i32
  }
}

</mosaic_0001>

<bundles_post_ra>
// kernel: acnse_forward.1
= control target key start
LH: loop header
LB: loop body
LE: loop exit
PB: predicated region body
PF: predicated region fallthrough
CT: control target
= control target key end

     0   :  { %s7383_s0 = inlined_call_operand.vmem [shape: f32[2,16,128], index: 0, kind: input, shape index: {}]   ;;  %s7384_s1 = inlined_call_operand.vmem [shape: bf16[3,176,128], index: 1, kind: input, shape index: {}]   ;;  %s7385_s2 = inlined_call_operand.hbm [shape: bf16[3,176,128], index: 2, kind: input, shape index: {}]   ;;  %s7386_s3 = inlined_call_operand.vmem [shape: f32[1,128], index: 3, kind: input, shape index: {}]   ;;  %s7387_s4 = inlined_call_operand.hbm [shape: bf16[3,176,128], index: 4, kind: input, shape index: {}]   ;;  %s7388_s5 = inlined_call_operand.vmem [shape: f32[1,128], index: 5, kind: input, shape index: {}]   ;;  %s7389_s6 = inlined_call_operand.hbm [shape: bf16[3,176,128], index: 6, kind: input, shape index: {}]   ;;  %s7390_s7 = inlined_call_operand.hbm [shape: bf16[3,176,128], index: 7, kind: input, shape index: {}]   ;;  %s7391_s8 = inlined_call_operand.vmem [shape: f32[1,128], index: 8, kind: input, shape index: {}]   ;;  %s7392_s9 = inlined_call_operand.hbm [shape: bf16[3,176,128], index: 9, kind: input, shape index: {}]   ;;  %s7393_s10 = inlined_call_operand.vmem [shape: f32[128,8], index: 10, kind: input, shape index: {}]   ;;  %s7394_s11 = inlined_call_operand.vmem [shape: f32[1,8], index: 11, kind: input, shape index: {}]   ;;  %s7395_s12 = inlined_call_operand.vmem [shape: f32[8,128], index: 12, kind: input, shape index: {}]   ;;  %s7396_s13 = inlined_call_operand.vmem [shape: f32[1,128], index: 13, kind: input, shape index: {}]   ;;  %s7397_s14 = inlined_call_operand.vmem [shape: bf16[7,176,128], index: 14, kind: input, shape index: {}]   ;;  %s7398_s15 = inlined_call_operand.vmem [shape: f32[1,128], index: 15, kind: input, shape index: {}]   ;;  %s7399_s16 = inlined_call_operand.vmem [shape: f32[2,16,128], index: 16, kind: output, shape index: {}]  }
   0x1   :  { %7401 = sst [smem:[#allocation15_spill]] %s7383_s0 }
   0x2   :  { %7402 = sst [smem:[#allocation16_spill]] %s7385_s2 }
   0x3   :  { %7403 = sst [smem:[#allocation17_spill]] %s7387_s4 }
   0x4   :  { %7404 = sst [smem:[#allocation18_spill]] %s7390_s7 }
   0x5   :  { %7405 = sst [smem:[#allocation19_spill]] %s7399_s16 }
   0x6   :  { %21 = vsyncpa [#allocation4], 0 }
   0x7   :  { %22 = vsyncpa [#allocation6], 0 }
   0x8   :  { %23 = vsyncpa [#allocation9], 0  ;;  %s6706_s21 = smov 0  }
   0x9 LB: > { %7406 = sst [smem:[#allocation14_spill]] %s6610_s21  ;;  %s6712_s22 = sadd.s32 4294967295, %s6610_s21   ;;  %s6610_s21 = sphi %s6706_s21, %s29_s21  }
   0xa   : > { %p4765_p0 = scmp.ge.s32.totalorder %s6610_s21, 1  ;;  %p401_p1 = scmp.lt.s32.totalorder %s6610_s21, 3 }
   0xb   : > { %p6399_p2 = scmp.eq.s32.totalorder %s6712_s22, 0  ;;  %s7407_s4 = sld [smem:[#allocation17_spill]] }
   0xc   : > { %p6720_p3 = pnand %p4765_p0, %p401_p1  ;;  %s7409_s7 = sld [smem:[#allocation18_spill]] }
   0xd   : > { %s6612_s30 = smov [#allocation5]   ;;  %s6613_s18 = smov [#allocation8]  }
   0xe   : > { %p6383_p4 = pneg %p6720_p3  ;;  %s434_s0 = sshll.u32 %s6612_s30, 4  ;;  %s435_s0 = int_to_ptr.vmem [resolvable:$true] %s434_s0 }
   0xf   : > { %s465_s19 = sshll.u32 %s6613_s18, 4  ;;  %s7411_s2 = sld [smem:[#allocation16_spill]]  ;;  %s466_s19 = int_to_ptr.vmem [resolvable:$true] %s465_s19 }
  0x10   : > { %p6731_p5 = pnand %p6399_p2, %p6383_p4  ;;  %s6614_s27 = smov 64  }
  0x11   : > { %s432_s25 = sshll.u32 %s7407_s4, 4  ;;  %s6615_s28 = smov 4   ;;  %s433_s25 = int_to_ptr.hbm [resolvable:$true] %s432_s25 }
  0x12   : > { %s463_s29 = sshll.u32 %s7409_s7, 4  ;;  %s6616_s30 = smov [#allocation3]   ;;  %s464_s29 = int_to_ptr.hbm [resolvable:$true] %s463_s29 }
  0x13   : > { %6389 = dma.hbm_to_vmem [thread:$0]  (!%p6731_p5), %s433_s25, 4224, %s435_s0, [#allocation6], %s6614_s27, %s6614_s27, %s6615_s28  }
  0x14   : > { %6395 = dma.hbm_to_vmem [thread:$0]  (!%p6731_p5), %s464_s29, 4224, %s466_s19, [#allocation9], %s6614_s27, %s6614_s27, %s6615_s28  }
  0x15   : > { %s415_s24 = sshll.u32 %s7411_s2, 4  ;;  %s417_s4 = sshll.u32 %s6616_s30, 4  ;;  %s416_s24 = int_to_ptr.hbm [resolvable:$true] %s415_s24  ;;  %s418_s4 = int_to_ptr.vmem [resolvable:$true] %s417_s4 }
  0x16   : > { %s449_s18 = sshll.u32 %s7389_s6, 4  ;;  %s480_s2 = sshll.u32 %s7392_s9, 4  ;;  %s450_s18 = int_to_ptr.hbm [resolvable:$true] %s449_s18  ;;  %s481_s2 = int_to_ptr.hbm [resolvable:$true] %s480_s2 }
  0x17   : > { %6386 = dma.hbm_to_vmem [thread:$0]  (!%p6731_p5), %s416_s24, 4224, %s418_s4, [#allocation4], %s6614_s27, %s6614_s27, %s6615_s28  }
  0x18   : > { %s6617_s16 = smov [#allocation7]   ;;  %s6618_s29 = smov [#allocation10]  }
  0x19   : > { %s451_s25 = sshll.u32 %s6617_s16, 4  ;;  %s482_s0 = sshll.u32 %s6618_s29, 4  ;;  %s452_s25 = int_to_ptr.vmem [resolvable:$true] %s451_s25  ;;  %s483_s0 = int_to_ptr.vmem [resolvable:$true] %s482_s0 }
  0x1a   : > { %6392 = dma.hbm_to_vmem [thread:$0]  (!%p6731_p5), %s450_s18, 4224, %s452_s25, [#allocation6], %s6614_s27, %s6614_s27, %s6615_s28  }
  0x1b   : > { %6398 = dma.hbm_to_vmem [thread:$0]  (!%p6731_p5), %s481_s2, 4224, %s483_s0, [#allocation9], %s6614_s27, %s6614_s27, %s6615_s28  }
  0x1c   : > { %524 = sbr.rel (%p6720_p3) target bundleno = 2229 (0x8b5), region = 84 }
  0x21   : > { %6597 = dma.done.wait (%p6399_p2), [#allocation4], 4224  }
  0x22   : > { %6599 = vsyncadd (%p6399_p2), [#allocation4], 4294963072 }
  0x23   : > { %6601 = dma.done.wait (%p6399_p2), [#allocation6], 8448  }
  0x24   : > { %6603 = vsyncadd (%p6399_p2), [#allocation6], 4294958848 }
  0x25   : > { %6605 = dma.done.wait (%p6399_p2), [#allocation9], 8448  }
  0x26   : > { %6607 = vsyncadd (%p6399_p2), [#allocation9], 4294958848  ;;  %p595_p6 = scmp.lt.s32.totalorder %s6712_s22, 1  ;;  %vm612_vm0 = vcmask 195587   ;;  %vm618_vm1 = vcmask 392387   ;;  %v6619_v0 = vmov 0.0  }
  0x27   : > { %606 = vst [vmem:[#allocation2] sm:$0x7] %v6619_v0  ;;  %s7412_s16 = sld [smem:[#allocation15_spill]]  ;;  %v6095_v3 = vld [vmem:[%s7384_s1 + $0x38] sm:$0xff]  ;;  %v6106_v6 = vld [vmem:[%s7384_s1 + $0x90] sm:$0xff]  ;;  %s6620_s30 = smov 24  }
  0x28   : > { %s7416_s22 = smov (!%p595_p6, %s6712_s22), 1  ;;  %613 = vst.msk [vmem:[#allocation2] sm:$0xf8] %vm612_vm0, %v6619_v0  ;;  %928 = vmatpush.bf16.msra.mxu2 %v6095_v3  ;;  %v6094_v7 = vld [vmem:[%s7384_s1 + $0x30] sm:$0xff]  ;;  %819 = vmatpush.bf16.msra.mxu0 %v6106_v6  ;;  %v6105_v8 = vld [vmem:[%s7384_s1 + $0x88] sm:$0xff]  ;;  %vm628_vm2 = vcmask 1042432  }
  0x29   : > { %619 = vst.msk [vmem:[#allocation2 + $0x8] sm:$0xf8] %vm618_vm1, %v6619_v0  ;;  %s6086_s2 = sshll.u32 %s7416_s22, 4  ;;  %v6093_v9 = vld [vmem:[%s7384_s1 + $0x28] sm:$0xff]  ;;  %v6104_v12 = vld [vmem:[%s7384_s1 + $0x80] sm:$0xff]  ;;  %vm616_vm3 = vcmask 190464  }
  0x2a   : > { %609 = vst [vmem:[#allocation2 + $0x20] sm:$0x38] %v6619_v0  ;;  %v6109_v11 = vld [vmem:[%s7384_s1 + $0xa8] sm:$0xff]  ;;  %v6092_v13 = vld [vmem:[%s7384_s1 + $0x20] sm:$0xff]  ;;  %vm622_vm4 = vcmask 387264   ;;  %vm607_vm5 = vcmask 387072  }
  0x2b   : > { %838 = vmatpush.bf16.msra.mxu1 %v6109_v11  ;;  %v6108_v14 = vld [vmem:[%s7384_s1 + $0xa0] sm:$0xff]  ;;  %617 = vst.msk [vmem:[#allocation2 + $0x20] sm:$0x7] %vm616_vm3, %v6619_v0  ;;  %v6103_v15 = vld [vmem:[%s7384_s1 + $0x78] sm:$0xff]  ;;  %vm614_vm6 = vcmask 195584   ;;  %vm620_vm7 = vcmask 392384  }
  0x2c   : > { %929 = vmatpush.bf16.msra.mxu2 %v6094_v7  ;;  %820 = vmatpush.bf16.msra.mxu0 %v6105_v8  ;;  %v6091_v16 = vld [vmem:[%s7384_s1 + $0x18] sm:$0xff]  ;;  %623 = vst.msk [vmem:[#allocation2 + $0x28] sm:$0x7] %vm622_vm4, %v6619_v0  ;;  %vm610_vm8 = vcmask 390147   ;;  %v6102_v18 = vld [vmem:[%s7384_s1 + $0x70] sm:$0xff]  ;;  %v6117_v21 = vld [vmem:[%s7384_s1 + $0xe8] sm:$0xff] }
  0x2d   : > { %s599_s21 = scalar_lea.vmem %s7412_s16, %s6086_s2  ;;  %615 = vst.msk [vmem:[#allocation2 + $0x10] sm:$0xff] %vm614_vm6, %v6619_v0  ;;  %v6107_v17 = vld [vmem:[%s7384_s1 + $0x98] sm:$0xff]  ;;  %v6090_v19 = vld [vmem:[%s7384_s1 + $0x10] sm:$0xff]  ;;  %v6101_v22 = vld [vmem:[%s7384_s1 + $0x68] sm:$0xff]  ;;  %vm641_vm9 = vcmask 1047747   ;;  %vm647_vm10 = vcmask 1042624  }
  0x2e   : > { %v6779_v1 = vld [vmem:[%s599_s21] sm:$0xff]  ;;  %v6781_v2 = vld [vmem:[%s599_s21 + $0x8] sm:$0xff]  ;;  %621 = vst.msk [vmem:[#allocation2 + $0x18] sm:$0xff] %vm620_vm7, %v6619_v0  ;;  %v6098_v20 = vld [vmem:[%s7384_s1 + $0x50] sm:$0xff]  ;;  %vm644_vm11 = vcmask 1047744   ;;  %vm851_vm12 = vcmask 1046528  }
  0x2f   : > { %v629_v4 = vrot.slane %v6779_v1, 5  ;;  %v630_v5 = vrot.slane %v6781_v2, 5  ;;  %839 = vmatpush.bf16.msra.mxu1 %v6108_v14  ;;  %608 = vst.msk [vmem:[#allocation2 + $0x8] sm:$0x7] %vm607_vm5, %v6619_v0  ;;  %v6089_v23 = vld [vmem:[%s7384_s1 + $0x8] sm:$0xff]  ;;  %947 = vmatpush.bf16.msra.mxu3 %v6098_v20  ;;  %v6116_v25 = vld [vmem:[%s7384_s1 + $0xe0] sm:$0xff] }
  0x30   : > { %930 = vmatpush.bf16.msra.mxu2 %v6093_v9  ;;  %821 = vmatpush.bf16.msra.mxu0 %v6104_v12  ;;  %611 = vst.msk [vmem:[#allocation2 + $0x28] sm:$0x38] %vm610_vm8, %v6619_v0  ;;  %v6097_v24 = vld [vmem:[%s7384_s1 + $0x48] sm:$0xff]  ;;  %v6100_v26 = vld [vmem:[%s7384_s1 + $0x60] sm:$0xff]  ;;  %v6115_v29 = vld [vmem:[%s7384_s1 + $0xd8] sm:$0xff]  ;;  %vm815_vm13 = vcmask 392192  }
  0x31   : > { %632 = vrot.lane.b32.xlu0 %v629_v4, %s6620_s30  ;;  %636 = vrot.lane.b32.xlu1 %v630_v5, %s6620_s30  ;;  %v631_v10 = vsel %vm628_vm2, %v629_v4, %v630_v5  ;;  %v6088_v27 = vld [vmem:[%s7384_s1] sm:$0xff]  ;;  %v6099_v30 = vld [vmem:[%s7384_s1 + $0x58] sm:$0xff]  ;;  %vm713_vm14 = vsmask.f32 6400  ;;  %vm991_vm15 = vcmask 1045504   ;;  %s7413_s19 = sld [smem:[#allocation19_spill]] }
  0x32   : > { %v6096_v28 = vld [vmem:[%s7384_s1 + $0x40] sm:$0xff]  ;;  %v6114_v31 = vld [vmem:[%s7384_s1 + $0xd0] sm:$0xff]  ;;  %v6113_v32 = vld [vmem:[%s7384_s1 + $0xc8] sm:$0xff] }
  0x33   : > { %840 = vmatpush.bf16.msra.mxu1 %v6107_v17  ;;  %948 = vmatpush.bf16.msra.mxu3 %v6097_v24  ;;  %v6120_v33 = vld [vmem:[%s7384_s1 + $0x100] sm:$0xff]  ;;  %v6119_v34 = vld [vmem:[%s7384_s1 + $0xf8] sm:$0xff]  ;;  %v6118_v38 = vld [vmem:[%s7384_s1 + $0xf0] sm:$0xff] }
  0x34   : > { %931 = vmatpush.bf16.msra.mxu2 %v6092_v13  ;;  %822 = vmatpush.bf16.msra.mxu0 %v6103_v15  ;;  %v6112_v35 = vld [vmem:[%s7384_s1 + $0xc0] sm:$0xff]  ;;  %v6111_v39 = vld [vmem:[%s7384_s1 + $0xb8] sm:$0xff]  ;;  %v6110_v40 = vld [vmem:[%s7384_s1 + $0xb0] sm:$0xff] }
  0x37   : > { %1068 = vmatpush.bf16.msrb.mxu1 %v6117_v21  ;;  %949 = vmatpush.bf16.msra.mxu3 %v6096_v28  ;;  %s604_s24 = scalar_lea.vmem %s7413_s19, %s6086_s2 }
  0x38   : > { %932 = vmatpush.bf16.msra.mxu2 %v6091_v16  ;;  %823 = vmatpush.bf16.msra.mxu0 %v6102_v18 }
  0x39   : > { %634 = vrot.lane.b32.xlu0 %v631_v10, %s6620_s30 }
  0x3b   : > { %1069 = vmatpush.bf16.msrb.mxu1 %v6116_v25  ;;  %1087 = vmatpush.bf16.msrb.mxu3 %v6120_v33 }
  0x3c   : > { %933 = vmatpush.bf16.msra.mxu2 %v6090_v19  ;;  %824 = vmatpush.bf16.msra.mxu0 %v6101_v22 }
  0x3f   : > { %1070 = vmatpush.bf16.msrb.mxu1 %v6115_v29  ;;  %1088 = vmatpush.bf16.msrb.mxu3 %v6119_v34 }
  0x40   : > { %934 = vmatpush.bf16.msra.mxu2 %v6089_v23  ;;  %825 = vmatpush.bf16.msra.mxu0 %v6100_v26 }
  0x43   : > { %1071 = vmatpush.bf16.msrb.mxu1 %v6114_v31  ;;  %1089 = vmatpush.bf16.msrb.mxu3 %v6118_v38 }
  0x44   : > { %935 = vmatpush.bf16.msra.mxu2 %v6088_v27  ;;  %826 = vmatpush.bf16.msra.mxu0 %v6099_v30 }
  0x47   : > { %1072 = vmatpush.bf16.msrb.mxu1 %v6113_v32 }
  0x4b   : > { %1073 = vmatpush.bf16.msrb.mxu1 %v6112_v35 }
  0x4f   : > { %1074 = vmatpush.bf16.msrb.mxu1 %v6111_v39 }
  0x53   : > { %1075 = vmatpush.bf16.msrb.mxu1 %v6110_v40 }
  0xa3   : > { %v633_v36 = vpop.permute.xlu0 %632  ;;  %v637_v37 = vpop.permute.xlu1 %636 }
  0xa4   : > { %642 = vst.msk [vmem:[#allocation2] sm:$0xf8] %vm641_vm9, %v633_v36 }
  0xa5   : > { %643 = vst.msk [vmem:[#allocation2 + $0x8] sm:$0xf8] %vm612_vm0, %v633_v36 }
  0xa6   : > { %648 = vst.msk [vmem:[#allocation2 + $0x20] sm:$0x7] %vm647_vm10, %v637_v37 }
  0xa7   : > { %649 = vst.msk [vmem:[#allocation2 + $0x28] sm:$0x7] %vm616_vm3, %v637_v37 }
  0xab   : > { %v635_v41 = vpop.permute.xlu0 %634  ;;  %v650_v54 = vld [vmem:[#allocation2] sm:$0xfc] }
  0xac   : > { %645 = vst.msk [vmem:[#allocation2 + $0x10] sm:$0xff] %vm644_vm11, %v635_v41  ;;  %v682_v55 = vld [vmem:[#allocation2] sm:$0xf8]  ;;  %v651_v58 = vld [vmem:[#allocation2 + $0x8] sm:$0xfc] }
  0xad   : > { %646 = vst.msk [vmem:[#allocation2 + $0x18] sm:$0xff] %vm614_vm6, %v635_v41  ;;  %v654_v42 = vld [vmem:[#allocation2 + $0x20] sm:$0x3]  ;;  %v683_v3 = vld [vmem:[#allocation2 + $0x8] sm:$0xf8] }
  0xae   : > { %v684_v43 = vld [vmem:[#allocation2 + $0x20] sm:$0x7]  ;;  %v655_v44 = vld [vmem:[#allocation2 + $0x28] sm:$0x3]  ;;  %v658_v47 = vpack.c.bf16 %v654_v42, %v654_v42  ;;  %v957_v27 = vld [vmem:[#allocation2 + $0x8] sm:$0xf0] }
  0xaf   : > { %v688_v45 = vpack.c.bf16 %v684_v43, %v684_v43  ;;  %v685_v46 = vld [vmem:[#allocation2 + $0x28] sm:$0x7]  ;;  %v659_v48 = vpack.c.bf16 %v655_v44, %v655_v44  ;;  %v958_v30 = vld [vmem:[#allocation2 + $0x20] sm:$0xf]  ;;  %v956_v31 = vld [vmem:[#allocation2] sm:$0xf0] }
  0xb0   : > { %v689_v49 = vpack.c.bf16 %v685_v46, %v685_v46  ;;  %v853_v57 = vrot.slane %v658_v47, 1  ;;  %v959_v26 = vld [vmem:[#allocation2 + $0x28] sm:$0xf]  ;;  %v962_v35 = vpack.c.bf16 %v958_v30, %v958_v30 }
  0xb1   : > { %v723_v50 = vshrl.u32 %v688_v45, 16  ;;  %v726_v51 = vshll.u32 %v688_v45, 16  ;;  %v856_v59 = vrot.slane %v659_v48, 1  ;;  %v963_v29 = vpack.c.bf16 %v959_v26, %v959_v26  ;;  %v6128_v47 = vld [vmem:[#allocation3 + $0x38] sm:$0xff]  ;;  %v6149_v26 = vld [vmem:[#allocation3 + $0xe0] sm:$0xff] }
  0xb2   : > { %v740_v52 = vshrl.u32 %v689_v49, 16  ;;  %v743_v53 = vshll.u32 %v689_v49, 16  ;;  %v993_v38 = vrot.slane %v962_v35, 2  ;;  %1400 = vmatpush.bf16.msrb.mxu2 %v6128_v47  ;;  %v6148_v30 = vld [vmem:[#allocation3 + $0xd8] sm:$0xff]  ;;  %v6153_v35 = vld [vmem:[#allocation3 + $0x100] sm:$0xff] }
  0xb3   : > { %v652_v56 = vld [vmem:[#allocation2 + $0x10] sm:$0xff]  ;;  %v725_v63 = vrot.slane %v723_v50, 1  ;;  %v728_v0 = vrot.slane %v726_v51, 2  ;;  %v996_v33 = vrot.slane %v963_v29, 2 }
  0xb4   : > { %v656_v60 = vpack.c.bf16 %v652_v56, %v650_v54  ;;  %v653_v61 = vld [vmem:[#allocation2 + $0x18] sm:$0xff]  ;;  %v686_v62 = vpack.c.bf16 %v652_v56, %v682_v55  ;;  %v742_v6 = vrot.slane %v740_v52, 1  ;;  %v745_v7 = vrot.slane %v743_v53, 2  ;;  %v6129_v29 = vld [vmem:[#allocation3 + $0x40] sm:$0xff] }
  0xb5   : > { %v657_v4 = vpack.c.bf16 %v653_v61, %v651_v58  ;;  %v687_v5 = vpack.c.bf16 %v653_v61, %v683_v3  ;;  %v729_v17 = vor.u32 %v728_v0, %v725_v63  ;;  %v961_v28 = vpack.c.bf16 %v653_v61, %v957_v27  ;;  %v6133_v27 = vld [vmem:[#allocation3 + $0x60] sm:$0xff] }
  0xb6   : > { %v852_v8 = vrot.slane %v656_v60, 1  ;;  %v715_v9 = vshrl.u32 %v686_v62, 16  ;;  %v718_v10 = vshll.u32 %v686_v62, 16  ;;  %v746_v21 = vor.u32 %v745_v7, %v742_v6 }
  0xb7   : > { %v855_v11 = vrot.slane %v657_v4, 1  ;;  %v732_v12 = vshrl.u32 %v687_v5, 16  ;;  %v735_v13 = vshll.u32 %v687_v5, 16  ;;  %v995_v32 = vrot.slane %v961_v28, 2  ;;  %v6121_v28 = vld [vmem:[#allocation3] sm:$0xff] }
  0xb8   : > { %v854_v14 = vsel %vm851_vm12, %v852_v8, %v853_v57  ;;  %v717_v15 = vrot.slane %v715_v9, 1  ;;  %v720_v16 = vrot.slane %v718_v10, 2  ;;  %v960_v34 = vpack.c.bf16 %v652_v56, %v956_v31  ;;  %v6139_v8 = vld [vmem:[#allocation3 + $0x90] sm:$0xff]  ;;  %v6138_v10 = vld [vmem:[#allocation3 + $0x88] sm:$0xff]  ;;  %v6132_v31 = vld [vmem:[#allocation3 + $0x58] sm:$0xff] }
  0xb9   : > { %936 = vmatmul.bf16.vlgmr.msra.gmra.mxu2 %v854_v14  ;;  %v857_v18 = vsel %vm851_vm12, %v855_v11, %v856_v59  ;;  %v734_v19 = vrot.slane %v732_v12, 1  ;;  %v737_v20 = vrot.slane %v735_v13, 2  ;;  %v997_v36 = vsel %vm991_vm15, %v995_v32, %v996_v33  ;;  %v6127_v9 = vld [vmem:[#allocation3 + $0x30] sm:$0xff]  ;;  %v6126_v11 = vld [vmem:[#allocation3 + $0x28] sm:$0xff]  ;;  %v6137_v13 = vld [vmem:[#allocation3 + $0x80] sm:$0xff] }
  0xba   : > { %4893 = vmatmul.msk.bf16.vlgmr.msra.gmra.mxu3 %vm815_vm13, %v857_v18  ;;  %v721_v22 = vor.u32 %v720_v16, %v717_v15  ;;  %v992_v37 = vrot.slane %v960_v34, 2  ;;  %1401 = vmatpush.bf16.msrb.mxu2 %v6127_v9  ;;  %v6142_v12 = vld [vmem:[#allocation3 + $0xa8] sm:$0xff]  ;;  %v6125_v14 = vld [vmem:[#allocation3 + $0x20] sm:$0xff]  ;;  %v6136_v16 = vld [vmem:[#allocation3 + $0x78] sm:$0xff] }
  0xbb   : > { %v738_v23 = vor.u32 %v737_v20, %v734_v19  ;;  %1292 = vmatpush.bf16.msra.mxu3 %v6139_v8  ;;  %1311 = vmatpush.bf16.msrb.mxu0 %v6142_v12  ;;  %v6141_v15 = vld [vmem:[#allocation3 + $0xa0] sm:$0xff]  ;;  %v6140_v18 = vld [vmem:[#allocation3 + $0x98] sm:$0xff]  ;;  %v6135_v19 = vld [vmem:[#allocation3 + $0x70] sm:$0xff] }
  0xbc   : > { %v730_v24 = vsel %vm713_vm14, %v721_v22, %v729_v17  ;;  %v994_v39 = vsel %vm991_vm15, %v992_v37, %v993_v38  ;;  %v6124_v17 = vld [vmem:[#allocation3 + $0x18] sm:$0xff]  ;;  %v6123_v20 = vld [vmem:[#allocation3 + $0x10] sm:$0xff]  ;;  %v6150_v22 = vld [vmem:[#allocation3 + $0xe8] sm:$0xff] }
  0xbd   : > { %827 = vmatmul.bf16.vlgmr.msra.gmra.mxu0 %v730_v24  ;;  %v747_v25 = vsel %vm713_vm14, %v738_v23, %v746_v21  ;;  %v6131_v21 = vld [vmem:[#allocation3 + $0x50] sm:$0xff]  ;;  %v6134_v23 = vld [vmem:[#allocation3 + $0x68] sm:$0xff]  ;;  %v6145_v37 = vld [vmem:[#allocation3 + $0xc0] sm:$0xff] }
  0xbe   : > { %4848 = vmatmul.msk.bf16.vlgmr.msra.gmra.mxu1 %vm815_vm13, %v747_v25  ;;  %1402 = vmatpush.bf16.msrb.mxu2 %v6126_v11  ;;  %v6122_v24 = vld [vmem:[#allocation3 + $0x8] sm:$0xff]  ;;  %v6147_v32 = vld [vmem:[#allocation3 + $0xd0] sm:$0xff] }
  0xbf   : > { %1293 = vmatpush.bf16.msra.mxu3 %v6138_v10  ;;  %1312 = vmatpush.bf16.msrb.mxu0 %v6141_v15  ;;  %v6130_v25 = vld [vmem:[#allocation3 + $0x48] sm:$0xff] }
  0xc0   : > { %1419 = vmatpush.bf16.msra.mxu1 %v6131_v21  ;;  %v6146_v34 = vld [vmem:[#allocation3 + $0xc8] sm:$0xff] }
  0xc2   : > { %1403 = vmatpush.bf16.msrb.mxu2 %v6125_v14 }
  0xc3   : > { %1294 = vmatpush.bf16.msra.mxu3 %v6137_v13  ;;  %1313 = vmatpush.bf16.msrb.mxu0 %v6140_v18 }
  0xc4   : > { %1420 = vmatpush.bf16.msra.mxu1 %v6130_v25 }
  0xc6   : > { %1404 = vmatpush.bf16.msrb.mxu2 %v6124_v17 }
  0xc7   : > { %1295 = vmatpush.bf16.msra.mxu3 %v6136_v16  ;;  %1539 = vmatpush.bf16.msra.mxu0 %v6150_v22 }
  0xc8   : > { %1421 = vmatpush.bf16.msra.mxu1 %v6129_v29 }
  0xca   : > { %4960 = vmatmul.msk.bf16.vlgmr.msrb.gmra.mxu3 %vm815_vm13, %v997_v36  ;;  %1405 = vmatpush.bf16.msrb.mxu2 %v6123_v20  ;;  %v6152_v36 = vld [vmem:[#allocation3 + $0xf8] sm:$0xff] }
  0xcb   : > { %1296 = vmatpush.bf16.msra.mxu3 %v6135_v19  ;;  %1540 = vmatpush.bf16.msra.mxu0 %v6149_v26 }
  0xce   : > { %1076 = vmatmul.bf16.vlgmr.msrb.gmra.mxu1 %v994_v39  ;;  %1406 = vmatpush.bf16.msrb.mxu2 %v6122_v24  ;;  %v6151_v39 = vld [vmem:[#allocation3 + $0xf0] sm:$0xff] }
  0xcf   : > { %1297 = vmatpush.bf16.msra.mxu3 %v6134_v23  ;;  %1541 = vmatpush.bf16.msra.mxu0 %v6148_v30 }
  0xd0   : > { %1558 = vmatpush.bf16.msrb.mxu1 %v6153_v35 }
  0xd2   : > { %1407 = vmatpush.bf16.msrb.mxu2 %v6121_v28 }
  0xd3   : > { %1298 = vmatpush.bf16.msra.mxu3 %v6133_v27  ;;  %1542 = vmatpush.bf16.msra.mxu0 %v6147_v32 }
  0xd4   : > { %1559 = vmatpush.bf16.msrb.mxu1 %v6152_v36 }
  0xd7   : > { %1299 = vmatpush.bf16.msra.mxu3 %v6132_v31  ;;  %1543 = vmatpush.bf16.msra.mxu0 %v6146_v34 }
  0xd8   : > { %1560 = vmatpush.bf16.msrb.mxu1 %v6151_v39 }
  0xdb   : > { %1544 = vmatpush.bf16.msra.mxu0 %v6145_v37 }
 0x13a   : > { %v828_v42 = vpop.f32.mrf.mxu0 }
 0x13b   : > { %v842_v40 = vpop.f32.mrf.mxu1 }
 0x13c   : > { %v937_v44 = vpop.f32.mrf.mxu2  ;;  %v843_v46 = vadd.f32 %v842_v40, %v828_v42  ;;  %v6144_v40 = vld [vmem:[#allocation3 + $0xb8] sm:$0xff] }
 0x13d   : > { %v951_v41 = vpop.f32.mrf.mxu3  ;;  %1545 = vmatpush.bf16.msra.mxu0 %v6144_v40 }
 0x13e   : > { %v938_v48 = vadd.f32 %v937_v44, %v843_v46 }
 0x140   : > { %v952_v52 = vadd.f32 %v951_v41, %v938_v48  ;;  %v6143_v41 = vld [vmem:[#allocation3 + $0xb0] sm:$0xff] }
 0x141   : > { %1546 = vmatpush.bf16.msra.mxu0 %v6143_v41 }
 0x142   : > { %v830_v49 = vpop.f32.mrf.mxu0 }
 0x143   : > { %v844_v43 = vpop.f32.mrf.mxu1 }
 0x144   : > { %v845_v53 = vadd.f32 %v844_v43, %v830_v49  ;;  %v939_v55 = vpop.f32.mrf.mxu2 }
 0x145   : > { %v953_v45 = vpop.f32.mrf.mxu3 }
 0x146   : > { %v940_v57 = vadd.f32 %v939_v55, %v845_v53 }
 0x148   : > { %v954_v63 = vadd.f32 %v953_v45, %v940_v57 }
 0x14b   : > { %v1077_v50 = vpop.f32.mrf.mxu1 }
 0x14d   : > { %v1091_v51 = vpop.f32.mrf.mxu3 }
 0x14e   : > { %v1092_v54 = vadd.f32 %v1091_v51, %v1077_v50 }
 0x150   : > { %v1096_v56 = vadd.f32 %v1092_v54, %v952_v52 }
 0x152   : > { %v1100_v58 = vmul.f32 0.1, %v1096_v56  ;;  %vm1098_vm1 = vcmp.ge.f32.partialorder %v1096_v56, 0.0 }
 0x153   : > { %v1079_v60 = vpop.f32.mrf.mxu1 }
 0x154   : > { %v1102_v59 = vsel %vm1098_vm1, %v1096_v56, %v1100_v58 }
 0x155   : > { %v1093_v61 = vpop.f32.mrf.mxu3  ;;  %v1107_v62 = vrot.slane %v1102_v59, 5 }
 0x156   : > { %v1094_v0 = vadd.f32 %v1093_v61, %v1079_v60 }
 0x157   : > { %1110 = vrot.lane.b32.xlu1 %v1107_v62, %s6620_s30 }
 0x158   : > { %v1097_v3 = vadd.f32 %v1094_v0, %v954_v63 }
 0x15a   : > { %vm1099_vm4 = vcmp.ge.f32.partialorder %v1097_v3, 0.0  ;;  %v1101_v4 = vmul.f32 0.1, %v1097_v3 }
 0x15c   : > { %v1103_v5 = vsel %vm1099_vm4, %v1097_v3, %v1101_v4 }
 0x15d   : > { %v1108_v6 = vrot.slane %v1103_v5, 5 }
 0x15f   : > { %v1109_v7 = vsel %vm628_vm2, %v1107_v62, %v1108_v6 }
 0x160   : > { %1112 = vrot.lane.b32.xlu2 %v1109_v7, %s6620_s30 }
 0x168   : > { %1114 = vrot.lane.b32.xlu2 %v1108_v6, %s6620_s30 }
 0x1ba   : > { %v1113_v33 = vpop.permute.xlu2 %1112 }
 0x1bb   : > { %1121 = vst.msk [vmem:[#allocation2 + $0x10] sm:$0xff] %vm644_vm11, %v1113_v33 }
 0x1bc   : > { %1122 = vst.msk [vmem:[#allocation2 + $0x18] sm:$0xff] %vm614_vm6, %v1113_v33 }
 0x1c2   : > { %v1115_v38 = vpop.permute.xlu2 %1114  ;;  %v1127_v53 = vld [vmem:[#allocation2 + $0x10] sm:$0xff] }
 0x1c3   : > { %1123 = vst.msk [vmem:[#allocation2 + $0x20] sm:$0x7] %vm647_vm10, %v1115_v38  ;;  %v1128_v56 = vld [vmem:[#allocation2 + $0x18] sm:$0xff] }
 0x1c4   : > { %1124 = vst.msk [vmem:[#allocation2 + $0x28] sm:$0x7] %vm616_vm3, %v1115_v38 }
 0x1c9   : > { %v1111_v42 = vpop.permute.xlu1 %1110 }
 0x1ca   : > { %1119 = vst.msk [vmem:[#allocation2] sm:$0xf8] %vm641_vm9, %v1111_v42  ;;  %v1129_v43 = vld [vmem:[#allocation2 + $0x20] sm:$0x3] }
 0x1cb   : > { %v1159_v44 = vld [vmem:[#allocation2 + $0x20] sm:$0x7]  ;;  %1120 = vst.msk [vmem:[#allocation2 + $0x8] sm:$0xf8] %vm612_vm0, %v1111_v42  ;;  %v1130_v45 = vld [vmem:[#allocation2 + $0x28] sm:$0x3]  ;;  %v1133_v49 = vpack.c.bf16 %v1129_v43, %v1129_v43 }
 0x1cc   : > { %v1163_v46 = vpack.c.bf16 %v1159_v44, %v1159_v44  ;;  %v1160_v47 = vld [vmem:[#allocation2 + $0x28] sm:$0x7]  ;;  %v1134_v50 = vpack.c.bf16 %v1130_v45, %v1130_v45  ;;  %v1430_v32 = vld [vmem:[#allocation2 + $0x20] sm:$0xf] }
 0x1cd   : > { %v1164_v48 = vpack.c.bf16 %v1160_v47, %v1160_v47  ;;  %v1325_v60 = vrot.slane %v1133_v49, 1  ;;  %v1431_v28 = vld [vmem:[#allocation2 + $0x28] sm:$0xf]  ;;  %v1434_v36 = vpack.c.bf16 %v1430_v32, %v1430_v32  ;;  %v6165_v32 = vld [vmem:[#allocation5 + $0x58] sm:$0xff] }
 0x1ce   : > { %v1197_v51 = vshrl.u32 %v1163_v46, 16  ;;  %v1200_v52 = vshll.u32 %v1163_v46, 16  ;;  %v1328_v62 = vrot.slane %v1134_v50, 1  ;;  %v1435_v31 = vpack.c.bf16 %v1431_v28, %v1431_v28  ;;  %v6166_v28 = vld [vmem:[#allocation5 + $0x60] sm:$0xff] }
 0x1cf   : > { %v1214_v54 = vshrl.u32 %v1164_v48, 16  ;;  %v1217_v58 = vshll.u32 %v1164_v48, 16  ;;  %v1464_v39 = vrot.slane %v1434_v36, 2  ;;  %v6178_v36 = vld [vmem:[#allocation5 + $0xc0] sm:$0xff] }
 0x1d0   : > { %v1199_v4 = vrot.slane %v1197_v51, 1  ;;  %v1202_v5 = vrot.slane %v1200_v52, 2  ;;  %v1467_v35 = vrot.slane %v1435_v31, 2  ;;  %v6181_v31 = vld [vmem:[#allocation5 + $0xd8] sm:$0xff] }
 0x1d1   : > { %v1125_v55 = vld [vmem:[#allocation2] sm:$0xfc]  ;;  %v1216_v10 = vrot.slane %v1214_v54, 1  ;;  %v1219_v14 = vrot.slane %v1217_v58, 2 }
 0x1d2   : > { %v1157_v57 = vld [vmem:[#allocation2] sm:$0xf8]  ;;  %v1131_v59 = vpack.c.bf16 %v1127_v53, %v1125_v55  ;;  %v1126_v61 = vld [vmem:[#allocation2 + $0x8] sm:$0xfc]  ;;  %v1203_v22 = vor.u32 %v1202_v5, %v1199_v4  ;;  %v6426_v55 = vld [vmem:[%s7386_s3] ss:$0 sm:$0xff] }
 0x1d3   : > { %v1161_v63 = vpack.c.bf16 %v1127_v53, %v1157_v57  ;;  %v1158_v0 = vld [vmem:[#allocation2 + $0x8] sm:$0xf8]  ;;  %v1132_v3 = vpack.c.bf16 %v1128_v56, %v1126_v61  ;;  %v1220_v24 = vor.u32 %v1219_v14, %v1216_v10  ;;  %v1428_v30 = vld [vmem:[#allocation2] sm:$0xf0]  ;;  %v6158_v14 = vld [vmem:[#allocation5 + $0x20] sm:$0xff] }
 0x1d4   : > { %v1162_v6 = vpack.c.bf16 %v1128_v56, %v1158_v0  ;;  %v1324_v7 = vrot.slane %v1131_v59, 1  ;;  %v1429_v27 = vld [vmem:[#allocation2 + $0x8] sm:$0xf0]  ;;  %v1432_v34 = vpack.c.bf16 %v1127_v53, %v1428_v30  ;;  %v6162_v30 = vld [vmem:[#allocation5 + $0x40] sm:$0xff] }
 0x1d5   : > { %v1189_v8 = vshrl.u32 %v1161_v63, 16  ;;  %v1192_v9 = vshll.u32 %v1161_v63, 16  ;;  %v1327_v11 = vrot.slane %v1132_v3, 1  ;;  %v1433_v29 = vpack.c.bf16 %v1128_v56, %v1429_v27  ;;  %v6160_v10 = vld [vmem:[#allocation5 + $0x30] sm:$0xff] }
 0x1d6   : > { %v1206_v12 = vshrl.u32 %v1162_v6, 16  ;;  %v1209_v13 = vshll.u32 %v1162_v6, 16  ;;  %v1326_v15 = vsel %vm851_vm12, %v1324_v7, %v1325_v60  ;;  %v1463_v38 = vrot.slane %v1432_v34, 2  ;;  %v6179_v34 = vld [vmem:[#allocation5 + $0xc8] sm:$0xff] }
 0x1d7   : > { %v1191_v16 = vrot.slane %v1189_v8, 1  ;;  %v1194_v17 = vrot.slane %v1192_v9, 2  ;;  %1408 = vmatmul.bf16.vlgmr.msrb.gmra.mxu2 %v1326_v15  ;;  %v1329_v18 = vsel %vm851_vm12, %v1327_v11, %v1328_v62  ;;  %v1466_v33 = vrot.slane %v1433_v29, 2  ;;  %v6161_v8 = vld [vmem:[#allocation5 + $0x38] sm:$0xff]  ;;  %v6172_v9 = vld [vmem:[#allocation5 + $0x90] sm:$0xff]  ;;  %v6171_v11 = vld [vmem:[#allocation5 + $0x88] sm:$0xff] }
 0x1d8   : > { %v1208_v19 = vrot.slane %v1206_v12, 1  ;;  %v1211_v20 = vrot.slane %v1209_v13, 2  ;;  %5050 = vmatmul.msk.bf16.vlgmr.msra.gmra.mxu1 %vm815_vm13, %v1329_v18  ;;  %v1465_v40 = vsel %vm991_vm15, %v1463_v38, %v1464_v39  ;;  %1764 = vmatpush.bf16.msrb.mxu3 %v6172_v9  ;;  %v6159_v12 = vld [vmem:[#allocation5 + $0x28] sm:$0xff]  ;;  %v6170_v13 = vld [vmem:[#allocation5 + $0x80] sm:$0xff]  ;;  %v6173_v18 = vld [vmem:[#allocation5 + $0x98] sm:$0xff] }
 0x1d9   : > { %v1195_v21 = vor.u32 %v1194_v17, %v1191_v16  ;;  %v1468_v37 = vsel %vm991_vm15, %v1466_v33, %v1467_v35  ;;  %1872 = vmatpush.bf16.msra.mxu1 %v6161_v8  ;;  %v6174_v15 = vld [vmem:[#allocation5 + $0xa0] sm:$0xff]  ;;  %v6169_v16 = vld [vmem:[#allocation5 + $0x78] sm:$0xff]  ;;  %v6180_v33 = vld [vmem:[#allocation5 + $0xd0] sm:$0xff] }
 0x1da   : > { %v1212_v23 = vor.u32 %v1211_v20, %v1208_v19  ;;  %v6157_v17 = vld [vmem:[#allocation5 + $0x18] sm:$0xff]  ;;  %v6168_v19 = vld [vmem:[#allocation5 + $0x70] sm:$0xff]  ;;  %v6154_v29 = vld [vmem:[#allocation5] sm:$0xff] }
 0x1db   : > { %v1204_v25 = vsel %vm713_vm14, %v1195_v21, %v1203_v22  ;;  %v6156_v20 = vld [vmem:[#allocation5 + $0x10] sm:$0xff]  ;;  %v6183_v22 = vld [vmem:[#allocation5 + $0xe8] sm:$0xff]  ;;  %v6186_v35 = vld [vmem:[#allocation5 + $0x100] sm:$0xff] }
 0x1dc   : > { %1300 = vmatmul.bf16.vlgmr.msra.gmra.mxu3 %v1204_v25  ;;  %v1221_v26 = vsel %vm713_vm14, %v1212_v23, %v1220_v24  ;;  %v6164_v21 = vld [vmem:[#allocation5 + $0x50] sm:$0xff]  ;;  %v6167_v23 = vld [vmem:[#allocation5 + $0x68] sm:$0xff]  ;;  %v6177_v39 = vld [vmem:[#allocation5 + $0xb8] sm:$0xff] }
 0x1dd   : > { %5005 = vmatmul.msk.bf16.vlgmr.msrb.gmra.mxu0 %vm815_vm13, %v1221_v26  ;;  %1873 = vmatpush.bf16.msra.mxu1 %v6160_v10  ;;  %v6155_v24 = vld [vmem:[#allocation5 + $0x8] sm:$0xff]  ;;  %v6182_v26 = vld [vmem:[#allocation5 + $0xe0] sm:$0xff] }
 0x1de   : > { %1765 = vmatpush.bf16.msrb.mxu3 %v6171_v11  ;;  %1891 = vmatpush.bf16.msrb.mxu0 %v6164_v21  ;;  %v6163_v25 = vld [vmem:[#allocation5 + $0x48] sm:$0xff] }
 0x1e1   : > { %1874 = vmatpush.bf16.msra.mxu1 %v6159_v12 }
 0x1e2   : > { %1766 = vmatpush.bf16.msrb.mxu3 %v6170_v13  ;;  %1892 = vmatpush.bf16.msrb.mxu0 %v6163_v25 }
 0x1e5   : > { %1875 = vmatpush.bf16.msra.mxu1 %v6158_v14 }
 0x1e6   : > { %1767 = vmatpush.bf16.msrb.mxu3 %v6169_v16  ;;  %1893 = vmatpush.bf16.msrb.mxu0 %v6162_v30 }
 0x1e8   : > { %5095 = vmatmul.msk.bf16.vlgmr.msrb.gmra.mxu1 %vm815_vm13, %v1468_v37  ;;  %v6185_v37 = vld [vmem:[#allocation5 + $0xf8] sm:$0xff] }
 0x1e9   : > { %1876 = vmatpush.bf16.msra.mxu1 %v6157_v17 }
 0x1ea   : > { %1768 = vmatpush.bf16.msrb.mxu3 %v6168_v19 }
 0x1ed   : > { %1547 = vmatmul.bf16.vlgmr.msra.gmra.mxu0 %v1465_v40  ;;  %1877 = vmatpush.bf16.msra.mxu1 %v6156_v20  ;;  %v6184_v40 = vld [vmem:[#allocation5 + $0xf0] sm:$0xff] }
 0x1ee   : > { %1769 = vmatpush.bf16.msrb.mxu3 %v6167_v23 }
 0x1f1   : > { %1878 = vmatpush.bf16.msra.mxu1 %v6155_v24 }
 0x1f2   : > { %1770 = vmatpush.bf16.msrb.mxu3 %v6166_v28 }
 0x1f5   : > { %1879 = vmatpush.bf16.msra.mxu1 %v6154_v29 }
 0x1f6   : > { %1771 = vmatpush.bf16.msrb.mxu3 %v6165_v32 }
 0x1fa   : > { %2030 = vmatpush.bf16.msra.mxu3 %v6186_v35 }
 0x1fe   : > { %2031 = vmatpush.bf16.msra.mxu3 %v6185_v37 }
 0x202   : > { %2032 = vmatpush.bf16.msra.mxu3 %v6184_v40 }
 0x255   : > { %v1423_v41 = vpop.f32.mrf.mxu1 }
 0x25a   : > { %v1315_v42 = vpop.f32.mrf.mxu0  ;;  %v1409_v47 = vpop.f32.mrf.mxu2 }
 0x25d   : > { %v1425_v43 = vpop.f32.mrf.mxu1 }
 0x25f   : > { %v1301_v44 = vpop.f32.mrf.mxu3 }
 0x260   : > { %v1316_v46 = vadd.f32 %v1315_v42, %v1301_v44 }
 0x262   : > { %v1317_v45 = vpop.f32.mrf.mxu0  ;;  %v1410_v48 = vadd.f32 %v1409_v47, %v1316_v46  ;;  %v1411_v57 = vpop.f32.mrf.mxu2 }
 0x264   : > { %v1424_v53 = vadd.f32 %v1423_v41, %v1410_v48  ;;  %v6176_v41 = vld [vmem:[#allocation5 + $0xb0] sm:$0xff] }
 0x265   : > { %v1562_v49 = vpop.f32.mrf.mxu1 }
 0x267   : > { %v1303_v50 = vpop.f32.mrf.mxu3 }
 0x268   : > { %v1318_v52 = vadd.f32 %v1317_v45, %v1303_v50 }
 0x26a   : > { %v1548_v51 = vpop.f32.mrf.mxu0  ;;  %v1412_v58 = vadd.f32 %v1411_v57, %v1318_v52 }
 0x26b   : > { %v1563_v54 = vadd.f32 %v1562_v49, %v1548_v51 }
 0x26c   : > { %v1426_v63 = vadd.f32 %v1425_v43, %v1412_v58 }
 0x26d   : > { %v1567_v56 = vadd.f32 %v1563_v54, %v1424_v53  ;;  %v1564_v61 = vpop.f32.mrf.mxu1 }
 0x26f   : > { %v1572_v59 = vadd.f32 %v6426_v55, %v1567_v56 }
 0x271   : > { %v6928_v60 = vadd.f32 %v1572_v59, %v6779_v1 }
 0x272   : > { %v1550_v62 = vpop.f32.mrf.mxu0 }
 0x273   : > { %v1565_v0 = vadd.f32 %v1564_v61, %v1550_v62  ;;  %v1579_v3 = vrot.slane %v6928_v60, 5 }
 0x275   : > { %v1568_v4 = vadd.f32 %v1565_v0, %v1426_v63  ;;  %1582 = vrot.lane.b32.xlu0 %v1579_v3, %s6620_s30 }
 0x277   : > { %v1573_v5 = vadd.f32 %v6426_v55, %v1568_v4 }
 0x279   : > { %v6933_v6 = vadd.f32 %v1573_v5, %v6781_v2  ;;  %v6175_v2 = vld [vmem:[#allocation5 + $0xa8] sm:$0xff] }
 0x27a   : > { %1783 = vmatpush.bf16.msra.mxu2 %v6175_v2 }
 0x27b   : > { %v1580_v7 = vrot.slane %v6933_v6, 5 }
 0x27d   : > { %1586 = vrot.lane.b32.xlu2 %v1580_v7, %s6620_s30  ;;  %v1581_v1 = vsel %vm628_vm2, %v1579_v3, %v1580_v7 }
 0x27e   : > { %1584 = vrot.lane.b32.xlu1 %v1581_v1, %s6620_s30  ;;  %1784 = vmatpush.bf16.msra.mxu2 %v6174_v15 }
 0x282   : > { %1785 = vmatpush.bf16.msra.mxu2 %v6173_v18 }
 0x286   : > { %2011 = vmatpush.bf16.msrb.mxu2 %v6183_v22 }
 0x28a   : > { %2012 = vmatpush.bf16.msrb.mxu2 %v6182_v26 }
 0x28e   : > { %2013 = vmatpush.bf16.msrb.mxu2 %v6181_v31 }
 0x292   : > { %2014 = vmatpush.bf16.msrb.mxu2 %v6180_v33 }
 0x296   : > { %2015 = vmatpush.bf16.msrb.mxu2 %v6179_v34 }
 0x29a   : > { %2016 = vmatpush.bf16.msrb.mxu2 %v6178_v36 }
 0x29e   : > { %2017 = vmatpush.bf16.msrb.mxu2 %v6177_v39 }
 0x2a2   : > { %2018 = vmatpush.bf16.msrb.mxu2 %v6176_v41 }
 0x2d7   : > { %v1587_v27 = vpop.permute.xlu2 %1586 }
 0x2d8   : > { %1595 = vst.msk [vmem:[#allocation2 + $0x20] sm:$0x7] %vm647_vm10, %v1587_v27 }
 0x2d9   : > { %1596 = vst.msk [vmem:[#allocation2 + $0x28] sm:$0x7] %vm616_vm3, %v1587_v27 }
 0x2df   : > { %v1631_v42 = vld [vmem:[#allocation2 + $0x20] sm:$0x7] }
 0x2e0   : > { %v1601_v44 = vld [vmem:[#allocation2 + $0x20] sm:$0x3]  ;;  %v1632_v45 = vld [vmem:[#allocation2 + $0x28] sm:$0x7]  ;;  %v1635_v47 = vpack.c.bf16 %v1631_v42, %v1631_v42 }
 0x2e1   : > { %v1602_v46 = vld [vmem:[#allocation2 + $0x28] sm:$0x3]  ;;  %v1605_v48 = vpack.c.bf16 %v1601_v44, %v1601_v44  ;;  %v1636_v49 = vpack.c.bf16 %v1632_v45, %v1632_v45  ;;  %v1902_v30 = vld [vmem:[#allocation2 + $0x20] sm:$0xf] }
 0x2e2   : > { %v1606_v50 = vpack.c.bf16 %v1602_v46, %v1602_v46  ;;  %v1669_v51 = vshrl.u32 %v1635_v47, 16  ;;  %v1672_v52 = vshll.u32 %v1635_v47, 16  ;;  %v1903_v28 = vld [vmem:[#allocation2 + $0x28] sm:$0xf]  ;;  %v1906_v34 = vpack.c.bf16 %v1902_v30, %v1902_v30  ;;  %v6215_v30 = vld [vmem:[#allocation7 + $0xe0] sm:$0xff] }
 0x2e3   : > { %v1797_v53 = vrot.slane %v1605_v48, 1  ;;  %v1686_v54 = vshrl.u32 %v1636_v49, 16  ;;  %v1689_v58 = vshll.u32 %v1636_v49, 16  ;;  %v1907_v33 = vpack.c.bf16 %v1903_v28, %v1903_v28  ;;  %v6188_v28 = vld [vmem:[#allocation7 + $0x8] sm:$0xff] }
 0x2e4   : > { %v1800_v63 = vrot.slane %v1606_v50, 1  ;;  %v1671_v5 = vrot.slane %v1669_v51, 1  ;;  %v1674_v7 = vrot.slane %v1672_v52, 2 }
 0x2e5   : > { %v1688_v11 = vrot.slane %v1686_v54, 1  ;;  %v1691_v14 = vrot.slane %v1689_v58, 2  ;;  %v1939_v37 = vrot.slane %v1907_v33, 2  ;;  %v6427_v54 = vld [vmem:[%s7388_s5] ss:$0 sm:$0xff] }
 0x2e6   : > { %v1675_v22 = vor.u32 %v1674_v7, %v1671_v5  ;;  %v6187_v33 = vld [vmem:[#allocation7] sm:$0xff] }
 0x2e7   : > { %v1583_v38 = vpop.permute.xlu0 %1582  ;;  %v1692_v24 = vor.u32 %v1691_v14, %v1688_v11  ;;  %v6204_v14 = vld [vmem:[#allocation7 + $0x88] sm:$0xff] }
 0x2e8   : > { %1591 = vst.msk [vmem:[#allocation2] sm:$0xf8] %vm641_vm9, %v1583_v38 }
 0x2e9   : > { %1592 = vst.msk [vmem:[#allocation2 + $0x8] sm:$0xf8] %vm612_vm0, %v1583_v38  ;;  %v1936_v38 = vrot.slane %v1906_v34, 2  ;;  %v6195_v34 = vld [vmem:[#allocation7 + $0x40] sm:$0xff] }
 0x2ef   : > { %v1597_v55 = vld [vmem:[#allocation2] sm:$0xfc] }
 0x2f0   : > { %v1585_v43 = vpop.permute.xlu1 %1584  ;;  %v1629_v57 = vld [vmem:[#allocation2] sm:$0xf8]  ;;  %v1598_v61 = vld [vmem:[#allocation2 + $0x8] sm:$0xfc] }
 0x2f1   : > { %1593 = vst.msk [vmem:[#allocation2 + $0x10] sm:$0xff] %vm644_vm11, %v1585_v43  ;;  %v1630_v3 = vld [vmem:[#allocation2 + $0x8] sm:$0xf8]  ;;  %v1900_v29 = vld [vmem:[#allocation2] sm:$0xf0] }
 0x2f2   : > { %1594 = vst.msk [vmem:[#allocation2 + $0x18] sm:$0xff] %vm614_vm6, %v1585_v43  ;;  %v1901_v27 = vld [vmem:[#allocation2 + $0x8] sm:$0xf0] }
 0x2f8   : > { %v1599_v56 = vld [vmem:[#allocation2 + $0x10] sm:$0xff] }
 0x2f9   : > { %v1603_v59 = vpack.c.bf16 %v1599_v56, %v1597_v55  ;;  %v1600_v62 = vld [vmem:[#allocation2 + $0x18] sm:$0xff]  ;;  %v1633_v0 = vpack.c.bf16 %v1599_v56, %v1629_v57  ;;  %v1904_v32 = vpack.c.bf16 %v1599_v56, %v1900_v29  ;;  %v6196_v29 = vld [vmem:[#allocation7 + $0x48] sm:$0xff] }
 0x2fa   : > { %v1604_v4 = vpack.c.bf16 %v1600_v62, %v1598_v61  ;;  %v1634_v1 = vpack.c.bf16 %v1600_v62, %v1630_v3  ;;  %v1905_v31 = vpack.c.bf16 %v1600_v62, %v1901_v27  ;;  %v6200_v27 = vld [vmem:[#allocation7 + $0x68] sm:$0xff] }
 0x2fb   : > { %v1796_v8 = vrot.slane %v1603_v59, 1  ;;  %v1661_v9 = vshrl.u32 %v1633_v0, 16  ;;  %v1664_v10 = vshll.u32 %v1633_v0, 16  ;;  %v1935_v36 = vrot.slane %v1904_v32, 2  ;;  %v6199_v32 = vld [vmem:[#allocation7 + $0x60] sm:$0xff] }
 0x2fc   : > { %v1799_v12 = vrot.slane %v1604_v4, 1  ;;  %v1678_v2 = vshrl.u32 %v1634_v1, 16  ;;  %v1681_v13 = vshll.u32 %v1634_v1, 16  ;;  %v1938_v35 = vrot.slane %v1905_v31, 2 }
 0x2fd   : > { %v1798_v15 = vsel %vm851_vm12, %v1796_v8, %v1797_v53  ;;  %v1663_v16 = vrot.slane %v1661_v9, 1  ;;  %v1666_v17 = vrot.slane %v1664_v10, 2  ;;  %v1937_v40 = vsel %vm991_vm15, %v1935_v36, %v1936_v38  ;;  %v6198_v36 = vld [vmem:[#allocation7 + $0x58] sm:$0xff]  ;;  %v6212_v38 = vld [vmem:[#allocation7 + $0xc8] sm:$0xff] }
 0x2fe   : > { %1880 = vmatmul.bf16.vlgmr.msra.gmra.mxu1 %v1798_v15  ;;  %v1801_v18 = vsel %vm851_vm12, %v1799_v12, %v1800_v63  ;;  %v1680_v19 = vrot.slane %v1678_v2, 1  ;;  %v1683_v20 = vrot.slane %v1681_v13, 2  ;;  %v1940_v39 = vsel %vm991_vm15, %v1938_v35, %v1939_v37  ;;  %v6194_v12 = vld [vmem:[#allocation7 + $0x38] sm:$0xff]  ;;  %v6205_v2 = vld [vmem:[#allocation7 + $0x90] sm:$0xff]  ;;  %v6192_v15 = vld [vmem:[#allocation7 + $0x28] sm:$0xff] }
 0x2ff   : > { %5185 = vmatmul.msk.bf16.vlgmr.msrb.gmra.mxu0 %vm815_vm13, %v1801_v18  ;;  %v1667_v21 = vor.u32 %v1666_v17, %v1663_v16  ;;  %v6193_v13 = vld [vmem:[#allocation7 + $0x30] sm:$0xff]  ;;  %v6208_v16 = vld [vmem:[#allocation7 + $0xa8] sm:$0xff]  ;;  %v6203_v17 = vld [vmem:[#allocation7 + $0x80] sm:$0xff] }
 0x300   : > { %v1684_v23 = vor.u32 %v1683_v20, %v1680_v19  ;;  %2239 = vmatpush.bf16.msra.mxu0 %v6205_v2  ;;  %v6191_v18 = vld [vmem:[#allocation7 + $0x20] sm:$0xff]  ;;  %2258 = vmatpush.bf16.msrb.mxu1 %v6208_v16  ;;  %v6202_v20 = vld [vmem:[#allocation7 + $0x78] sm:$0xff]  ;;  %v6213_v37 = vld [vmem:[#allocation7 + $0xd0] sm:$0xff] }
 0x301   : > { %v1676_v25 = vsel %vm713_vm14, %v1667_v21, %v1675_v22  ;;  %v6207_v19 = vld [vmem:[#allocation7 + $0xa0] sm:$0xff]  ;;  %v6190_v21 = vld [vmem:[#allocation7 + $0x18] sm:$0xff] }
 0x302   : > { %1772 = vmatmul.bf16.vlgmr.msrb.gmra.mxu3 %v1676_v25  ;;  %v1693_v26 = vsel %vm713_vm14, %v1684_v23, %v1692_v24  ;;  %v6206_v22 = vld [vmem:[#allocation7 + $0x98] sm:$0xff]  ;;  %v6201_v23 = vld [vmem:[#allocation7 + $0x70] sm:$0xff] }
 0x303   : > { %5140 = vmatmul.msk.bf16.vlgmr.msra.gmra.mxu2 %vm815_vm13, %v1693_v26  ;;  %2347 = vmatpush.bf16.msrb.mxu3 %v6194_v12  ;;  %v6189_v24 = vld [vmem:[#allocation7 + $0x10] sm:$0xff]  ;;  %v6216_v26 = vld [vmem:[#allocation7 + $0xe8] sm:$0xff]  ;;  %v6214_v35 = vld [vmem:[#allocation7 + $0xd8] sm:$0xff] }
 0x304   : > { %2240 = vmatpush.bf16.msra.mxu0 %v6204_v14  ;;  %2259 = vmatpush.bf16.msrb.mxu1 %v6207_v19  ;;  %v6197_v25 = vld [vmem:[#allocation7 + $0x50] sm:$0xff] }
 0x305   : > { %2366 = vmatpush.bf16.msra.mxu2 %v6197_v25 }
 0x307   : > { %2348 = vmatpush.bf16.msrb.mxu3 %v6193_v13 }
 0x308   : > { %2241 = vmatpush.bf16.msra.mxu0 %v6203_v17  ;;  %2260 = vmatpush.bf16.msrb.mxu1 %v6206_v22 }
 0x309   : > { %2367 = vmatpush.bf16.msra.mxu2 %v6196_v29 }
 0x30b   : > { %2349 = vmatpush.bf16.msrb.mxu3 %v6192_v15 }
 0x30c   : > { %2242 = vmatpush.bf16.msra.mxu0 %v6202_v20  ;;  %2486 = vmatpush.bf16.msra.mxu1 %v6216_v26 }
 0x30d   : > { %2368 = vmatpush.bf16.msra.mxu2 %v6195_v34 }
 0x30f   : > { %2350 = vmatpush.bf16.msrb.mxu3 %v6191_v18 }
 0x310   : > { %2243 = vmatpush.bf16.msra.mxu0 %v6201_v23  ;;  %2487 = vmatpush.bf16.msra.mxu1 %v6215_v30 }
 0x312   : > { %5230 = vmatmul.msk.bf16.vlgmr.msra.gmra.mxu3 %vm815_vm13, %v1940_v39  ;;  %v6219_v39 = vld [vmem:[#allocation7 + $0x100] sm:$0xff] }
 0x313   : > { %2019 = vmatmul.bf16.vlgmr.msrb.gmra.mxu2 %v1937_v40  ;;  %2351 = vmatpush.bf16.msrb.mxu3 %v6190_v21  ;;  %v6211_v40 = vld [vmem:[#allocation7 + $0xc0] sm:$0xff] }
 0x314   : > { %2244 = vmatpush.bf16.msra.mxu0 %v6200_v27  ;;  %2488 = vmatpush.bf16.msra.mxu1 %v6214_v35 }
 0x317   : > { %2352 = vmatpush.bf16.msrb.mxu3 %v6189_v24 }
 0x318   : > { %2245 = vmatpush.bf16.msra.mxu0 %v6199_v32  ;;  %2489 = vmatpush.bf16.msra.mxu1 %v6213_v37 }
 0x31b   : > { %2353 = vmatpush.bf16.msrb.mxu3 %v6188_v28 }
 0x31c   : > { %2246 = vmatpush.bf16.msra.mxu0 %v6198_v36  ;;  %2490 = vmatpush.bf16.msra.mxu1 %v6212_v38 }
 0x31f   : > { %2354 = vmatpush.bf16.msrb.mxu3 %v6187_v33 }
 0x320   : > { %2505 = vmatpush.bf16.msrb.mxu0 %v6219_v39  ;;  %2491 = vmatpush.bf16.msra.mxu1 %v6211_v40 }
 0x37b   : > { %v1881_v46 = vpop.f32.mrf.mxu1 }
 0x37c   : > { %v1895_v48 = vpop.f32.mrf.mxu0 }
 0x383   : > { %v1883_v56 = vpop.f32.mrf.mxu1 }
 0x384   : > { %v1897_v62 = vpop.f32.mrf.mxu0 }
 0x385   : > { %v1773_v41 = vpop.f32.mrf.mxu3 }
 0x386   : > { %v1787_v42 = vpop.f32.mrf.mxu2 }
 0x387   : > { %v1788_v45 = vadd.f32 %v1787_v42, %v1773_v41  ;;  %v6218_v41 = vld [vmem:[#allocation7 + $0xf8] sm:$0xff] }
 0x388   : > { %2506 = vmatpush.bf16.msrb.mxu0 %v6218_v41 }
 0x389   : > { %v1882_v47 = vadd.f32 %v1881_v46, %v1788_v45  ;;  %v6209_v45 = vld [vmem:[#allocation7 + $0xb0] sm:$0xff] }
 0x38b   : > { %v1896_v52 = vadd.f32 %v1895_v48, %v1882_v47 }
 0x38d   : > { %v1775_v43 = vpop.f32.mrf.mxu3 }
 0x38e   : > { %v1789_v44 = vpop.f32.mrf.mxu2 }
 0x38f   : > { %v1790_v51 = vadd.f32 %v1789_v44, %v1775_v43  ;;  %v6210_v43 = vld [vmem:[#allocation7 + $0xb8] sm:$0xff]  ;;  %v6217_v44 = vld [vmem:[#allocation7 + $0xf0] sm:$0xff] }
 0x390   : > { %2492 = vmatpush.bf16.msra.mxu1 %v6210_v43  ;;  %2507 = vmatpush.bf16.msrb.mxu0 %v6217_v44 }
 0x391   : > { %v1884_v57 = vadd.f32 %v1883_v56, %v1790_v51 }
 0x393   : > { %v1898_v0 = vadd.f32 %v1897_v62, %v1884_v57 }
 0x394   : > { %2493 = vmatpush.bf16.msra.mxu1 %v6209_v45 }
 0x395   : > { %v2034_v49 = vpop.f32.mrf.mxu3 }
 0x396   : > { %v2020_v50 = vpop.f32.mrf.mxu2 }
 0x397   : > { %v2035_v53 = vadd.f32 %v2034_v49, %v2020_v50 }
 0x399   : > { %v2039_v55 = vadd.f32 %v2035_v53, %v1896_v52 }
 0x39b   : > { %v2044_v58 = vadd.f32 %v6427_v54, %v2039_v55 }
 0x39d   : > { %v2036_v59 = vpop.f32.mrf.mxu3  ;;  %vm2046_vm5 = vcmp.ge.f32.partialorder %v2044_v58, 0.0  ;;  %v2048_v61 = vmul.f32 0.1, %v2044_v58 }
 0x39e   : > { %v2022_v63 = vpop.f32.mrf.mxu2 }
 0x39f   : > { %v2037_v3 = vadd.f32 %v2036_v59, %v2022_v63  ;;  %v2050_v4 = vsel %vm2046_vm5, %v2044_v58, %v2048_v61 }
 0x3a0   : > { %v2054_v5 = vrot.slane %v2050_v4, 5 }
 0x3a1   : > { %v2040_v7 = vadd.f32 %v2037_v3, %v1898_v0 }
 0x3a2   : > { %2057 = vrot.lane.b32.xlu0 %v2054_v5, %s6620_s30 }
 0x3a3   : > { %v2045_v1 = vadd.f32 %v6427_v54, %v2040_v7 }
 0x3a5   : > { %vm2047_vm7 = vcmp.ge.f32.partialorder %v2045_v1, 0.0  ;;  %v2049_v8 = vmul.f32 0.1, %v2045_v1 }
 0x3a7   : > { %v2051_v9 = vsel %vm2047_vm7, %v2045_v1, %v2049_v8 }
 0x3a8   : > { %v2055_v10 = vrot.slane %v2051_v9, 5 }
 0x3aa   : > { %2061 = vrot.lane.b32.xlu2 %v2055_v10, %s6620_s30  ;;  %v2056_v11 = vsel %vm628_vm2, %v2054_v5, %v2055_v10 }
 0x3ab   : > { %2059 = vrot.lane.b32.xlu1 %v2056_v11, %s6620_s30 }
 0x404   : > { %v2062_v31 = vpop.permute.xlu2 %2061 }
 0x405   : > { %2070 = vst.msk [vmem:[#allocation2 + $0x20] sm:$0x7] %vm647_vm10, %v2062_v31 }
 0x406   : > { %2071 = vst.msk [vmem:[#allocation2 + $0x28] sm:$0x7] %vm616_vm3, %v2062_v31 }
 0x40c   : > { %v2106_v46 = vld [vmem:[#allocation2 + $0x20] sm:$0x7] }
 0x40d   : > { %v2076_v48 = vld [vmem:[#allocation2 + $0x20] sm:$0x3]  ;;  %v2107_v49 = vld [vmem:[#allocation2 + $0x28] sm:$0x7]  ;;  %v2110_v51 = vpack.c.bf16 %v2106_v46, %v2106_v46 }
 0x40e   : > { %v2077_v50 = vld [vmem:[#allocation2 + $0x28] sm:$0x3]  ;;  %v2080_v52 = vpack.c.bf16 %v2076_v48, %v2076_v48  ;;  %v2111_v53 = vpack.c.bf16 %v2107_v49, %v2107_v49  ;;  %v2377_v34 = vld [vmem:[#allocation2 + $0x20] sm:$0xf] }
 0x40f   : > { %v2081_v54 = vpack.c.bf16 %v2077_v50, %v2077_v50  ;;  %v2144_v55 = vshrl.u32 %v2110_v51, 16  ;;  %v2147_v56 = vshll.u32 %v2110_v51, 16  ;;  %v2378_v32 = vld [vmem:[#allocation2 + $0x28] sm:$0xf]  ;;  %v2381_v38 = vpack.c.bf16 %v2377_v34, %v2377_v34  ;;  %v6246_v34 = vld [vmem:[#allocation8 + $0xd0] sm:$0xff] }
 0x410   : > { %v2272_v57 = vrot.slane %v2080_v52, 1  ;;  %v2161_v58 = vshrl.u32 %v2111_v53, 16  ;;  %v2164_v63 = vshll.u32 %v2111_v53, 16  ;;  %v2382_v37 = vpack.c.bf16 %v2378_v32, %v2378_v32  ;;  %v6247_v32 = vld [vmem:[#allocation8 + $0xd8] sm:$0xff] }
 0x411   : > { %v2275_v5 = vrot.slane %v2081_v54, 1  ;;  %v2146_v9 = vrot.slane %v2144_v55, 1  ;;  %v2149_v10 = vrot.slane %v2147_v56, 2 }
 0x412   : > { %v2163_v14 = vrot.slane %v2161_v58, 1  ;;  %v2166_v18 = vrot.slane %v2164_v63, 2  ;;  %v2414_v41 = vrot.slane %v2382_v37, 2  ;;  %v6244_v37 = vld [vmem:[#allocation8 + $0xc0] sm:$0xff] }
 0x413   : > { %v2150_v26 = vor.u32 %v2149_v10, %v2146_v9  ;;  %v6227_v10 = vld [vmem:[#allocation8 + $0x38] sm:$0xff] }
 0x414   : > { %v2058_v42 = vpop.permute.xlu0 %2057  ;;  %v2167_v28 = vor.u32 %v2166_v18, %v2163_v14  ;;  %v6236_v14 = vld [vmem:[#allocation8 + $0x80] sm:$0xff]  ;;  %v6223_v18 = vld [vmem:[#allocation8 + $0x18] sm:$0xff] }
 0x415   : > { %2066 = vst.msk [vmem:[#allocation2] sm:$0xf8] %vm641_vm9, %v2058_v42 }
 0x416   : > { %2067 = vst.msk [vmem:[#allocation2 + $0x8] sm:$0xf8] %vm612_vm0, %v2058_v42  ;;  %v2411_v42 = vrot.slane %v2381_v38, 2  ;;  %v6251_v38 = vld [vmem:[#allocation8 + $0xf8] sm:$0xff] }
 0x41c   : > { %v2072_v59 = vld [vmem:[#allocation2] sm:$0xfc] }
 0x41d   : > { %v2060_v47 = vpop.permute.xlu1 %2059  ;;  %v2104_v62 = vld [vmem:[#allocation2] sm:$0xf8]  ;;  %v2073_v3 = vld [vmem:[#allocation2 + $0x8] sm:$0xfc] }
 0x41e   : > { %2068 = vst.msk [vmem:[#allocation2 + $0x10] sm:$0xff] %vm644_vm11, %v2060_v47  ;;  %v2105_v1 = vld [vmem:[#allocation2 + $0x8] sm:$0xf8]  ;;  %v2375_v33 = vld [vmem:[#allocation2] sm:$0xf0] }
 0x41f   : > { %2069 = vst.msk [vmem:[#allocation2 + $0x18] sm:$0xff] %vm614_vm6, %v2060_v47  ;;  %v2376_v31 = vld [vmem:[#allocation2 + $0x8] sm:$0xf0] }
 0x425   : > { %v2074_v61 = vld [vmem:[#allocation2 + $0x10] sm:$0xff] }
 0x426   : > { %v2078_v0 = vpack.c.bf16 %v2074_v61, %v2072_v59  ;;  %v2075_v4 = vld [vmem:[#allocation2 + $0x18] sm:$0xff]  ;;  %v2108_v7 = vpack.c.bf16 %v2074_v61, %v2104_v62  ;;  %v2379_v36 = vpack.c.bf16 %v2074_v61, %v2375_v33  ;;  %v6231_v33 = vld [vmem:[#allocation8 + $0x58] sm:$0xff] }
 0x427   : > { %v2079_v8 = vpack.c.bf16 %v2075_v4, %v2073_v3  ;;  %v2109_v11 = vpack.c.bf16 %v2075_v4, %v2105_v1  ;;  %v2380_v35 = vpack.c.bf16 %v2075_v4, %v2376_v31  ;;  %v6228_v31 = vld [vmem:[#allocation8 + $0x40] sm:$0xff] }
 0x428   : > { %v2271_v12 = vrot.slane %v2078_v0, 1  ;;  %v2136_v2 = vshrl.u32 %v2108_v7, 16  ;;  %v2139_v13 = vshll.u32 %v2108_v7, 16  ;;  %v2410_v40 = vrot.slane %v2379_v36, 2  ;;  %v6252_v36 = vld [vmem:[#allocation8 + $0x100] sm:$0xff] }
 0x429   : > { %v2274_v15 = vrot.slane %v2079_v8, 1  ;;  %v2153_v16 = vshrl.u32 %v2109_v11, 16  ;;  %v2156_v17 = vshll.u32 %v2109_v11, 16  ;;  %v2413_v39 = vrot.slane %v2380_v35, 2  ;;  %v6238_v11 = vld [vmem:[#allocation8 + $0x90] sm:$0xff]  ;;  %v6245_v35 = vld [vmem:[#allocation8 + $0xc8] sm:$0xff] }
 0x42a   : > { %v2273_v19 = vsel %vm851_vm12, %v2271_v12, %v2272_v57  ;;  %v2138_v20 = vrot.slane %v2136_v2, 1  ;;  %v2141_v21 = vrot.slane %v2139_v13, 2  ;;  %v2412_v44 = vsel %vm991_vm15, %v2410_v40, %v2411_v42  ;;  %2706 = vmatpush.bf16.msrb.mxu2 %v6238_v11  ;;  %v6226_v12 = vld [vmem:[#allocation8 + $0x30] sm:$0xff]  ;;  %v6237_v2 = vld [vmem:[#allocation8 + $0x88] sm:$0xff]  ;;  %v6243_v40 = vld [vmem:[#allocation8 + $0xb8] sm:$0xff] }
 0x42b   : > { %2355 = vmatmul.bf16.vlgmr.msrb.gmra.mxu3 %v2273_v19  ;;  %v2276_v22 = vsel %vm851_vm12, %v2274_v15, %v2275_v5  ;;  %v2155_v23 = vrot.slane %v2153_v16, 1  ;;  %v2158_v24 = vrot.slane %v2156_v17, 2  ;;  %v2415_v43 = vsel %vm991_vm15, %v2413_v39, %v2414_v41  ;;  %v6225_v13 = vld [vmem:[#allocation8 + $0x28] sm:$0xff]  ;;  %v6224_v15 = vld [vmem:[#allocation8 + $0x20] sm:$0xff]  ;;  %v6235_v17 = vld [vmem:[#allocation8 + $0x78] sm:$0xff] }
 0x42c   : > { %5320 = vmatmul.msk.bf16.vlgmr.msra.gmra.mxu2 %vm815_vm13, %v2276_v22  ;;  %v2142_v25 = vor.u32 %v2141_v21, %v2138_v20  ;;  %v6240_v16 = vld [vmem:[#allocation8 + $0xa0] sm:$0xff]  ;;  %v6239_v19 = vld [vmem:[#allocation8 + $0x98] sm:$0xff]  ;;  %v6234_v20 = vld [vmem:[#allocation8 + $0x70] sm:$0xff] }
 0x42d   : > { %v2159_v27 = vor.u32 %v2158_v24, %v2155_v23  ;;  %v6222_v21 = vld [vmem:[#allocation8 + $0x10] sm:$0xff]  ;;  %v6249_v23 = vld [vmem:[#allocation8 + $0xe8] sm:$0xff] }
 0x42e   : > { %v2151_v29 = vsel %vm713_vm14, %v2142_v25, %v2150_v26  ;;  %2707 = vmatpush.bf16.msrb.mxu2 %v6237_v2  ;;  %v6230_v22 = vld [vmem:[#allocation8 + $0x50] sm:$0xff]  ;;  %v6233_v24 = vld [vmem:[#allocation8 + $0x68] sm:$0xff] }
 0x42f   : > { %2247 = vmatmul.bf16.vlgmr.msra.gmra.mxu0 %v2151_v29  ;;  %v2168_v30 = vsel %vm713_vm14, %v2159_v27, %v2167_v28  ;;  %v6221_v25 = vld [vmem:[#allocation8 + $0x8] sm:$0xff]  ;;  %v6248_v27 = vld [vmem:[#allocation8 + $0xe0] sm:$0xff]  ;;  %v6250_v41 = vld [vmem:[#allocation8 + $0xf0] sm:$0xff] }
 0x430   : > { %5275 = vmatmul.msk.bf16.vlgmr.msrb.gmra.mxu1 %vm815_vm13, %v2168_v30  ;;  %2814 = vmatpush.bf16.msra.mxu0 %v6227_v10  ;;  %v6229_v26 = vld [vmem:[#allocation8 + $0x48] sm:$0xff]  ;;  %v6232_v29 = vld [vmem:[#allocation8 + $0x60] sm:$0xff]  ;;  %v6242_v42 = vld [vmem:[#allocation8 + $0xb0] sm:$0xff] }
 0x431   : > { %2833 = vmatpush.bf16.msrb.mxu1 %v6230_v22  ;;  %v6220_v30 = vld [vmem:[#allocation8] sm:$0xff] }
 0x432   : > { %2708 = vmatpush.bf16.msrb.mxu2 %v6236_v14 }
 0x434   : > { %2815 = vmatpush.bf16.msra.mxu0 %v6226_v12 }
 0x435   : > { %2834 = vmatpush.bf16.msrb.mxu1 %v6229_v26 }
 0x436   : > { %2709 = vmatpush.bf16.msrb.mxu2 %v6235_v17 }
 0x438   : > { %2816 = vmatpush.bf16.msra.mxu0 %v6225_v13 }
 0x439   : > { %2835 = vmatpush.bf16.msrb.mxu1 %v6228_v31 }
 0x43a   : > { %2710 = vmatpush.bf16.msrb.mxu2 %v6234_v20 }
 0x43c   : > { %2817 = vmatpush.bf16.msra.mxu0 %v6224_v15 }
 0x43e   : > { %2711 = vmatpush.bf16.msrb.mxu2 %v6233_v24 }
 0x43f   : > { %5365 = vmatmul.msk.bf16.vlgmr.msrb.gmra.mxu0 %vm815_vm13, %v2415_v43 }
 0x440   : > { %2494 = vmatmul.bf16.vlgmr.msra.gmra.mxu1 %v2412_v44  ;;  %2818 = vmatpush.bf16.msra.mxu0 %v6223_v18 }
 0x442   : > { %2712 = vmatpush.bf16.msrb.mxu2 %v6232_v29 }
 0x444   : > { %2819 = vmatpush.bf16.msra.mxu0 %v6222_v21 }
 0x446   : > { %2713 = vmatpush.bf16.msrb.mxu2 %v6231_v33 }
 0x448   : > { %2820 = vmatpush.bf16.msra.mxu0 %v6221_v25 }
 0x44a   : > { %2972 = vmatpush.bf16.msra.mxu2 %v6252_v36 }
 0x44c   : > { %2821 = vmatpush.bf16.msra.mxu0 %v6220_v30 }
 0x44e   : > { %2973 = vmatpush.bf16.msra.mxu2 %v6251_v38 }
 0x452   : > { %2974 = vmatpush.bf16.msra.mxu2 %v6250_v41 }
 0x4ac   : > { %v2248_v45 = vpop.f32.mrf.mxu0 }
 0x4ad   : > { %v2262_v46 = vpop.f32.mrf.mxu1 }
 0x4ae   : > { %v2356_v48 = vpop.f32.mrf.mxu3  ;;  %v2263_v50 = vadd.f32 %v2262_v46, %v2248_v45 }
 0x4af   : > { %v2370_v52 = vpop.f32.mrf.mxu2 }
 0x4b0   : > { %v2357_v51 = vadd.f32 %v2356_v48, %v2263_v50 }
 0x4b2   : > { %v2371_v55 = vadd.f32 %v2370_v52, %v2357_v51 }
 0x4b4   : > { %v2250_v47 = vpop.f32.mrf.mxu0 }
 0x4b5   : > { %v2264_v49 = vpop.f32.mrf.mxu1 }
 0x4b6   : > { %v2265_v56 = vadd.f32 %v2264_v49, %v2250_v47  ;;  %v2358_v58 = vpop.f32.mrf.mxu3 }
 0x4b7   : > { %v2372_v3 = vpop.f32.mrf.mxu2 }
 0x4b8   : > { %v2359_v61 = vadd.f32 %v2358_v58, %v2265_v56 }
 0x4ba   : > { %v2373_v5 = vadd.f32 %v2372_v3, %v2359_v61 }
 0x4bc   : > { %v2509_v53 = vpop.f32.mrf.mxu0 }
 0x4bd   : > { %v2495_v54 = vpop.f32.mrf.mxu1 }
 0x4be   : > { %v2510_v57 = vadd.f32 %v2509_v53, %v2495_v54 }
 0x4c0   : > { %v2514_v59 = vadd.f32 %v2510_v57, %v2371_v55 }
 0x4c2   : > { %v6977_v62 = vadd.f32 %v2514_v59, %v6928_v60 }
 0x4c4   : > { %v2511_v63 = vpop.f32.mrf.mxu0  ;;  %v2521_v0 = vrot.slane %v6977_v62, 5 }
 0x4c5   : > { %v2497_v4 = vpop.f32.mrf.mxu1 }
 0x4c6   : > { %v2512_v7 = vadd.f32 %v2511_v63, %v2497_v4  ;;  %2524 = vrot.lane.b32.xlu0 %v2521_v0, %s6620_s30 }
 0x4c8   : > { %v2515_v1 = vadd.f32 %v2512_v7, %v2373_v5 }
 0x4ca   : > { %v6982_v8 = vadd.f32 %v2515_v1, %v6933_v6  ;;  %v6241_v6 = vld [vmem:[#allocation8 + $0xa8] sm:$0xff] }
 0x4cb   : > { %2725 = vmatpush.bf16.msra.mxu3 %v6241_v6 }
 0x4cc   : > { %v2522_v9 = vrot.slane %v6982_v8, 5 }
 0x4ce   : > { %2528 = vrot.lane.b32.xlu2 %v2522_v9, %s6620_s30  ;;  %v2523_v60 = vsel %vm628_vm2, %v2521_v0, %v2522_v9 }
 0x4cf   : > { %2526 = vrot.lane.b32.xlu1 %v2523_v60, %s6620_s30  ;;  %2726 = vmatpush.bf16.msra.mxu3 %v6240_v16 }
 0x4d3   : > { %2727 = vmatpush.bf16.msra.mxu3 %v6239_v19 }
 0x4d7   : > { %2953 = vmatpush.bf16.msrb.mxu3 %v6249_v23 }
 0x4db   : > { %2954 = vmatpush.bf16.msrb.mxu3 %v6248_v27 }
 0x4df   : > { %2955 = vmatpush.bf16.msrb.mxu3 %v6247_v32 }
 0x4e3   : > { %2956 = vmatpush.bf16.msrb.mxu3 %v6246_v34 }
 0x4e7   : > { %2957 = vmatpush.bf16.msrb.mxu3 %v6245_v35 }
 0x4eb   : > { %2958 = vmatpush.bf16.msrb.mxu3 %v6244_v37 }
 0x4ef   : > { %2959 = vmatpush.bf16.msrb.mxu3 %v6243_v40 }
 0x4f3   : > { %2960 = vmatpush.bf16.msrb.mxu3 %v6242_v42 }
 0x528   : > { %v2529_v28 = vpop.permute.xlu2 %2528 }
 0x529   : > { %2537 = vst.msk [vmem:[#allocation2 + $0x20] sm:$0x7] %vm647_vm10, %v2529_v28 }
 0x52a   : > { %2538 = vst.msk [vmem:[#allocation2 + $0x28] sm:$0x7] %vm616_vm3, %v2529_v28 }
 0x530   : > { %v2573_v43 = vld [vmem:[#allocation2 + $0x20] sm:$0x7] }
 0x531   : > { %v2543_v45 = vld [vmem:[#allocation2 + $0x20] sm:$0x3]  ;;  %v2574_v46 = vld [vmem:[#allocation2 + $0x28] sm:$0x7]  ;;  %v2577_v48 = vpack.c.bf16 %v2573_v43, %v2573_v43 }
 0x532   : > { %v2544_v47 = vld [vmem:[#allocation2 + $0x28] sm:$0x3]  ;;  %v2547_v49 = vpack.c.bf16 %v2543_v45, %v2543_v45  ;;  %v2578_v50 = vpack.c.bf16 %v2574_v46, %v2574_v46  ;;  %v2844_v31 = vld [vmem:[#allocation2 + $0x20] sm:$0xf] }
 0x533   : > { %v2548_v51 = vpack.c.bf16 %v2544_v47, %v2544_v47  ;;  %v2611_v52 = vshrl.u32 %v2577_v48, 16  ;;  %v2614_v53 = vshll.u32 %v2577_v48, 16  ;;  %v2845_v29 = vld [vmem:[#allocation2 + $0x28] sm:$0xf]  ;;  %v2848_v35 = vpack.c.bf16 %v2844_v31, %v2844_v31  ;;  %v6281_v31 = vld [vmem:[#allocation10 + $0xe0] sm:$0xff] }
 0x534   : > { %v2739_v54 = vrot.slane %v2547_v49, 1  ;;  %v2628_v55 = vshrl.u32 %v2578_v50, 16  ;;  %v2631_v59 = vshll.u32 %v2578_v50, 16  ;;  %v2849_v34 = vpack.c.bf16 %v2845_v29, %v2845_v29  ;;  %v6254_v29 = vld [vmem:[#allocation10 + $0x8] sm:$0xff] }
 0x535   : > { %v2742_v3 = vrot.slane %v2548_v51, 1  ;;  %v2613_v1 = vrot.slane %v2611_v52, 1  ;;  %v2616_v9 = vrot.slane %v2614_v53, 2 }
 0x536   : > { %v2630_v2 = vrot.slane %v2628_v55, 1  ;;  %v2633_v15 = vrot.slane %v2631_v59, 2  ;;  %v2881_v38 = vrot.slane %v2849_v34, 2  ;;  %v6428_v55 = vld [vmem:[%s7391_s8] ss:$0 sm:$0xff]  ;;  %v6253_v34 = vld [vmem:[#allocation10] sm:$0xff] }
 0x537   : > { %v2617_v23 = vor.u32 %v2616_v9, %v2613_v1 }
 0x538   : > { %v2525_v39 = vpop.permute.xlu0 %2524  ;;  %v2634_v25 = vor.u32 %v2633_v15, %v2630_v2  ;;  %v6270_v15 = vld [vmem:[#allocation10 + $0x88] sm:$0xff] }
 0x539   : > { %2533 = vst.msk [vmem:[#allocation2] sm:$0xf8] %vm641_vm9, %v2525_v39 }
 0x53a   : > { %2534 = vst.msk [vmem:[#allocation2 + $0x8] sm:$0xf8] %vm612_vm0, %v2525_v39  ;;  %v2878_v39 = vrot.slane %v2848_v35, 2  ;;  %v6261_v35 = vld [vmem:[#allocation10 + $0x40] sm:$0xff] }
 0x540   : > { %v2539_v56 = vld [vmem:[#allocation2] sm:$0xfc] }
 0x541   : > { %v2527_v44 = vpop.permute.xlu1 %2526  ;;  %v2571_v58 = vld [vmem:[#allocation2] sm:$0xf8]  ;;  %v2540_v63 = vld [vmem:[#allocation2 + $0x8] sm:$0xfc] }
 0x542   : > { %2535 = vst.msk [vmem:[#allocation2 + $0x10] sm:$0xff] %vm644_vm11, %v2527_v44  ;;  %v2572_v5 = vld [vmem:[#allocation2 + $0x8] sm:$0xf8]  ;;  %v2842_v30 = vld [vmem:[#allocation2] sm:$0xf0] }
 0x543   : > { %2536 = vst.msk [vmem:[#allocation2 + $0x18] sm:$0xff] %vm614_vm6, %v2527_v44  ;;  %v2843_v28 = vld [vmem:[#allocation2 + $0x8] sm:$0xf0] }
 0x549   : > { %v2541_v57 = vld [vmem:[#allocation2 + $0x10] sm:$0xff] }
 0x54a   : > { %v2545_v61 = vpack.c.bf16 %v2541_v57, %v2539_v56  ;;  %v2542_v0 = vld [vmem:[#allocation2 + $0x18] sm:$0xff]  ;;  %v2575_v4 = vpack.c.bf16 %v2541_v57, %v2571_v58  ;;  %v2846_v33 = vpack.c.bf16 %v2541_v57, %v2842_v30 }
 0x54b   : > { %v2546_v7 = vpack.c.bf16 %v2542_v0, %v2540_v63  ;;  %v2576_v60 = vpack.c.bf16 %v2542_v0, %v2572_v5  ;;  %v2847_v32 = vpack.c.bf16 %v2542_v0, %v2843_v28  ;;  %v6266_v28 = vld [vmem:[#allocation10 + $0x68] sm:$0xff] }
 0x54c   : > { %v2738_v10 = vrot.slane %v2545_v61, 1  ;;  %v2603_v11 = vshrl.u32 %v2575_v4, 16  ;;  %v2606_v12 = vshll.u32 %v2575_v4, 16  ;;  %v2877_v37 = vrot.slane %v2846_v33, 2  ;;  %v6262_v30 = vld [vmem:[#allocation10 + $0x48] sm:$0xff]  ;;  %v6265_v33 = vld [vmem:[#allocation10 + $0x60] sm:$0xff] }
 0x54d   : > { %v2741_v13 = vrot.slane %v2546_v7, 1  ;;  %v2620_v6 = vshrl.u32 %v2576_v60, 16  ;;  %v2623_v14 = vshll.u32 %v2576_v60, 16  ;;  %v2880_v36 = vrot.slane %v2847_v32, 2 }
 0x54e   : > { %v2740_v16 = vsel %vm851_vm12, %v2738_v10, %v2739_v54  ;;  %v2605_v17 = vrot.slane %v2603_v11, 1  ;;  %v2608_v18 = vrot.slane %v2606_v12, 2  ;;  %v2879_v41 = vsel %vm991_vm15, %v2877_v37, %v2878_v39  ;;  %v6264_v37 = vld [vmem:[#allocation10 + $0x58] sm:$0xff]  ;;  %v6278_v39 = vld [vmem:[#allocation10 + $0xc8] sm:$0xff] }
 0x54f   : > { %2822 = vmatmul.bf16.vlgmr.msra.gmra.mxu0 %v2740_v16  ;;  %v2743_v19 = vsel %vm851_vm12, %v2741_v13, %v2742_v3  ;;  %v2622_v20 = vrot.slane %v2620_v6, 1  ;;  %v2625_v21 = vrot.slane %v2623_v14, 2  ;;  %v2882_v40 = vsel %vm991_vm15, %v2880_v36, %v2881_v38  ;;  %v6260_v13 = vld [vmem:[#allocation10 + $0x38] sm:$0xff]  ;;  %v6271_v6 = vld [vmem:[#allocation10 + $0x90] sm:$0xff]  ;;  %v6258_v16 = vld [vmem:[#allocation10 + $0x28] sm:$0xff] }
 0x550   : > { %5455 = vmatmul.msk.bf16.vlgmr.msrb.gmra.mxu1 %vm815_vm13, %v2743_v19  ;;  %v2609_v22 = vor.u32 %v2608_v18, %v2605_v17  ;;  %v6259_v14 = vld [vmem:[#allocation10 + $0x30] sm:$0xff]  ;;  %v6274_v17 = vld [vmem:[#allocation10 + $0xa8] sm:$0xff]  ;;  %v6269_v18 = vld [vmem:[#allocation10 + $0x80] sm:$0xff] }
 0x551   : > { %v2626_v24 = vor.u32 %v2625_v21, %v2622_v20  ;;  %3181 = vmatpush.bf16.msra.mxu1 %v6271_v6  ;;  %v6257_v19 = vld [vmem:[#allocation10 + $0x20] sm:$0xff]  ;;  %3200 = vmatpush.bf16.msrb.mxu0 %v6274_v17  ;;  %v6268_v21 = vld [vmem:[#allocation10 + $0x78] sm:$0xff]  ;;  %v6279_v38 = vld [vmem:[#allocation10 + $0xd0] sm:$0xff] }
 0x552   : > { %v2618_v26 = vsel %vm713_vm14, %v2609_v22, %v2617_v23  ;;  %v6273_v20 = vld [vmem:[#allocation10 + $0xa0] sm:$0xff]  ;;  %v6256_v22 = vld [vmem:[#allocation10 + $0x18] sm:$0xff] }
 0x553   : > { %2714 = vmatmul.bf16.vlgmr.msrb.gmra.mxu2 %v2618_v26  ;;  %v2635_v27 = vsel %vm713_vm14, %v2626_v24, %v2634_v25  ;;  %v6272_v23 = vld [vmem:[#allocation10 + $0x98] sm:$0xff]  ;;  %v6267_v24 = vld [vmem:[#allocation10 + $0x70] sm:$0xff] }
 0x554   : > { %5410 = vmatmul.msk.bf16.vlgmr.msra.gmra.mxu3 %vm815_vm13, %v2635_v27  ;;  %3289 = vmatpush.bf16.msrb.mxu2 %v6260_v13  ;;  %v6255_v25 = vld [vmem:[#allocation10 + $0x10] sm:$0xff]  ;;  %v6282_v27 = vld [vmem:[#allocation10 + $0xe8] sm:$0xff]  ;;  %v6280_v36 = vld [vmem:[#allocation10 + $0xd8] sm:$0xff] }
 0x555   : > { %3182 = vmatpush.bf16.msra.mxu1 %v6270_v15  ;;  %3201 = vmatpush.bf16.msrb.mxu0 %v6273_v20  ;;  %v6263_v26 = vld [vmem:[#allocation10 + $0x50] sm:$0xff] }
 0x556   : > { %3308 = vmatpush.bf16.msra.mxu3 %v6263_v26 }
 0x558   : > { %3290 = vmatpush.bf16.msrb.mxu2 %v6259_v14 }
 0x559   : > { %3183 = vmatpush.bf16.msra.mxu1 %v6269_v18  ;;  %3202 = vmatpush.bf16.msrb.mxu0 %v6272_v23 }
 0x55a   : > { %3309 = vmatpush.bf16.msra.mxu3 %v6262_v30 }
 0x55c   : > { %3291 = vmatpush.bf16.msrb.mxu2 %v6258_v16 }
 0x55d   : > { %3184 = vmatpush.bf16.msra.mxu1 %v6268_v21  ;;  %3428 = vmatpush.bf16.msra.mxu0 %v6282_v27 }
 0x55e   : > { %3310 = vmatpush.bf16.msra.mxu3 %v6261_v35 }
 0x560   : > { %3292 = vmatpush.bf16.msrb.mxu2 %v6257_v19 }
 0x561   : > { %3185 = vmatpush.bf16.msra.mxu1 %v6267_v24  ;;  %3429 = vmatpush.bf16.msra.mxu0 %v6281_v31 }
 0x563   : > { %5500 = vmatmul.msk.bf16.vlgmr.msra.gmra.mxu2 %vm815_vm13, %v2882_v40  ;;  %v6285_v40 = vld [vmem:[#allocation10 + $0x100] sm:$0xff] }
 0x564   : > { %2961 = vmatmul.bf16.vlgmr.msrb.gmra.mxu3 %v2879_v41  ;;  %3293 = vmatpush.bf16.msrb.mxu2 %v6256_v22  ;;  %v6277_v41 = vld [vmem:[#allocation10 + $0xc0] sm:$0xff] }
 0x565   : > { %3186 = vmatpush.bf16.msra.mxu1 %v6266_v28  ;;  %3430 = vmatpush.bf16.msra.mxu0 %v6280_v36 }
 0x568   : > { %3294 = vmatpush.bf16.msrb.mxu2 %v6255_v25 }
 0x569   : > { %3187 = vmatpush.bf16.msra.mxu1 %v6265_v33  ;;  %3431 = vmatpush.bf16.msra.mxu0 %v6279_v38 }
 0x56c   : > { %3295 = vmatpush.bf16.msrb.mxu2 %v6254_v29 }
 0x56d   : > { %3188 = vmatpush.bf16.msra.mxu1 %v6264_v37  ;;  %3432 = vmatpush.bf16.msra.mxu0 %v6278_v39 }
 0x570   : > { %3296 = vmatpush.bf16.msrb.mxu2 %v6253_v34 }
 0x571   : > { %3447 = vmatpush.bf16.msrb.mxu1 %v6285_v40  ;;  %3433 = vmatpush.bf16.msra.mxu0 %v6277_v41 }
 0x5cc   : > { %v2823_v47 = vpop.f32.mrf.mxu0 }
 0x5cd   : > { %v2837_v49 = vpop.f32.mrf.mxu1 }
 0x5d4   : > { %v2825_v57 = vpop.f32.mrf.mxu0 }
 0x5d5   : > { %v2839_v0 = vpop.f32.mrf.mxu1 }
 0x5d6   : > { %v2715_v42 = vpop.f32.mrf.mxu2 }
 0x5d7   : > { %v2729_v43 = vpop.f32.mrf.mxu3 }
 0x5d8   : > { %v2730_v46 = vadd.f32 %v2729_v43, %v2715_v42  ;;  %v6284_v42 = vld [vmem:[#allocation10 + $0xf8] sm:$0xff] }
 0x5d9   : > { %3448 = vmatpush.bf16.msrb.mxu1 %v6284_v42 }
 0x5da   : > { %v2824_v48 = vadd.f32 %v2823_v47, %v2730_v46  ;;  %v6275_v46 = vld [vmem:[#allocation10 + $0xb0] sm:$0xff] }
 0x5dc   : > { %v2838_v53 = vadd.f32 %v2837_v49, %v2824_v48 }
 0x5de   : > { %v2717_v44 = vpop.f32.mrf.mxu2 }
 0x5df   : > { %v2731_v45 = vpop.f32.mrf.mxu3 }
 0x5e0   : > { %v2732_v52 = vadd.f32 %v2731_v45, %v2717_v44  ;;  %v6276_v44 = vld [vmem:[#allocation10 + $0xb8] sm:$0xff]  ;;  %v6283_v45 = vld [vmem:[#allocation10 + $0xf0] sm:$0xff] }
 0x5e1   : > { %3434 = vmatpush.bf16.msra.mxu0 %v6276_v44  ;;  %3449 = vmatpush.bf16.msrb.mxu1 %v6283_v45 }
 0x5e2   : > { %v2826_v58 = vadd.f32 %v2825_v57, %v2732_v52 }
 0x5e4   : > { %v2840_v4 = vadd.f32 %v2839_v0, %v2826_v58 }
 0x5e5   : > { %3435 = vmatpush.bf16.msra.mxu0 %v6275_v46  ;;  %v3482_v46 = vld [vmem:[%s7393_s10 + $0x78] sm:$0xff] }
 0x5e6   : > { %v2976_v50 = vpop.f32.mrf.mxu2  ;;  %3484 = vmatpush.msrb.mxu3 %v3482_v46  ;;  %v6287_v46 = vld [vmem:[%s7397_s14 + $0x8] sm:$0xff] }
 0x5e7   : > { %v2962_v51 = vpop.f32.mrf.mxu3 }
 0x5e8   : > { %v2977_v54 = vadd.f32 %v2976_v50, %v2962_v51 }
 0x5ea   : > { %v2981_v56 = vadd.f32 %v2977_v54, %v2838_v53 }
 0x5ec   : > { %v2986_v59 = vadd.f32 %v6428_v55, %v2981_v56 }
 0x5ee   : > { %v2978_v61 = vpop.f32.mrf.mxu2  ;;  %vm2988_vm8 = vcmp.ge.f32.partialorder %v2986_v59, 0.0  ;;  %v2990_v63 = vmul.f32 0.1, %v2986_v59 }
 0x5ef   : > { %v2964_v3 = vpop.f32.mrf.mxu3 }
 0x5f0   : > { %v2979_v5 = vadd.f32 %v2978_v61, %v2964_v3  ;;  %v2992_v7 = vsel %vm2988_vm8, %v2986_v59, %v2990_v63 }
 0x5f1   : > { %v2996_v1 = vrot.slane %v2992_v7, 5 }
 0x5f2   : > { %v2982_v9 = vadd.f32 %v2979_v5, %v2840_v4 }
 0x5f3   : > { %2999 = vrot.lane.b32.xlu0 %v2996_v1, %s6620_s30 }
 0x5f4   : > { %v2987_v60 = vadd.f32 %v6428_v55, %v2982_v9 }
 0x5f6   : > { %vm2989_vm1 = vcmp.ge.f32.partialorder %v2987_v60, 0.0  ;;  %v2991_v10 = vmul.f32 0.1, %v2987_v60 }
 0x5f8   : > { %v2993_v11 = vsel %vm2989_vm1, %v2987_v60, %v2991_v10 }
 0x5f9   : > { %v2997_v12 = vrot.slane %v2993_v11, 5 }
 0x5fb   : > { %3003 = vrot.lane.b32.xlu2 %v2997_v12, %s6620_s30  ;;  %v2998_v2 = vsel %vm628_vm2, %v2996_v1, %v2997_v12 }
 0x5fc   : > { %3001 = vrot.lane.b32.xlu1 %v2998_v2, %s6620_s30 }
 0x655   : > { %v3004_v32 = vpop.permute.xlu2 %3003 }
 0x656   : > { %3012 = vst.msk [vmem:[#allocation2 + $0x20] sm:$0x7] %vm647_vm10, %v3004_v32 }
 0x657   : > { %3013 = vst.msk [vmem:[#allocation2 + $0x28] sm:$0x7] %vm616_vm3, %v3004_v32 }
 0x65d   : > { %v3048_v47 = vld [vmem:[#allocation2 + $0x20] sm:$0x7] }
 0x65e   : > { %v3018_v49 = vld [vmem:[#allocation2 + $0x20] sm:$0x3]  ;;  %v3049_v50 = vld [vmem:[#allocation2 + $0x28] sm:$0x7]  ;;  %v3052_v52 = vpack.c.bf16 %v3048_v47, %v3048_v47  ;;  %v3481_v47 = vld [vmem:[%s7393_s10 + $0x70] sm:$0xff] }
 0x65f   : > { %v3019_v51 = vld [vmem:[#allocation2 + $0x28] sm:$0x3]  ;;  %v3022_v53 = vpack.c.bf16 %v3018_v49, %v3018_v49  ;;  %v3053_v54 = vpack.c.bf16 %v3049_v50, %v3049_v50  ;;  %v3319_v35 = vld [vmem:[#allocation2 + $0x20] sm:$0xf]  ;;  %3485 = vmatpush.msrb.mxu3 %v3481_v47  ;;  %v3478_v50 = vld [vmem:[%s7393_s10 + $0x58] sm:$0xff] }
 0x660   : > { %v3023_v55 = vpack.c.bf16 %v3019_v51, %v3019_v51  ;;  %v3086_v56 = vshrl.u32 %v3052_v52, 16  ;;  %v3089_v57 = vshll.u32 %v3052_v52, 16  ;;  %v3320_v33 = vld [vmem:[#allocation2 + $0x28] sm:$0xf]  ;;  %v3323_v39 = vpack.c.bf16 %v3319_v35, %v3319_v35  ;;  %v3479_v49 = vld [vmem:[%s7393_s10 + $0x60] sm:$0xff]  ;;  %v3477_v51 = vld [vmem:[%s7393_s10 + $0x50] sm:$0xff] }
 0x661   : > { %v3214_v58 = vrot.slane %v3022_v53, 1  ;;  %v3103_v59 = vshrl.u32 %v3053_v54, 16  ;;  %v3106_v3 = vshll.u32 %v3053_v54, 16  ;;  %v3324_v38 = vpack.c.bf16 %v3320_v33, %v3320_v33  ;;  %v3476_v52 = vld [vmem:[%s7393_s10 + $0x48] sm:$0xff]  ;;  %v3475_v53 = vld [vmem:[%s7393_s10 + $0x40] sm:$0xff]  ;;  %v3474_v54 = vld [vmem:[%s7393_s10 + $0x38] sm:$0xff] }
 0x662   : > { %v3217_v1 = vrot.slane %v3023_v55, 1  ;;  %v3088_v11 = vrot.slane %v3086_v56, 1  ;;  %v3091_v12 = vrot.slane %v3089_v57, 2  ;;  %v3473_v57 = vld [vmem:[%s7393_s10 + $0x30] sm:$0xff]  ;;  %v6295_v47 = vld [vmem:[%s7397_s14 + $0x48] sm:$0xff] }
 0x663   : > { %v3105_v15 = vrot.slane %v3103_v59, 1  ;;  %v3108_v19 = vrot.slane %v3106_v3, 2  ;;  %v3356_v42 = vrot.slane %v3324_v38, 2  ;;  %v3471_v59 = vld [vmem:[%s7393_s10 + $0x20] sm:$0xff]  ;;  %v6292_v35 = vld [vmem:[%s7397_s14 + $0x30] sm:$0xff]  ;;  %v6301_v38 = vld [vmem:[%s7397_s14 + $0x78] sm:$0xff] }
 0x664   : > { %v3092_v27 = vor.u32 %v3091_v12, %v3088_v11 }
 0x665   : > { %v3000_v43 = vpop.permute.xlu0 %2999  ;;  %v3109_v29 = vor.u32 %v3108_v19, %v3105_v15 }
 0x666   : > { %3008 = vst.msk [vmem:[#allocation2] sm:$0xf8] %vm641_vm9, %v3000_v43 }
 0x667   : > { %3009 = vst.msk [vmem:[#allocation2 + $0x8] sm:$0xf8] %vm612_vm0, %v3000_v43  ;;  %v3353_v43 = vrot.slane %v3323_v39, 2  ;;  %v6290_v39 = vld [vmem:[%s7397_s14 + $0x20] sm:$0xff] }
 0x66d   : > { %v3014_v61 = vld [vmem:[#allocation2] sm:$0xfc] }
 0x66e   : > { %v3002_v48 = vpop.permute.xlu1 %3001  ;;  %v3046_v0 = vld [vmem:[#allocation2] sm:$0xf8]  ;;  %v3015_v5 = vld [vmem:[#allocation2 + $0x8] sm:$0xfc] }
 0x66f   : > { %3010 = vst.msk [vmem:[#allocation2 + $0x10] sm:$0xff] %vm644_vm11, %v3002_v48  ;;  %v3047_v60 = vld [vmem:[#allocation2 + $0x8] sm:$0xf8]  ;;  %v3317_v34 = vld [vmem:[#allocation2] sm:$0xf0] }
 0x670   : > { %3011 = vst.msk [vmem:[#allocation2 + $0x18] sm:$0xff] %vm614_vm6, %v3002_v48  ;;  %v3318_v32 = vld [vmem:[#allocation2 + $0x8] sm:$0xf0] }
 0x671   : > { %v3480_v48 = vld [vmem:[%s7393_s10 + $0x68] sm:$0xff] }
 0x672   : > { %3486 = vmatpush.msrb.mxu3 %v3480_v48  ;;  %v6297_v48 = vld [vmem:[%s7397_s14 + $0x58] sm:$0xff] }
 0x674   : > { %3487 = vmatpush.msrb.mxu3 %v3479_v49  ;;  %v6286_v49 = vld [vmem:[%s7397_s14] sm:$0xff] }
 0x676   : > { %v3016_v63 = vld [vmem:[#allocation2 + $0x10] sm:$0xff]  ;;  %3488 = vmatpush.msrb.mxu3 %v3478_v50  ;;  %v6294_v50 = vld [vmem:[%s7397_s14 + $0x40] sm:$0xff] }
 0x677   : > { %v3020_v4 = vpack.c.bf16 %v3016_v63, %v3014_v61  ;;  %v3017_v7 = vld [vmem:[#allocation2 + $0x18] sm:$0xff]  ;;  %v3050_v9 = vpack.c.bf16 %v3016_v63, %v3046_v0  ;;  %v3321_v37 = vpack.c.bf16 %v3016_v63, %v3317_v34  ;;  %v3469_v63 = vld [vmem:[%s7393_s10 + $0x10] sm:$0xff] }
 0x678   : > { %v3021_v10 = vpack.c.bf16 %v3017_v7, %v3015_v5  ;;  %v3051_v2 = vpack.c.bf16 %v3017_v7, %v3047_v60  ;;  %v3322_v36 = vpack.c.bf16 %v3017_v7, %v3318_v32  ;;  %3489 = vmatpush.msrb.mxu3 %v3477_v51  ;;  %v3470_v61 = vld [vmem:[%s7393_s10 + $0x18] sm:$0xff]  ;;  %v3468_v5 = vld [vmem:[%s7393_s10 + $0x8] sm:$0xff]  ;;  %v6304_v60 = vld [vmem:[%s7397_s14 + $0x90] sm:$0xff] }
 0x679   : > { %v3213_v13 = vrot.slane %v3020_v4, 1  ;;  %v3078_v6 = vshrl.u32 %v3050_v9, 16  ;;  %v3081_v14 = vshll.u32 %v3050_v9, 16  ;;  %v3352_v41 = vrot.slane %v3321_v37, 2  ;;  %v6291_v37 = vld [vmem:[%s7397_s14 + $0x28] sm:$0xff]  ;;  %v6318_v51 = vld [vmem:[%s7397_s14 + $0x100] sm:$0xff] }
 0x67a   : > { %v3216_v16 = vrot.slane %v3021_v10, 1  ;;  %v3095_v17 = vshrl.u32 %v3051_v2, 16  ;;  %v3098_v18 = vshll.u32 %v3051_v2, 16  ;;  %v3355_v40 = vrot.slane %v3322_v36, 2  ;;  %3490 = vmatpush.msrb.mxu3 %v3476_v52  ;;  %v6293_v10 = vld [vmem:[%s7397_s14 + $0x38] sm:$0xff]  ;;  %v6302_v36 = vld [vmem:[%s7397_s14 + $0x80] sm:$0xff] }
 0x67b   : > { %v3215_v20 = vsel %vm851_vm12, %v3213_v13, %v3214_v58  ;;  %v3080_v21 = vrot.slane %v3078_v6, 1  ;;  %v3083_v22 = vrot.slane %v3081_v14, 2  ;;  %v3354_v45 = vsel %vm991_vm15, %v3352_v41, %v3353_v43  ;;  %v3472_v58 = vld [vmem:[%s7393_s10 + $0x28] sm:$0xff]  ;;  %v6289_v41 = vld [vmem:[%s7397_s14 + $0x18] sm:$0xff]  ;;  %v6288_v43 = vld [vmem:[%s7397_s14 + $0x10] sm:$0xff] }
 0x67c   : > { %3297 = vmatmul.bf16.vlgmr.msrb.gmra.mxu2 %v3215_v20  ;;  %v3218_v23 = vsel %vm851_vm12, %v3216_v16, %v3217_v1  ;;  %v3097_v24 = vrot.slane %v3095_v17, 1  ;;  %v3100_v25 = vrot.slane %v3098_v18, 2  ;;  %v3357_v44 = vsel %vm991_vm15, %v3355_v40, %v3356_v42  ;;  %3491 = vmatpush.msrb.mxu3 %v3475_v53  ;;  %v3467_v1 = vld [vmem:[%s7393_s10] sm:$0xff]  ;;  %v6300_v40 = vld [vmem:[%s7397_s14 + $0x70] sm:$0xff]  ;;  %v6299_v42 = vld [vmem:[%s7397_s14 + $0x68] sm:$0xff] }
 0x67d   : > { %5590 = vmatmul.msk.bf16.vlgmr.msra.gmra.mxu3 %vm815_vm13, %v3218_v23  ;;  %v3084_v26 = vor.u32 %v3083_v22, %v3080_v21  ;;  %v6326_v52 = vld [vmem:[%s7397_s14 + $0x140] sm:$0xff]  ;;  %v6329_v53 = vld [vmem:[%s7397_s14 + $0x158] sm:$0xff] }
 0x67e   : > { %v3101_v28 = vor.u32 %v3100_v25, %v3097_v24  ;;  %3492 = vmatpush.msrb.mxu3 %v3474_v54  ;;  %v6325_v54 = vld [vmem:[%s7397_s14 + $0x138] sm:$0xff] }
 0x67f   : > { %v3093_v30 = vsel %vm713_vm14, %v3084_v26, %v3092_v27 }
 0x680   : > { %3189 = vmatmul.bf16.vlgmr.msra.gmra.mxu1 %v3093_v30  ;;  %v3110_v31 = vsel %vm713_vm14, %v3101_v28, %v3109_v29  ;;  %3493 = vmatpush.msrb.mxu3 %v3473_v57 }
 0x681   : > { %5545 = vmatmul.msk.bf16.vlgmr.msrb.gmra.mxu0 %vm815_vm13, %v3110_v31  ;;  %3727 = vmatpush.bf16.msra.mxu1 %v6304_v60  ;;  %v6319_v60 = vld [vmem:[%s7397_s14 + $0x108] sm:$0xff] }
 0x682   : > { %3494 = vmatpush.msrb.mxu3 %v3472_v58  ;;  %3824 = vmatpush.bf16.msrb.mxu0 %v6293_v10  ;;  %v6316_v58 = vld [vmem:[%s7397_s14 + $0xf0] sm:$0xff] }
 0x684   : > { %3495 = vmatpush.msrb.mxu3 %v3471_v59  ;;  %v6324_v59 = vld [vmem:[%s7397_s14 + $0x130] sm:$0xff] }
 0x686   : > { %3496 = vmatpush.msrb.mxu3 %v3470_v61  ;;  %3825 = vmatpush.bf16.msrb.mxu0 %v6292_v35  ;;  %v6327_v61 = vld [vmem:[%s7397_s14 + $0x148] sm:$0xff] }
 0x688   : > { %3497 = vmatpush.msrb.mxu3 %v3469_v63  ;;  %v6323_v63 = vld [vmem:[%s7397_s14 + $0x128] sm:$0xff] }
 0x68a   : > { %3498 = vmatpush.msrb.mxu3 %v3468_v5  ;;  %3826 = vmatpush.bf16.msrb.mxu0 %v6291_v37  ;;  %v6351_v37 = vld [vmem:[%s7397_s14 + $0x208] sm:$0xff] }
 0x68c   : > { %3499 = vmatpush.msrb.mxu3 %v3467_v1  ;;  %v6320_v1 = vld [vmem:[%s7397_s14 + $0x110] sm:$0xff] }
 0x68e   : > { %3827 = vmatpush.bf16.msrb.mxu0 %v6290_v39 }
 0x690   : > { %5635 = vmatmul.msk.bf16.vlgmr.msrb.gmra.mxu1 %vm815_vm13, %v3357_v44  ;;  %v6296_v44 = vld [vmem:[%s7397_s14 + $0x50] sm:$0xff] }
 0x691   : > { %3436 = vmatmul.bf16.vlgmr.msra.gmra.mxu0 %v3354_v45  ;;  %v6298_v45 = vld [vmem:[%s7397_s14 + $0x60] sm:$0xff]  ;;  %3843 = vmatpush.bf16.msra.mxu3 %v6296_v44 }
 0x692   : > { %3828 = vmatpush.bf16.msrb.mxu0 %v6289_v41 }
 0x695   : > { %3844 = vmatpush.bf16.msra.mxu3 %v6295_v47 }
 0x696   : > { %3829 = vmatpush.bf16.msrb.mxu0 %v6288_v43  ;;  %v6335_v43 = vld [vmem:[%s7397_s14 + $0x188] sm:$0xff] }
 0x699   : > { %3845 = vmatpush.bf16.msra.mxu3 %v6294_v50 }
 0x69a   : > { %3830 = vmatpush.bf16.msrb.mxu0 %v6287_v46 }
 0x69e   : > { %3831 = vmatpush.bf16.msrb.mxu0 %v6286_v49 }
 0x6a2   : > { %4147 = vmatpush.bf16.msra.mxu0 %v6329_v53 }
 0x6fd   : > { %v3190_v55 = vpop.f32.mrf.mxu1 }
 0x6fe   : > { %v3204_v56 = vpop.f32.mrf.mxu0 }
 0x6ff   : > { %v3298_v3 = vpop.f32.mrf.mxu2  ;;  %v3205_v7 = vadd.f32 %v3204_v56, %v3190_v55  ;;  %v6317_v55 = vld [vmem:[%s7397_s14 + $0xf8] sm:$0xff]  ;;  %v6328_v56 = vld [vmem:[%s7397_s14 + $0x150] sm:$0xff] }
 0x700   : > { %v3312_v11 = vpop.f32.mrf.mxu3  ;;  %4148 = vmatpush.bf16.msra.mxu0 %v6328_v56 }
 0x701   : > { %v3299_v9 = vadd.f32 %v3298_v3, %v3205_v7  ;;  %v6321_v3 = vld [vmem:[%s7397_s14 + $0x118] sm:$0xff]  ;;  %v6307_v7 = vld [vmem:[%s7397_s14 + $0xa8] sm:$0xff] }
 0x703   : > { %v3313_v13 = vadd.f32 %v3312_v11, %v3299_v9  ;;  %v6306_v9 = vld [vmem:[%s7397_s14 + $0xa0] sm:$0xff]  ;;  %v6305_v11 = vld [vmem:[%s7397_s14 + $0x98] sm:$0xff] }
 0x704   : > { %4149 = vmatpush.bf16.msra.mxu0 %v6327_v61 }
 0x705   : > { %v3192_v0 = vpop.f32.mrf.mxu1 }
 0x706   : > { %v3206_v4 = vpop.f32.mrf.mxu0 }
 0x707   : > { %v3207_v6 = vadd.f32 %v3206_v4, %v3192_v0  ;;  %v3300_v15 = vpop.f32.mrf.mxu2  ;;  %v6322_v0 = vld [vmem:[%s7397_s14 + $0x120] sm:$0xff] }
 0x708   : > { %v3314_v21 = vpop.f32.mrf.mxu3  ;;  %v3507_v4 = vld [vmem:[%s7395_s12] sm:$0xff] }
 0x709   : > { %v3301_v17 = vadd.f32 %v3300_v15, %v3207_v6  ;;  %3528 = vmatpush.msra.mxu2 %v3507_v4 }
 0x70b   : > { %v3315_v23 = vadd.f32 %v3314_v21, %v3301_v17  ;;  %3746 = vmatpush.bf16.msrb.mxu2 %v6307_v7 }
 0x70d   : > { %v3451_v12 = vpop.f32.mrf.mxu1 }
 0x70e   : > { %v3437_v2 = vpop.f32.mrf.mxu0 }
 0x70f   : > { %v3452_v14 = vadd.f32 %v3451_v12, %v3437_v2  ;;  %3747 = vmatpush.bf16.msrb.mxu2 %v6306_v9  ;;  %v6337_v2 = vld [vmem:[%s7397_s14 + $0x198] sm:$0xff] }
 0x711   : > { %v3456_v16 = vadd.f32 %v3452_v14, %v3313_v13  ;;  %v6348_v13 = vld [vmem:[%s7397_s14 + $0x1f0] sm:$0xff] }
 0x713   : > { %v7080_v18 = vadd.f32 %v3456_v16, %v6977_v62  ;;  %3748 = vmatpush.bf16.msrb.mxu2 %v6305_v11 }
 0x715   : > { %v3453_v19 = vpop.f32.mrf.mxu1  ;;  %v3555_v20 = vrot.slane %v7080_v18, 5 }
 0x716   : > { %v3439_v22 = vpop.f32.mrf.mxu0 }
 0x717   : > { %v3454_v24 = vadd.f32 %v3453_v19, %v3439_v22  ;;  %3558 = vrot.lane.b32.xlu0 %v3555_v20, %s6620_s30 }
 0x719   : > { %v3457_v25 = vadd.f32 %v3454_v24, %v3315_v23 }
 0x71b   : > { %v7085_v26 = vadd.f32 %v3457_v25, %v6982_v8  ;;  %v6303_v8 = vld [vmem:[%s7397_s14 + $0x88] sm:$0xff] }
 0x71c   : > { %3728 = vmatpush.bf16.msra.mxu1 %v6303_v8 }
 0x71d   : > { %v3460_v27 = vadd.f32 %v7085_v26, %v7080_v18  ;;  %v3556_v28 = vrot.slane %v7085_v26, 5 }
 0x71f   : > { %v3461_v62 = vrot.slane %v3460_v27, 4  ;;  %3562 = vrot.lane.b32.xlu2 %v3556_v28, %s6620_s30  ;;  %v3557_v29 = vsel %vm628_vm2, %v3555_v20, %v3556_v28 }
 0x720   : > { %3560 = vrot.lane.b32.xlu1 %v3557_v29, %s6620_s30  ;;  %3729 = vmatpush.bf16.msra.mxu1 %v6302_v36 }
 0x721   : > { %v3462_v30 = vadd.f32 %v3461_v62, %v3460_v27  ;;  %v6347_v62 = vld [vmem:[%s7397_s14 + $0x1e8] sm:$0xff] }
 0x723   : > { %v3463_v31 = vrot.slane %v3462_v30, 2 }
 0x724   : > { %3730 = vmatpush.bf16.msra.mxu1 %v6301_v38  ;;  %v6346_v38 = vld [vmem:[%s7397_s14 + $0x1e0] sm:$0xff] }
 0x725   : > { %v3464_v32 = vadd.f32 %v3463_v31, %v3462_v30  ;;  %v6336_v30 = vld [vmem:[%s7397_s14 + $0x190] sm:$0xff] }
 0x727   : > { %v3465_v33 = vrot.slane %v3464_v32, 1 }
 0x728   : > { %3731 = vmatpush.bf16.msra.mxu1 %v6300_v40 }
 0x729   : > { %v3466_v34 = vadd.f32 %v3465_v33, %v3464_v32 }
 0x72b   : > { %3500 = vmatmul.f32.vlgmr.msrb.gmra.mxu3 %v3466_v34 }
 0x72c   : > { %3732 = vmatpush.bf16.msra.mxu1 %v6299_v42  ;;  %3982 = vmatpush.bf16.msrb.mxu3 %v6318_v51  ;;  %v6350_v51 = vld [vmem:[%s7397_s14 + $0x200] sm:$0xff] }
 0x730   : > { %3733 = vmatpush.bf16.msra.mxu1 %v6298_v45  ;;  %3983 = vmatpush.bf16.msrb.mxu3 %v6317_v55  ;;  %v6334_v55 = vld [vmem:[%s7397_s14 + $0x180] sm:$0xff] }
 0x734   : > { %3734 = vmatpush.bf16.msra.mxu1 %v6297_v48  ;;  %3984 = vmatpush.bf16.msrb.mxu3 %v6316_v58 }
 0x738   : > { %4128 = vmatpush.bf16.msrb.mxu1 %v6326_v52  ;;  %v6345_v52 = vld [vmem:[%s7397_s14 + $0x1d8] sm:$0xff] }
 0x73c   : > { %4129 = vmatpush.bf16.msrb.mxu1 %v6325_v54 }
 0x740   : > { %4130 = vmatpush.bf16.msrb.mxu1 %v6324_v59 }
 0x744   : > { %4131 = vmatpush.bf16.msrb.mxu1 %v6323_v63 }
 0x748   : > { %4132 = vmatpush.bf16.msrb.mxu1 %v6322_v0 }
 0x74c   : > { %4133 = vmatpush.bf16.msrb.mxu1 %v6321_v3  ;;  %v6349_v3 = vld [vmem:[%s7397_s14 + $0x1f8] sm:$0xff] }
 0x750   : > { %4134 = vmatpush.bf16.msrb.mxu1 %v6320_v1 }
 0x754   : > { %4135 = vmatpush.bf16.msrb.mxu1 %v6319_v60  ;;  %v6333_v60 = vld [vmem:[%s7397_s14 + $0x178] sm:$0xff] }
 0x779   : > { %v3563_v57 = vpop.permute.xlu2 %3562 }
 0x77a   : > { %3571 = vst.msk [vmem:[#allocation2 + $0x20] sm:$0x7] %vm647_vm10, %v3563_v57 }
 0x77b   : > { %3572 = vst.msk [vmem:[#allocation2 + $0x28] sm:$0x7] %vm616_vm3, %v3563_v57  ;;  %vm3509_vm3 = vcmask 64512  }
 0x781   : > { %v3603_v12 = vld [vmem:[#allocation2 + $0x20] sm:$0x1] }
 0x782   : > { %v3607_v6 = vpack.c.bf16 %v3603_v12, %v3603_v12  ;;  %v3996_v14 = vld [vmem:[#allocation2 + $0x28] sm:$0x7]  ;;  %v3995_v36 = vld [vmem:[#allocation2 + $0x20] sm:$0x7] }
 0x783   : > { %v4000_v29 = vpack.c.bf16 %v3996_v14, %v3996_v14  ;;  %v3855_v46 = vld [vmem:[#allocation2 + $0x28] sm:$0x3]  ;;  %v3999_v50 = vpack.c.bf16 %v3995_v36, %v3995_v36  ;;  %v4301_v1 = vld [vmem:[#allocation2 + $0x20] sm:$0x1f] }
 0x784   : > { %v3641_v28 = vshll.u32 %v3607_v6, 16  ;;  %v3859_v56 = vpack.c.bf16 %v3855_v46, %v3855_v46  ;;  %v3483_v6 = vld [vmem:[%s7394_s11] sm:$0x1] }
 0x785   : > { %v4050_v39 = vshrl.u32 %v4000_v29, 16  ;;  %v4053_v40 = vshll.u32 %v4000_v29, 16  ;;  %v4033_v63 = vshrl.u32 %v3999_v50, 16  ;;  %v4036_v0 = vshll.u32 %v3999_v50, 16 }
 0x786   : > { %v3643_v35 = vrot.slane %v3641_v28, 1  ;;  %v3891_v9 = vrot.slane %v3859_v56, 1  ;;  %v6330_v56 = vld [vmem:[%s7397_s14 + $0x160] sm:$0xff] }
 0x787   : > { %v4052_v53 = vrot.slane %v4050_v39, 1  ;;  %v4055_v54 = vrot.slane %v4053_v40, 2 }
 0x789   : > { %v3559_v5 = vpop.permute.xlu0 %3558  ;;  %v4056_v4 = vor.u32 %v4055_v54, %v4052_v53  ;;  %v6341_v53 = vld [vmem:[%s7397_s14 + $0x1b8] sm:$0xff] }
 0x78a   : > { %3567 = vst.msk [vmem:[#allocation2] sm:$0xf8] %vm641_vm9, %v3559_v5  ;;  %vm4500_vm9 = vcmask 1044480  }
 0x78b   : > { %3568 = vst.msk [vmem:[#allocation2 + $0x8] sm:$0xf8] %vm612_vm0, %v3559_v5  ;;  %vm3632_vm0 = vsmask.f32 7424  ;;  %v6344_v5 = vld [vmem:[%s7397_s14 + $0x1d0] sm:$0xff] }
 0x791   : > { %v3573_v15 = vld [vmem:[#allocation2] sm:$0xff] }
 0x792   : > { %v3561_v10 = vpop.permute.xlu1 %3560  ;;  %v3601_v17 = vld [vmem:[#allocation2] sm:$0xfe]  ;;  %v3574_v20 = vld [vmem:[#allocation2 + $0x8] sm:$0xff] }
 0x793   : > { %3569 = vst.msk [vmem:[#allocation2 + $0x10] sm:$0xff] %vm644_vm11, %v3561_v10  ;;  %v3994_v23 = vld [vmem:[#allocation2 + $0x8] sm:$0xf8]  ;;  %v3993_v41 = vld [vmem:[#allocation2] sm:$0xf8] }
 0x794   : > { %3570 = vst.msk [vmem:[#allocation2 + $0x18] sm:$0xff] %vm614_vm6, %v3561_v10  ;;  %v3853_v45 = vld [vmem:[#allocation2 + $0x8] sm:$0xfc]  ;;  %v4158_v46 = vld [vmem:[#allocation2] sm:$0xf0] }
 0x795   : > { %v3602_v7 = vld [vmem:[#allocation2 + $0x8] sm:$0xfe]  ;;  %vm4330_vm6 = vsmask.f32 5376 }
 0x796   : > { %v4300_v36 = vld [vmem:[#allocation2 + $0x8] sm:$0xe0] }
 0x79a   : > { %v7210_v16 = vld [vmem:[#allocation2 + $0x10] sm:$0xff] }
 0x79b   : > { %v3577_v19 = vpack.c.bf16 %v7210_v16, %v3573_v15  ;;  %v7213_v21 = vld [vmem:[#allocation2 + $0x18] sm:$0xff]  ;;  %v3605_v22 = vpack.c.bf16 %v7210_v16, %v3601_v17  ;;  %v3997_v44 = vpack.c.bf16 %v7210_v16, %v3993_v41  ;;  %v4035_v17 = vrot.slane %v4033_v63, 1  ;;  %v6331_v41 = vld [vmem:[%s7397_s14 + $0x168] sm:$0xff] }
 0x79c   : > { %v3578_v24 = vpack.c.bf16 %v7213_v21, %v3574_v20  ;;  %v3998_v25 = vpack.c.bf16 %v7213_v21, %v3994_v23  ;;  %v3857_v49 = vpack.c.bf16 %v7213_v21, %v3853_v45  ;;  %v3606_v12 = vpack.c.bf16 %v7213_v21, %v3602_v7  ;;  %v3604_v20 = vld [vmem:[#allocation2 + $0x28] sm:$0x1] }
 0x79d   : > { %3832 = vmatmul.bf16.vlgmr.msrb.gmra.mxu0 %v3577_v19  ;;  %v3636_v27 = vshll.u32 %v3605_v22, 16  ;;  %v3634_v31 = vshrl.u32 %v3605_v22, 16  ;;  %v4025_v57 = vshrl.u32 %v3997_v44, 16  ;;  %v4028_v58 = vshll.u32 %v3997_v44, 16  ;;  %v6343_v23 = vld [vmem:[%s7397_s14 + $0x1c8] sm:$0xff] }
 0x79e   : > { %5748 = vmatmul.msk.bf16.vlgmr.msra.gmra.mxu3 %vm815_vm13, %v3578_v24  ;;  %4435 = vmatpush.bf16.msrb.mxu0 %v6348_v13  ;;  %v4042_v33 = vshrl.u32 %v3998_v25, 16  ;;  %v4045_v34 = vshll.u32 %v3998_v25, 16  ;;  %v3890_v61 = vrot.slane %v3857_v49, 1  ;;  %v4038_v19 = vrot.slane %v4036_v0, 2  ;;  %v6314_v49 = vld [vmem:[%s7397_s14 + $0xe0] sm:$0xff] }
 0x79f   : > { %4269 = vmatpush.bf16.msra.mxu3 %v6337_v2  ;;  %v3638_v32 = vrot.slane %v3636_v27, 1  ;;  %v4027_v10 = vrot.slane %v4025_v57, 1  ;;  %v4030_v11 = vrot.slane %v4028_v58, 2  ;;  %v4299_v2 = vld [vmem:[#allocation2] sm:$0xe0]  ;;  %v4305_v24 = vpack.c.bf16 %v4301_v1, %v4301_v1  ;;  %v6332_v27 = vld [vmem:[%s7397_s14 + $0x170] sm:$0xff] }
 0x7a0   : > { %v4044_v47 = vrot.slane %v4042_v33, 1  ;;  %v4047_v48 = vrot.slane %v4045_v34, 2  ;;  %v4303_v14 = vpack.c.bf16 %v7210_v16, %v4299_v2  ;;  %v3892_v15 = vsel %vm851_vm12, %v3890_v61, %v3891_v9  ;;  %v6315_v34 = vld [vmem:[%s7397_s14 + $0xe8] sm:$0xff] }
 0x7a1   : > { %v3639_v8 = vor.u32 %v3638_v32, %v3634_v31  ;;  %v4031_v28 = vor.u32 %v4030_v11, %v4027_v10  ;;  %v3608_v29 = vpack.c.bf16 %v3604_v20, %v3604_v20  ;;  %v4304_v44 = vpack.c.bf16 %v7213_v21, %v4300_v36  ;;  %v6360_v20 = vld [vmem:[%s7397_s14 + $0x250] sm:$0xff] }
 0x7a2   : > { %4436 = vmatpush.bf16.msrb.mxu0 %v6347_v62  ;;  %v4048_v59 = vor.u32 %v4047_v48, %v4044_v47  ;;  %v3648_v62 = vshll.u32 %v3606_v12, 16  ;;  %v4332_v31 = vshrl.u32 %v4303_v14, 16  ;;  %v4335_v32 = vshll.u32 %v4303_v14, 16  ;;  %v6308_v36 = vld [vmem:[%s7397_s14 + $0xb0] sm:$0xff] }
 0x7a3   : > { %4270 = vmatpush.bf16.msra.mxu3 %v6336_v30  ;;  %v3644_v42 = vsel %vm3632_vm0, %v3639_v8, %v3643_v35  ;;  %v4302_v30 = vld [vmem:[#allocation2 + $0x28] sm:$0x1f]  ;;  %v4039_v8 = vor.u32 %v4038_v19, %v4035_v17  ;;  %v6342_v35 = vld [vmem:[%s7397_s14 + $0x1c0] sm:$0xff]  ;;  %v3653_v45 = vshll.u32 %v3608_v29, 16  ;;  %v3646_v50 = vshrl.u32 %v3606_v12, 16  ;;  %v6312_v17 = vld [vmem:[%s7397_s14 + $0xd0] sm:$0xff] }
 0x7a4   : > { %3735 = vmatmul.bf16.vlgmr.msra.gmra.mxu1 %v3644_v42  ;;  %v4057_v13 = vsel %vm713_vm14, %v4048_v59, %v4056_v4  ;;  %v3650_v42 = vrot.slane %v3648_v62, 1  ;;  %v4334_v47 = vrot.slane %v4332_v31, 2  ;;  %v4337_v48 = vrot.slane %v4335_v32, 3  ;;  %v6313_v4 = vld [vmem:[%s7397_s14 + $0xd8] sm:$0xff]  ;;  %v3852_v32 = vld [vmem:[#allocation2] sm:$0xfc] }
 0x7a5   : > { %4454 = vmatpush.bf16.msra.mxu1 %v6351_v37  ;;  %v4340_v37 = vshrl.u32 %v4305_v24, 16  ;;  %v4040_v40 = vsel %vm713_vm14, %v4031_v28, %v4039_v8  ;;  %v4349_v59 = vshrl.u32 %v4304_v44, 16  ;;  %v4352_v61 = vshll.u32 %v4304_v44, 16  ;;  %v6310_v28 = vld [vmem:[%s7397_s14 + $0xc0] sm:$0xff]  ;;  %v6359_v44 = vld [vmem:[%s7397_s14 + $0x248] sm:$0xff] }
 0x7a6   : > { %4437 = vmatpush.bf16.msrb.mxu0 %v6346_v38  ;;  %v4343_v38 = vshll.u32 %v4305_v24, 16  ;;  %v3651_v57 = vor.u32 %v3650_v42, %v3646_v50  ;;  %v3655_v63 = vrot.slane %v3653_v45, 1  ;;  %v4338_v0 = vor.u32 %v4337_v48, %v4334_v47  ;;  %v4159_v45 = vld [vmem:[#allocation2 + $0x8] sm:$0xf0]  ;;  %v6358_v47 = vld [vmem:[%s7397_s14 + $0x240] sm:$0xff]  ;;  %v6357_v50 = vld [vmem:[%s7397_s14 + $0x238] sm:$0xff] }
 0x7a7   : > { %4271 = vmatpush.bf16.msra.mxu3 %v6335_v43  ;;  %v4160_v43 = vld [vmem:[#allocation2 + $0x20] sm:$0xf]  ;;  %v4342_v54 = vrot.slane %v4340_v37, 2  ;;  %v4351_v11 = vrot.slane %v4349_v59, 2  ;;  %v4354_v12 = vrot.slane %v4352_v61, 3  ;;  %v3856_v8 = vpack.c.bf16 %v7210_v16, %v3852_v32  ;;  %v6352_v61 = vld [vmem:[%s7397_s14 + $0x210] sm:$0xff] }
 0x7a8   : > { %v4164_v58 = vpack.c.bf16 %v4160_v43, %v4160_v43  ;;  %v6338_v43 = vld [vmem:[%s7397_s14 + $0x1a0] sm:$0xff]  ;;  %v4163_v48 = vpack.c.bf16 %v7213_v21, %v4159_v45 }
 0x7a9   : > { %4455 = vmatpush.bf16.msra.mxu1 %v6350_v51  ;;  %v4162_v51 = vpack.c.bf16 %v7210_v16, %v4158_v46  ;;  %v4355_v19 = vor.u32 %v4354_v12, %v4351_v11  ;;  %v4161_v46 = vld [vmem:[#allocation2 + $0x28] sm:$0xf] }
 0x7aa   : > { %4438 = vmatpush.bf16.msrb.mxu0 %v6345_v52  ;;  %v4306_v52 = vpack.c.bf16 %v4302_v30, %v4302_v30  ;;  %v4194_v10 = vrot.slane %v4164_v58, 2  ;;  %v6309_v30 = vld [vmem:[%s7397_s14 + $0xb8] sm:$0xff]  ;;  %v4467_v58 = vld [vmem:[#allocation2 + $0x20] sm:$0x3f] }
 0x7ab   : > { %4272 = vmatpush.bf16.msra.mxu3 %v6334_v55  ;;  %v4345_v55 = vrot.slane %v4343_v38, 3  ;;  %v6340_v38 = vld [vmem:[%s7397_s14 + $0x1b0] sm:$0xff] }
 0x7ac   : > { %v4357_v7 = vshrl.u32 %v4306_v52, 16  ;;  %v4360_v1 = vshll.u32 %v4306_v52, 16 }
 0x7ad   : > { %5882 = vmatmul.msk.bf16.vlgmr.msra.gmra.mxu0 %vm815_vm13, %v4057_v13  ;;  %4456 = vmatpush.bf16.msra.mxu1 %v6349_v3  ;;  %v6362_v3 = vld [vmem:[%s7397_s14 + $0x260] sm:$0xff]  ;;  %v4346_v9 = vor.u32 %v4345_v55, %v4342_v54  ;;  %v6361_v13 = vld [vmem:[%s7397_s14 + $0x258] sm:$0xff]  ;;  %v6356_v54 = vld [vmem:[%s7397_s14 + $0x230] sm:$0xff] }
 0x7ae   : > { %5815 = vmatmul.msk.bf16.vlgmr.msrb.gmra.mxu3 %vm815_vm13, %v3892_v15  ;;  %v3501_v22 = vpop.f32.mrf.mxu3  ;;  %4439 = vmatpush.bf16.msrb.mxu0 %v6344_v5  ;;  %v4193_v5 = vrot.slane %v4162_v51, 2  ;;  %v4359_v14 = vrot.slane %v4357_v7, 2  ;;  %v4362_v15 = vrot.slane %v4360_v1, 3  ;;  %v4196_v51 = vrot.slane %v4163_v48, 2  ;;  %v6354_v55 = vld [vmem:[%s7397_s14 + $0x220] sm:$0xff] }
 0x7af   : > { %v3502_v25 = vadd.f32 %v3501_v22, %v3483_v6  ;;  %4273 = vmatpush.bf16.msra.mxu3 %v6333_v60  ;;  %v3656_v60 = vsel %vm3632_vm0, %v3651_v57, %v3655_v63  ;;  %v4347_v2 = vsel %vm4330_vm6, %v4338_v0, %v4346_v9  ;;  %v4465_v57 = vld [vmem:[#allocation2] sm:$0xc0]  ;;  %v4471_v63 = vpack.c.bf16 %v4467_v58, %v4467_v58 }
 0x7b0   : > { %v4195_v6 = vsel %vm991_vm15, %v4193_v5, %v4194_v10  ;;  %v4363_v22 = vor.u32 %v4362_v15, %v4359_v14  ;;  %v4469_v59 = vpack.c.bf16 %v7210_v16, %v4465_v57  ;;  %v3508_v14 = vld [vmem:[%s7396_s13] sm:$0x1] }
 0x7b1   : > { %vm3504_vm2 = vcmp.ge.f32.partialorder %v3502_v25, 0.0  ;;  %v3505_v33 = vmul.f32 0.1, %v3502_v25 }
 0x7b2   : > { %4440 = vmatpush.bf16.msrb.mxu0 %v6343_v23  ;;  %v6311_v23 = vld [vmem:[%s7397_s14 + $0xc8] sm:$0xff]  ;;  %v4364_v24 = vsel %vm4330_vm6, %v4355_v19, %v4363_v22  ;;  %v4501_v0 = vrot.slane %v4469_v59, 3 }
 0x7b3   : > { %v3506_v39 = vsel %vm3504_vm2, %v3502_v25, %v3505_v33  ;;  %4274 = vmatpush.bf16.msra.mxu3 %v6332_v27  ;;  %v4466_v25 = vld [vmem:[#allocation2 + $0x8] sm:$0xc0]  ;;  %v4468_v27 = vld [vmem:[#allocation2 + $0x28] sm:$0x3f]  ;;  %v3854_v33 = vld [vmem:[#allocation2 + $0x20] sm:$0x3] }
 0x7b4   : > { %5636 = vmatmul.msk.f32.vlgmr.msra.gmra.mxu2 %vm3509_vm3, %v3506_v39  ;;  %4136 = vmatmul.bf16.vlgmr.msrb.gmra.mxu1 %v4040_v40  ;;  %v4470_v62 = vpack.c.bf16 %v7213_v21, %v4466_v25  ;;  %v4472_v29 = vpack.c.bf16 %v4468_v27, %v4468_v27  ;;  %v3858_v37 = vpack.c.bf16 %v3854_v33, %v3854_v33  ;;  %v3887_v39 = vrot.slane %v3856_v8, 1  ;;  %v6355_v21 = vld [vmem:[%s7397_s14 + $0x228] sm:$0xff] }
 0x7b5   : > { %3963 = vmatpush.bf16.msra.mxu2 %v6315_v34 }
 0x7b6   : > { %4441 = vmatpush.bf16.msrb.mxu0 %v6342_v35  ;;  %v4504_v31 = vrot.slane %v4470_v62, 3  ;;  %v4505_v34 = vrot.slane %v4472_v29, 3  ;;  %v3888_v40 = vrot.slane %v3858_v37, 1 }
 0x7b7   : > { %4275 = vmatpush.bf16.msra.mxu3 %v6331_v41  ;;  %v6339_v41 = vld [vmem:[%s7397_s14 + $0x1a8] sm:$0xff] }
 0x7b8   : > { %v4506_v35 = vsel %vm4500_vm9, %v4504_v31, %v4505_v34  ;;  %v3889_v42 = vsel %vm851_vm12, %v3887_v39, %v3888_v40 }
 0x7b9   : > { %3964 = vmatpush.bf16.msra.mxu2 %v6314_v49  ;;  %v4165_v49 = vpack.c.bf16 %v4161_v46, %v4161_v46 }
 0x7ba   : > { %4442 = vmatpush.bf16.msrb.mxu0 %v6341_v53 }
 0x7bb   : > { %4276 = vmatpush.bf16.msra.mxu3 %v6330_v56  ;;  %v4197_v52 = vrot.slane %v4165_v49, 2  ;;  %v6353_v56 = vld [vmem:[%s7397_s14 + $0x218] sm:$0xff] }
 0x7bc   : > { %5703 = vmatmul.msk.bf16.vlgmr.msrb.gmra.mxu2 %vm815_vm13, %v3656_v60 }
 0x7bd   : > { %3965 = vmatpush.bf16.msra.mxu2 %v6313_v4  ;;  %4443 = vmatmul.bf16.vlgmr.msrb.gmra.mxu0 %v4347_v2  ;;  %v4198_v53 = vsel %vm991_vm15, %v4196_v51, %v4197_v52 }
 0x7be   : > { %4277 = vmatmul.bf16.vlgmr.msra.gmra.mxu3 %v4195_v6 }
 0x7bf   : > { %4596 = vmatpush.bf16.msrb.mxu3 %v6362_v3  ;;  %v4502_v3 = vrot.slane %v4471_v63, 3 }
 0x7c1   : > { %3966 = vmatpush.bf16.msra.mxu2 %v6312_v17  ;;  %v4503_v4 = vsel %vm4500_vm9, %v4501_v0, %v4502_v3 }
 0x7c3   : > { %4597 = vmatpush.bf16.msrb.mxu3 %v6361_v13 }
 0x7c4   : > { %6016 = vmatmul.msk.bf16.vlgmr.msra.gmra.mxu1 %vm815_vm13, %v4364_v24 }
 0x7c5   : > { %3967 = vmatpush.bf16.msra.mxu2 %v6311_v23 }
 0x7c7   : > { %4598 = vmatpush.bf16.msrb.mxu3 %v6360_v20 }
 0x7c9   : > { %3968 = vmatpush.bf16.msra.mxu2 %v6310_v28 }
 0x7cd   : > { %3969 = vmatpush.bf16.msra.mxu2 %v6309_v30 }
 0x7ce   : > { %6083 = vmatmul.msk.bf16.vlgmr.msrb.gmra.mxu3 %vm815_vm13, %v4506_v35 }
 0x7d1   : > { %3970 = vmatpush.bf16.msra.mxu2 %v6308_v36 }
 0x7d4   : > { %3971 = vmatmul.bf16.vlgmr.msra.gmra.mxu2 %v3889_v42 }
 0x7d5   : > { %4288 = vmatpush.bf16.msrb.mxu2 %v6340_v38 }
 0x7d9   : > { %4289 = vmatpush.bf16.msrb.mxu2 %v6339_v41 }
 0x7dd   : > { %4290 = vmatpush.bf16.msrb.mxu2 %v6338_v43 }
 0x7e1   : > { %4577 = vmatpush.bf16.msra.mxu2 %v6359_v44 }
 0x7e4   : > { %5949 = vmatmul.msk.bf16.vlgmr.msrb.gmra.mxu2 %vm815_vm13, %v4198_v53 }
 0x7e5   : > { %4578 = vmatpush.bf16.msra.mxu2 %v6358_v47 }
 0x7e9   : > { %4579 = vmatpush.bf16.msra.mxu2 %v6357_v50 }
 0x7ed   : > { %4580 = vmatpush.bf16.msra.mxu2 %v6356_v54  ;;  %v6429_v54 = vld [vmem:[%s7398_s15] ss:$0 sm:$0xff] }
 0x7f1   : > { %4581 = vmatpush.bf16.msra.mxu2 %v6355_v21 }
 0x7f5   : > { %4582 = vmatpush.bf16.msra.mxu2 %v6354_v55 }
 0x7f9   : > { %4583 = vmatpush.bf16.msra.mxu2 %v6353_v56 }
 0x7fd   : > { %4584 = vmatpush.bf16.msra.mxu2 %v6352_v61 }
 0x800   : > { %4585 = vmatmul.bf16.vlgmr.msra.gmra.mxu2 %v4503_v4 }
 0x81a   : > { %v3833_v11 = vpop.f32.mrf.mxu0 }
 0x821   : > { %v3847_v7 = vpop.f32.mrf.mxu3  ;;  %v3736_v60 = vpop.f32.mrf.mxu1 }
 0x822   : > { %v3835_v13 = vpop.f32.mrf.mxu0 }
 0x829   : > { %v3849_v9 = vpop.f32.mrf.mxu3  ;;  %v3738_v2 = vpop.f32.mrf.mxu1 }
 0x82a   : > { %v4151_v20 = vpop.f32.mrf.mxu0 }
 0x831   : > { %v3986_v16 = vpop.f32.mrf.mxu3  ;;  %v4137_v17 = vpop.f32.mrf.mxu1 }
 0x832   : > { %v4153_v29 = vpop.f32.mrf.mxu0  ;;  %v4152_v36 = vadd.f32 %v4151_v20, %v4137_v17 }
 0x837   : > { %v3530_v5 = vpop.f32.mrf.mxu2 }
 0x838   : > { %v3531_v19 = vadd.f32 %v3530_v5, %v3508_v14 }
 0x839   : > { %v3988_v6 = vpop.f32.mrf.mxu3  ;;  %v4139_v28 = vpop.f32.mrf.mxu1 }
 0x83a   : > { %v3533_v23 = vsub.f32 0.0, %v3531_v19  ;;  %v4444_v43 = vpop.f32.mrf.mxu0  ;;  %v4154_v50 = vadd.f32 %v4153_v29, %v4139_v28 }
 0x83c   : > { %v3534_v27 = vmul.f32 1.442695, %v3533_v23 }
 0x83e   : > { %6430 = vpow2.f32 %v3534_v27 }
 0x83f   : > { %v3750_v1 = vpop.f32.mrf.mxu2 }
 0x840   : > { %v3751_v24 = vadd.f32 %v3750_v1, %v3736_v60 }
 0x841   : > { %v4278_v22 = vpop.f32.mrf.mxu3  ;;  %v4458_v39 = vpop.f32.mrf.mxu1 }
 0x842   : > { %v3834_v62 = vadd.f32 %v3833_v11, %v3751_v24  ;;  %v4459_v47 = vadd.f32 %v4458_v39, %v4444_v43  ;;  %v4446_v61 = vpop.f32.mrf.mxu0 }
 0x844   : > { %v3848_v33 = vadd.f32 %v3847_v7, %v3834_v62  ;;  %v6431_v35 = vpop.eup %6430 }
 0x845   : > { %v3536_v42 = vadd.f32 1.0, %v6431_v35 }
 0x847   : > { %v3752_v10 = vpop.f32.mrf.mxu2  ;;  %6432 = vrcp.f32 %v3536_v42  ;;  %vm3542_vm11 = vweird.f32 %v3536_v42  ;;  %v3546_v17 = vand.u32 2147483647, %v3536_v42 }
 0x848   : > { %v3753_v32 = vadd.f32 %v3752_v10, %v3738_v2 }
 0x849   : > { %v4280_v31 = vpop.f32.mrf.mxu3  ;;  %v4460_v56 = vpop.f32.mrf.mxu1  ;;  %vm3547_vm13 = vcmp.eq.f32.partialorder %v3546_v17, 8.507059e+37 }
 0x84a   : > { %v3836_v37 = vadd.f32 %v3835_v13, %v3753_v32  ;;  %v4461_v63 = vadd.f32 %v4460_v56, %v4446_v61 }
 0x84c   : > { %v3850_v44 = vadd.f32 %v3849_v9, %v3836_v37 }
 0x84d   : > { %v6433_v59 = vpop.eup %6432 }
 0x84e   : > { %v3538_v5 = vmul.f32 %v6433_v59, %v3536_v42  ;;  %vm3543_vm10 = vweird.f32 %v6433_v59 }
 0x84f   : > { %vm3544_vm12 = vmor %vm3542_vm11, %vm3543_vm10 }
 0x850   : > { %v3539_v10 = vsub.f32 1.0, %v3538_v5 }
 0x851   : > { %v4600_v46 = vpop.f32.mrf.mxu3 }
 0x852   : > { %v3540_v2 = vmul.f32 %v6433_v59, %v3539_v10 }
 0x854   : > { %v3541_v14 = vadd.f32 %v6433_v59, %v3540_v2 }
 0x856   : > { %v3545_v20 = vsel %vm3544_vm12, %v6433_v59, %v3541_v14 }
 0x857   : > { %v3972_v12 = vpop.f32.mrf.mxu2 }
 0x858   : > { %v3987_v30 = vadd.f32 %v3986_v16, %v3972_v12 }
 0x859   : > { %v4602_v3 = vpop.f32.mrf.mxu3 }
 0x85a   : > { %v3991_v34 = vadd.f32 %v3987_v30, %v3848_v33 }
 0x85c   : > { %v4156_v41 = vadd.f32 %v4152_v36, %v3991_v34 }
 0x85f   : > { %v3974_v15 = vpop.f32.mrf.mxu2 }
 0x860   : > { %v3989_v40 = vadd.f32 %v3988_v6, %v3974_v15  ;;  %v3548_v15 = vand.u32 2147483648, %v3536_v42 }
 0x862   : > { %v3992_v48 = vadd.f32 %v3989_v40, %v3850_v44  ;;  %v3549_v23 = vor.u32 1.1754944e-38, %v3548_v15 }
 0x864   : > { %v4157_v21 = vadd.f32 %v4154_v50, %v3992_v48  ;;  %v3550_v27 = vsel %vm3547_vm13, %v3549_v23, %v3545_v20 }
 0x865   : > { %v4650_v29 = vadd.f32 1.0, %v3550_v27 }
 0x867   : > { %v4292_v25 = vpop.f32.mrf.mxu2 }
 0x868   : > { %v4293_v38 = vadd.f32 %v4292_v25, %v4278_v22 }
 0x86a   : > { %v4297_v45 = vadd.f32 %v4293_v38, %v4156_v41 }
 0x86c   : > { %v4463_v52 = vadd.f32 %v4459_v47, %v4297_v45 }
 0x86f   : > { %v4294_v8 = vpop.f32.mrf.mxu2 }
 0x870   : > { %v4295_v51 = vadd.f32 %v4294_v8, %v4280_v31  ;;  %v4651_v8 = vperm.slane %v4650_v29, 0 }
 0x872   : > { %v4298_v57 = vadd.f32 %v4295_v51, %v4157_v21 }
 0x874   : > { %v4464_v1 = vadd.f32 %v4461_v63, %v4298_v57 }
 0x883   : > { %v4586_v49 = vpop.f32.mrf.mxu2 }
 0x884   : > { %v4601_v53 = vadd.f32 %v4600_v46, %v4586_v49 }
 0x886   : > { %v4605_v55 = vadd.f32 %v4601_v53, %v4463_v52 }
 0x888   : > { %v4610_v58 = vadd.f32 %v6429_v54, %v4605_v55 }
 0x88a   : > { %v4612_v0 = vsub.f32 0.0, %v4610_v58 }
 0x88b   : > { %v4588_v4 = vpop.f32.mrf.mxu2 }
 0x88c   : > { %v4614_v7 = vmul.f32 1.442695, %v4612_v0  ;;  %v4603_v9 = vadd.f32 %v4602_v3, %v4588_v4 }
 0x88e   : > { %6434 = vpow2.f32 %v4614_v7  ;;  %v4606_v60 = vadd.f32 %v4603_v9, %v4464_v1 }
 0x890   : > { %v4611_v11 = vadd.f32 %v6429_v54, %v4606_v60 }
 0x892   : > { %v4613_v16 = vsub.f32 0.0, %v4611_v11 }
 0x894   : > { %v6435_v12 = vpop.eup %6434  ;;  %v4616_v13 = vmul.f32 1.442695, %v4613_v16 }
 0x895   : > { %v4618_v6 = vadd.f32 1.0, %v6435_v12 }
 0x896   : > { %6436 = vpow2.f32 %v4616_v13 }
 0x897   : > { %6438 = vrcp.f32 %v4618_v6  ;;  %v4631_v62 = vand.u32 2147483648, %v4618_v6  ;;  %v4629_v31 = vand.u32 2147483647, %v4618_v6  ;;  %vm4625_vm15 = vweird.f32 %v4618_v6 }
 0x899   : > { %v4632_v34 = vor.u32 1.1754944e-38, %v4631_v62  ;;  %vm4630_vm5 = vcmp.eq.f32.partialorder %v4629_v31, 8.507059e+37 }
 0x89c   : > { %v6437_v19 = vpop.eup %6436 }
 0x89d   : > { %v6439_v22 = vpop.eup %6438  ;;  %v4619_v24 = vadd.f32 1.0, %v6437_v19 }
 0x89e   : > { %v4621_v25 = vmul.f32 %v6439_v22, %v4618_v6  ;;  %vm4626_vm14 = vweird.f32 %v6439_v22 }
 0x89f   : > { %6440 = vrcp.f32 %v4619_v24  ;;  %vm4627_vm4 = vmor %vm4625_vm15, %vm4626_vm14  ;;  %v4646_v40 = vand.u32 2147483648, %v4619_v24  ;;  %v4644_v43 = vand.u32 2147483647, %v4619_v24  ;;  %vm4640_vm8 = vweird.f32 %v4619_v24 }
 0x8a0   : > { %v4622_v28 = vsub.f32 1.0, %v4621_v25 }
 0x8a1   : > { %v4647_v45 = vor.u32 1.1754944e-38, %v4646_v40  ;;  %vm4645_vm0 = vcmp.eq.f32.partialorder %v4644_v43, 8.507059e+37 }
 0x8a2   : > { %v4623_v30 = vmul.f32 %v6439_v22, %v4622_v28 }
 0x8a4   : > { %v4624_v32 = vadd.f32 %v6439_v22, %v4623_v30 }
 0x8a5   : > { %v6441_v33 = vpop.eup %6440 }
 0x8a6   : > { %v4628_v35 = vsel %vm4627_vm4, %v6439_v22, %v4624_v32  ;;  %v4636_v36 = vmul.f32 %v6441_v33, %v4619_v24  ;;  %vm4641_vm7 = vweird.f32 %v6441_v33 }
 0x8a7   : > { %v4633_v37 = vsel %vm4630_vm5, %v4632_v34, %v4628_v35  ;;  %vm4642_vm1 = vmor %vm4640_vm8, %vm4641_vm7 }
 0x8a8   : > { %v4652_v38 = vadd.f32 %v4651_v8, %v4633_v37  ;;  %v4637_v39 = vsub.f32 1.0, %v4636_v36 }
 0x8aa   : > { %v4654_v41 = vmul.f32 %v4652_v38, %v7080_v18  ;;  %v4638_v42 = vmul.f32 %v6441_v33, %v4637_v39 }
 0x8ac   : > { %4656 = vst [vmem:[%s604_s24] sm:$0xff] %v4654_v41  ;;  %v4639_v44 = vadd.f32 %v6441_v33, %v4638_v42 }
 0x8ae   : > { %v4643_v46 = vsel %vm4642_vm1, %v6441_v33, %v4639_v44 }
 0x8af   : > { %v4648_v47 = vsel %vm4645_vm0, %v4647_v45, %v4643_v46 }
 0x8b0   : > { %v4653_v48 = vadd.f32 %v4651_v8, %v4648_v47 }
 0x8b2   : > { %v4655_v49 = vmul.f32 %v4653_v48, %v7085_v26 }
 0x8b4   : > { %4657 = vst [vmem:[%s604_s24 + $0x8] sm:$0xff] %v4655_v49 }
 0x8b5 PF: > { %s7414_s22 = sld [smem:[#allocation14_spill]] }
 0x8bb   : > { %s29_s21 = sadd.s32 1, %s7414_s22  }
 0x8bc   : > { %p26_p7 = scmp.ge.s32.totalorder %s29_s21, 4  }
 0x8be   :  { %28 = sbr.rel (!%p26_p7) target bundleno = 9 (0x9), region = 153 }
 0x8c3   :  { %4679 = vsyncpa [#allocation4], 1 }
 0x8c4   :  { %4681 = vsyncpa [#allocation4 + $0x1], 1 }
 0x8c5   :  { %4682 = vsyncpa [#allocation6], 1 }
 0x8c6   :  { %4683 = vsyncpa [#allocation9], 1 }

</bundles_post_ra>
